<compile_context>
chip_gen: v7x
topology: tpu7x:2x2x1
jax: 0.10.0
libtpu: 0.0.40
codegen_flags: <defaults>
</compile_context>

<pallas_src>
import functools
import math

import jax
import jax.numpy as jnp
from jax.experimental import pallas as pl
from jax.experimental.pallas import tpu as pltpu

BN_EPS = 1e-5


def _round_up(x, m):
    return (x + m - 1) // m * m


def _pick_row_tile(oh, ow, cout):
    """Largest output-row tile th (dividing oh) whose th*ow rows are a multiple
    of 8 and whose f32 accumulator stays <= ~128 KB (v5e vreg-file friendly)."""
    max_rows = max(64, min(512, 32768 // max(cout, 1)))
    best = None
    for th in range(1, oh + 1):
        rows = th * ow
        if oh % th == 0 and rows % 8 == 0 and rows <= max_rows:
            best = th
    if best is None:
        best = oh  # TODO(synk): tiny odd spatial dims (e.g. 7x7 with N>1) need padded row tiles.
    return best


# ------------------------------ Pallas kernels -------------------------------

def _taps_conv_kernel(x_ref, w_ref, y_ref, stat_ref, *scratch, taps, th, ow, cin):
    """Generic 'sum of shifted taps' convolution row-tile.

    x_ref   : (1, Hp, Wp, Cimg) bf16  image block (resident across row tiles)
    w_ref   : (T*cin, Cout)     bf16  tap-major weight matrix
    y_ref   : (th*ow, Cout)     bf16  conv output rows for this row tile
    stat_ref: (1, 1, 2*Cout)    f32   [sum | sum-of-squares] BN partials
    scratch : optional (th*ow, T*cin) bf16 VMEM im2col slab (when T > 1)

    Each tap t is a static (row_off, col_off, chan_off) contiguous slice of the
    image block; taps are written once into the slab so a single K = T*cin MXU
    matmul covers the whole tile (instead of T shallow K=cin matmuls).
    """
    r = pl.program_id(1)
    rows = th * ow
    row_base = r * th
    if len(taps) == 1:
        ro, co, cho = taps[0]
        a = x_ref[0, pl.ds(row_base + ro, th), co:co + ow, cho:cho + cin]
        a = a.reshape(rows, cin)
    else:
        slab = scratch[0]
        for t, (ro, co, cho) in enumerate(taps):
            slab[:, t * cin:(t + 1) * cin] = x_ref[
                0, pl.ds(row_base + ro, th), co:co + ow, cho:cho + cin
            ].reshape(rows, cin)
        a = slab[...]
    acc = jnp.dot(a, w_ref[...], preferred_element_type=jnp.float32)
    y_ref[...] = acc.astype(y_ref.dtype)
    cout = acc.shape[-1]
    stat_ref[...] = jnp.concatenate(
        [jnp.sum(acc, axis=0, keepdims=True),
         jnp.sum(acc * acc, axis=0, keepdims=True)],
        axis=-1).reshape(1, 1, 2 * cout)


def _bn_act_kernel(x_ref, sc_ref, sh_ref, o_ref, *, relu):
    y = x_ref[...].astype(jnp.float32) * sc_ref[...] + sh_ref[...]
    if relu:
        y = jnp.maximum(y, 0.0)
    o_ref[...] = y.astype(o_ref.dtype)


def _bn_add_relu_kernel(x_ref, r_ref, sc_ref, sh_ref, o_ref):
    y = (x_ref[...].astype(jnp.float32) * sc_ref[...] + sh_ref[...]
         + r_ref[...].astype(jnp.float32))
    o_ref[...] = jnp.maximum(y, 0.0).astype(o_ref.dtype)


# ------------------------------ kernel wrappers ------------------------------

def taps_conv(img, w_km, taps, oh, ow, cin):
    """Conv expressed as static taps over `img`.  Returns (y (M,Cout) bf16, stats)."""
    n, hp, wp, cimg = img.shape
    cout = w_km.shape[1]
    th = _pick_row_tile(oh, ow, cout)
    r_tiles = oh // th
    rows = th * ow
    m = n * oh * ow
    kernel = functools.partial(_taps_conv_kernel, taps=tuple(taps), th=th, ow=ow, cin=cin)
    scratch = [] if len(taps) == 1 else [pltpu.VMEM((rows, len(taps) * cin), jnp.bfloat16)]
    y, stats = pl.pallas_call(
        kernel,
        out_shape=(jax.ShapeDtypeStruct((m, cout), jnp.bfloat16),
                   jax.ShapeDtypeStruct((n * r_tiles, 1, 2 * cout), jnp.float32)),
        grid=(n, r_tiles),
        in_specs=[pl.BlockSpec((1, hp, wp, cimg), lambda i, r: (i, 0, 0, 0)),
                  pl.BlockSpec((len(taps) * cin, cout), lambda i, r: (0, 0))],
        out_specs=(pl.BlockSpec((rows, cout), lambda i, r: (i * r_tiles + r, 0)),
                   pl.BlockSpec((1, 1, 2 * cout), lambda i, r: (i * r_tiles + r, 0, 0))),
        scratch_shapes=scratch,
        compiler_params=pltpu.CompilerParams(
            dimension_semantics=("parallel", "parallel")),
    )(img, w_km)
    return y, stats


def bn_scale_shift(stats, count, gamma, beta):
    # TODO(synk): finalize over per-tile [sum|sumsq] partials is a few hundred
    # floats; left as plain-JAX glue rather than a dedicated Pallas kernel.
    c = gamma.shape[0]
    flat = stats.reshape(-1, 2 * c)
    s = jnp.sum(flat[:, :c], axis=0)
    q = jnp.sum(flat[:, c:], axis=0)
    mean = s / count
    var = jnp.maximum(q / count - mean * mean, 0.0)  # biased var (train-mode BN)
    inv = jax.lax.rsqrt(var + BN_EPS)
    scale = gamma * inv
    shift = beta - mean * scale
    return scale.reshape(1, c).astype(jnp.float32), shift.reshape(1, c).astype(jnp.float32)


def bn_apply(x_mc, scale, shift, *, relu, residual=None,
             out_dtype=jnp.bfloat16, row_tile=1024):
    """y = x*scale + shift (+ residual) (+ ReLU), lane-dense row tiles."""
    m, c = x_mc.shape
    pack = 1
    if c < 128:                      # pack spatial positions so last dim >= 128
        pack = max(1, 128 // c)
        while pack > 1 and m % pack != 0:
            pack -= 1
    cp = pack * c
    mr = m // pack
    x = x_mc.reshape(mr, cp)
    sc = jnp.tile(scale, (1, pack))
    sh = jnp.tile(shift, (1, pack))
    r = residual.reshape(mr, cp) if residual is not None else None
    te = min(row_tile, _round_up(mr, 8))
    mp = _round_up(mr, te)
    if mp != mr:
        x = jnp.pad(x, ((0, mp - mr), (0, 0)))
        if r is not None:
            r = jnp.pad(r, ((0, mp - mr), (0, 0)))
    nt = mp // te
    row_spec = pl.BlockSpec((te, cp), lambda i: (i, 0))
    vec_spec = pl.BlockSpec((1, cp), lambda i: (0, 0))
    cparams = pltpu.CompilerParams(dimension_semantics=("parallel",))
    if residual is None:
        out = pl.pallas_call(
            functools.partial(_bn_act_kernel, relu=relu),
            out_shape=jax.ShapeDtypeStruct((mp, cp), out_dtype),
            grid=(nt,), in_specs=[row_spec, vec_spec, vec_spec],
            out_specs=row_spec, compiler_params=cparams,
        )(x, sc, sh)
    else:
        out = pl.pallas_call(
            _bn_add_relu_kernel,
            out_shape=jax.ShapeDtypeStruct((mp, cp), out_dtype),
            grid=(nt,), in_specs=[row_spec, row_spec, vec_spec, vec_spec],
            out_specs=row_spec, compiler_params=cparams,
        )(x, r, sc, sh)
    if mp != mr:
        out = out[:mr]
    return out.reshape(m, c)


# ------------------------------ layout helpers -------------------------------

_TAPS_3X3_S1 = tuple((kh, kw, 0) for kh in range(3) for kw in range(3))


def _taps_3x3_s2(cin):
    # tap (kh, kw) of a stride-2/pad-1 3x3 conv over a space-to-depth'ed padded
    # image: row off kh//2, col off kw//2, channel group 2*(kh%2)+(kw%2).
    return tuple((kh // 2, kw // 2, (2 * (kh % 2) + (kw % 2)) * cin)
                 for kh in range(3) for kw in range(3))


def _w_to_km(w_oihw):
    cout, cin, kh, kw = w_oihw.shape
    return jnp.transpose(w_oihw, (2, 3, 1, 0)).reshape(kh * kw * cin, cout).astype(jnp.bfloat16)


def _space_to_depth2(x):
    n, h, w, c = x.shape
    x = x.reshape(n, h // 2, 2, w // 2, 2, c)
    x = jnp.transpose(x, (0, 1, 3, 2, 4, 5))
    return x.reshape(n, h // 2, w // 2, 4 * c)


# ------------------------------ BasicBlock forward ---------------------------

def basic_block_forward_nhwc(x, params):
    """conv3x3(s) -> BN -> ReLU -> conv3x3 -> BN -> (+ downsample(x)) -> ReLU.
    NHWC bf16 in -> NHWC f32 out."""
    stride = params['stride']
    n, h, w, cin = x.shape
    planes = params['conv1'].shape[0]

    # conv1 (+ fused BN-partials epilogue)
    if stride == 1:
        xp = jnp.pad(x, ((0, 0), (1, 1), (1, 1), (0, 0)))
        oh, ow = h, w
        y1, st1 = taps_conv(xp, _w_to_km(params['conv1']), _TAPS_3X3_S1, oh, ow, cin)
        s2d = None
    else:
        # stride-2 3x3: space-to-depth the padded image once (1x input pass);
        # every tap then is a contiguous slice -> no HBM im2col materialization.
        assert h % 2 == 0 and w % 2 == 0  # TODO(synk): odd spatial dims would need an im2col fallback.
        xp = jnp.pad(x, ((0, 0), (1, 1), (1, 1), (0, 0)))
        s2d = _space_to_depth2(xp)                       # (N, H/2+1, W/2+1, 4*Cin)
        oh, ow = h // 2, w // 2
        y1, st1 = taps_conv(s2d, _w_to_km(params['conv1']), _taps_3x3_s2(cin), oh, ow, cin)

    m = n * oh * ow
    sc1, sh1 = bn_scale_shift(st1, m, *params['bn1'])
    a1 = bn_apply(y1, sc1, sh1, relu=True, out_dtype=jnp.bfloat16)       # bf16 feeds the next MXU pass

    # conv2 (stride 1); its bn2 affine is fused into the final add+ReLU kernel.
    a1p = jnp.pad(a1.reshape(n, oh, ow, planes), ((0, 0), (1, 1), (1, 1), (0, 0)))
    y2, st2 = taps_conv(a1p, _w_to_km(params['conv2']), _TAPS_3X3_S1, oh, ow, planes)
    sc2, sh2 = bn_scale_shift(st2, m, *params['bn2'])

    # residual branch (kept as a bf16 stream into the fused add kernel)
    if 'down_conv' in params:
        wd = _w_to_km(params['down_conv'])               # (Cin, Cout)
        if stride == 2:
            # 1x1 stride-2 conv == single tap (row/col parity 1,1 group) of the same s2d tensor.
            yd, std = taps_conv(s2d, wd, ((0, 0, 3 * cin),), oh, ow, cin)
        else:
            yd, std = taps_conv(x, wd, ((0, 0, 0),), oh, ow, cin)
        scd, shd = bn_scale_shift(std, m, *params['down_bn'])
        res = bn_apply(yd, scd, shd, relu=False, out_dtype=jnp.bfloat16)
    else:
        res = x.reshape(m, cin)                          # identity residual, already bf16

    # bn2 affine + residual add + ReLU fused; f32 output to match the nn.Module dtype.
    out = bn_apply(y2, sc2, sh2, relu=True, residual=res, out_dtype=jnp.float32)
    return out.reshape(n, oh, ow, planes)


def basic_block_forward(x_nchw, params):
    # TODO(synk): in a full ResNet keep activations NHWC end-to-end; these two
    # transposes exist only to match the PyTorch NCHW interface of one block.
    x = jnp.transpose(x_nchw, (0, 2, 3, 1)).astype(jnp.bfloat16)
    out = basic_block_forward_nhwc(x, params)
    return jnp.transpose(out, (0, 3, 1, 2))


# ------------------------------ reference & params ---------------------------

def ref_basic_block(x_nchw, params):
    """Pure-JAX reference of the PyTorch BasicBlock (train-mode BatchNorm)."""
    x = x_nchw.astype(jnp.float32)

    def conv(v, w, stride, pad):
        return jax.lax.conv_general_dilated(
            v, w.astype(jnp.float32), (stride, stride), [(pad, pad), (pad, pad)],
            dimension_numbers=('NCHW', 'OIHW', 'NCHW'))

    def bn(v, gamma, beta):
        mean = jnp.mean(v, axis=(0, 2, 3), keepdims=True)
        var = jnp.mean(jnp.square(v - mean), axis=(0, 2, 3), keepdims=True)
        g = gamma.reshape(1, -1, 1, 1)
        b = beta.reshape(1, -1, 1, 1)
        return g * (v - mean) * jax.lax.rsqrt(var + BN_EPS) + b

    s = params['stride']
    out = jax.nn.relu(bn(conv(x, params['conv1'], s, 1), *params['bn1']))
    out = bn(conv(out, params['conv2'], 1, 1), *params['bn2'])
    res = x
    if 'down_conv' in params:
        res = bn(conv(x, params['down_conv'], s, 0), *params['down_bn'])
    return jax.nn.relu(out + res)


def init_basic_block_params(key, inplanes, planes, stride):
    k1, k2, k3 = jax.random.split(key, 3)

    def conv_w(k, cout, cin, kh, kw):
        std = math.sqrt(2.0 / (cout * kh * kw))  # kaiming_normal_, fan_out, relu
        return std * jax.random.normal(k, (cout, cin, kh, kw), jnp.float32)

    def bn_p(c):
        return (jnp.ones((c,), jnp.float32), jnp.zeros((c,), jnp.float32))

    p = {'stride': stride,
         'conv1': conv_w(k1, planes, inplanes, 3, 3), 'bn1': bn_p(planes),
         'conv2': conv_w(k2, planes, planes, 3, 3), 'bn2': bn_p(planes)}
    if stride != 1 or inplanes != planes:
        p['down_conv'] = conv_w(k3, planes, inplanes, 1, 1)
        p['down_bn'] = bn_p(planes)
    return p


if __name__ == "__main__":
    key = jax.random.PRNGKey(0)
    kp1, kp2, kx = jax.random.split(key, 3)
    x = jax.random.normal(kx, (2, 64, 16, 16), jnp.float32)    # NCHW, like PyTorch
    xq = x.astype(jnp.bfloat16).astype(jnp.float32)            # same quantized input for the reference

    # Identity-residual block (inplanes == planes, stride 1, downsample=None).
    params_id = init_basic_block_params(kp1, 64, 64, 1)
    y_id = jax.block_until_ready(jax.jit(lambda v: basic_block_forward(v, params_id))(x))
    assert y_id.shape == (2, 64, 16, 16), y_id.shape
    assert bool(jnp.all(jnp.isfinite(y_id)))
    r_id = ref_basic_block(xq, params_id)
    err = float(jnp.max(jnp.abs(y_id - r_id)))
    assert err < 0.1 * float(jnp.max(jnp.abs(r_id))) + 0.1, f"identity-block mismatch {err}"

    # Downsample block (stride 2, channel expansion), as used inside ResNet layers.
    params_dn = init_basic_block_params(kp2, 64, 128, 2)
    y_dn = jax.block_until_ready(jax.jit(lambda v: basic_block_forward(v, params_dn))(x))
    assert y_dn.shape == (2, 128, 8, 8), y_dn.shape
    assert bool(jnp.all(jnp.isfinite(y_dn)))
    r_dn = ref_basic_block(xq, params_dn)
    err = float(jnp.max(jnp.abs(y_dn - r_dn)))
    assert err < 0.1 * float(jnp.max(jnp.abs(r_dn))) + 0.1, f"downsample-block mismatch {err}"

    print("KERNEL_OK")
</pallas_src>

<mosaic_0001>
module attributes {stable_mosaic.version = 11 : i64} {
  func.func @_taps_conv_kernel(%arg0: i32, %arg1: i32, %arg2: memref<1x18x18x64xbf16, #tpu.memory_space<vmem>>, %arg3: memref<576x64xbf16, #tpu.memory_space<vmem>>, %arg4: memref<256x64xbf16, #tpu.memory_space<vmem>>, %arg5: memref<1x1x128xf32, #tpu.memory_space<vmem>>, %arg6: memref<256x576xbf16, #tpu.memory_space<vmem>>) attributes {dimension_semantics = [#tpu.dimension_semantics<parallel>, #tpu.dimension_semantics<parallel>], iteration_bounds = array<i64: 2, 1>, scalar_prefetch = 0 : i64, scratch_operands = 1 : i64, tpu.core_type = #tpu.core_type<tc>, window_params = [{transform_indices = @transform_0, window_bounds = array<i64: 1, 18, 18, 64>}, {pipeline_mode = #tpu.pipeline_mode<synchronous>, transform_indices = @transform_1, window_bounds = array<i64: 576, 64>}, {transform_indices = @transform_2, window_bounds = array<i64: 256, 64>}, {transform_indices = @transform_3, window_bounds = array<i64: 1, 1, 128>}]} {
    %c16_i32 = arith.constant 16 : i32
    %0 = arith.muli %arg1, %c16_i32 : i32
    %c0_i32 = arith.constant 0 : i32
    %1 = arith.addi %0, %c0_i32 : i32
    %c0 = arith.constant 0 : index
    %2 = arith.index_cast %1 : i32 to index
    %c0_0 = arith.constant 0 : index
    %c0_1 = arith.constant 0 : index
    %3 = vector.load %arg2[%c0, %2, %c0_0, %c0_1] : memref<1x18x18x64xbf16, #tpu.memory_space<vmem>>, vector<1x16x16x64xbf16>
    %4 = vector.shape_cast %3 : vector<1x16x16x64xbf16> to vector<16x16x64xbf16>
    %5 = vector.shape_cast %4 : vector<16x16x64xbf16> to vector<256x64xbf16>
    %c0_2 = arith.constant 0 : index
    %c0_3 = arith.constant 0 : index
    %6 = vector.load %arg6[%c0_2, %c0_3] : memref<256x576xbf16, #tpu.memory_space<vmem>>, vector<256x64xbf16>
    tpu.vector_store %arg6[%c0_2, %c0_3], %5 {strides = array<i32>} : memref<256x576xbf16, #tpu.memory_space<vmem>>, vector<256x64xbf16>,
    %c0_i32_4 = arith.constant 0 : i32
    %7 = arith.addi %0, %c0_i32_4 : i32
    %c0_5 = arith.constant 0 : index
    %8 = arith.index_cast %7 : i32 to index
    %c1 = arith.constant 1 : index
    %c0_6 = arith.constant 0 : index
    %9 = vector.load %arg2[%c0_5, %8, %c1, %c0_6] : memref<1x18x18x64xbf16, #tpu.memory_space<vmem>>, vector<1x16x16x64xbf16>
    %10 = vector.shape_cast %9 : vector<1x16x16x64xbf16> to vector<16x16x64xbf16>
    %11 = vector.shape_cast %10 : vector<16x16x64xbf16> to vector<256x64xbf16>
    %c0_7 = arith.constant 0 : index
    %c64 = arith.constant 64 : index
    %12 = vector.load %arg6[%c0_7, %c64] : memref<256x576xbf16, #tpu.memory_space<vmem>>, vector<256x64xbf16>
    tpu.vector_store %arg6[%c0_7, %c64], %11 {strides = array<i32>} : memref<256x576xbf16, #tpu.memory_space<vmem>>, vector<256x64xbf16>,
    %c0_i32_8 = arith.constant 0 : i32
    %13 = arith.addi %0, %c0_i32_8 : i32
    %c0_9 = arith.constant 0 : index
    %14 = arith.index_cast %13 : i32 to index
    %c2 = arith.constant 2 : index
    %c0_10 = arith.constant 0 : index
    %15 = vector.load %arg2[%c0_9, %14, %c2, %c0_10] : memref<1x18x18x64xbf16, #tpu.memory_space<vmem>>, vector<1x16x16x64xbf16>
    %16 = vector.shape_cast %15 : vector<1x16x16x64xbf16> to vector<16x16x64xbf16>
    %17 = vector.shape_cast %16 : vector<16x16x64xbf16> to vector<256x64xbf16>
    %c0_11 = arith.constant 0 : index
    %c128 = arith.constant 128 : index
    %18 = vector.load %arg6[%c0_11, %c128] : memref<256x576xbf16, #tpu.memory_space<vmem>>, vector<256x64xbf16>
    tpu.vector_store %arg6[%c0_11, %c128], %17 {strides = array<i32>} : memref<256x576xbf16, #tpu.memory_space<vmem>>, vector<256x64xbf16>,
    %c1_i32 = arith.constant 1 : i32
    %19 = arith.addi %0, %c1_i32 : i32
    %c0_12 = arith.constant 0 : index
    %20 = arith.index_cast %19 : i32 to index
    %c0_13 = arith.constant 0 : index
    %c0_14 = arith.constant 0 : index
    %21 = vector.load %arg2[%c0_12, %20, %c0_13, %c0_14] : memref<1x18x18x64xbf16, #tpu.memory_space<vmem>>, vector<1x16x16x64xbf16>
    %22 = vector.shape_cast %21 : vector<1x16x16x64xbf16> to vector<16x16x64xbf16>
    %23 = vector.shape_cast %22 : vector<16x16x64xbf16> to vector<256x64xbf16>
    %c0_15 = arith.constant 0 : index
    %c192 = arith.constant 192 : index
    %24 = vector.load %arg6[%c0_15, %c192] : memref<256x576xbf16, #tpu.memory_space<vmem>>, vector<256x64xbf16>
    tpu.vector_store %arg6[%c0_15, %c192], %23 {strides = array<i32>} : memref<256x576xbf16, #tpu.memory_space<vmem>>, vector<256x64xbf16>,
    %c1_i32_16 = arith.constant 1 : i32
    %25 = arith.addi %0, %c1_i32_16 : i32
    %c0_17 = arith.constant 0 : index
    %26 = arith.index_cast %25 : i32 to index
    %c1_18 = arith.constant 1 : index
    %c0_19 = arith.constant 0 : index
    %27 = vector.load %arg2[%c0_17, %26, %c1_18, %c0_19] : memref<1x18x18x64xbf16, #tpu.memory_space<vmem>>, vector<1x16x16x64xbf16>
    %28 = vector.shape_cast %27 : vector<1x16x16x64xbf16> to vector<16x16x64xbf16>
    %29 = vector.shape_cast %28 : vector<16x16x64xbf16> to vector<256x64xbf16>
    %c0_20 = arith.constant 0 : index
    %c256 = arith.constant 256 : index
    %30 = vector.load %arg6[%c0_20, %c256] : memref<256x576xbf16, #tpu.memory_space<vmem>>, vector<256x64xbf16>
    tpu.vector_store %arg6[%c0_20, %c256], %29 {strides = array<i32>} : memref<256x576xbf16, #tpu.memory_space<vmem>>, vector<256x64xbf16>,
    %c1_i32_21 = arith.constant 1 : i32
    %31 = arith.addi %0, %c1_i32_21 : i32
    %c0_22 = arith.constant 0 : index
    %32 = arith.index_cast %31 : i32 to index
    %c2_23 = arith.constant 2 : index
    %c0_24 = arith.constant 0 : index
    %33 = vector.load %arg2[%c0_22, %32, %c2_23, %c0_24] : memref<1x18x18x64xbf16, #tpu.memory_space<vmem>>, vector<1x16x16x64xbf16>
    %34 = vector.shape_cast %33 : vector<1x16x16x64xbf16> to vector<16x16x64xbf16>
    %35 = vector.shape_cast %34 : vector<16x16x64xbf16> to vector<256x64xbf16>
    %c0_25 = arith.constant 0 : index
    %c320 = arith.constant 320 : index
    %36 = vector.load %arg6[%c0_25, %c320] : memref<256x576xbf16, #tpu.memory_space<vmem>>, vector<256x64xbf16>
    tpu.vector_store %arg6[%c0_25, %c320], %35 {strides = array<i32>} : memref<256x576xbf16, #tpu.memory_space<vmem>>, vector<256x64xbf16>,
    %c2_i32 = arith.constant 2 : i32
    %37 = arith.addi %0, %c2_i32 : i32
    %c0_26 = arith.constant 0 : index
    %38 = arith.index_cast %37 : i32 to index
    %c0_27 = arith.constant 0 : index
    %c0_28 = arith.constant 0 : index
    %39 = vector.load %arg2[%c0_26, %38, %c0_27, %c0_28] : memref<1x18x18x64xbf16, #tpu.memory_space<vmem>>, vector<1x16x16x64xbf16>
    %40 = vector.shape_cast %39 : vector<1x16x16x64xbf16> to vector<16x16x64xbf16>
    %41 = vector.shape_cast %40 : vector<16x16x64xbf16> to vector<256x64xbf16>
    %c0_29 = arith.constant 0 : index
    %c384 = arith.constant 384 : index
    %42 = vector.load %arg6[%c0_29, %c384] : memref<256x576xbf16, #tpu.memory_space<vmem>>, vector<256x64xbf16>
    tpu.vector_store %arg6[%c0_29, %c384], %41 {strides = array<i32>} : memref<256x576xbf16, #tpu.memory_space<vmem>>, vector<256x64xbf16>,
    %c2_i32_30 = arith.constant 2 : i32
    %43 = arith.addi %0, %c2_i32_30 : i32
    %c0_31 = arith.constant 0 : index
    %44 = arith.index_cast %43 : i32 to index
    %c1_32 = arith.constant 1 : index
    %c0_33 = arith.constant 0 : index
    %45 = vector.load %arg2[%c0_31, %44, %c1_32, %c0_33] : memref<1x18x18x64xbf16, #tpu.memory_space<vmem>>, vector<1x16x16x64xbf16>
    %46 = vector.shape_cast %45 : vector<1x16x16x64xbf16> to vector<16x16x64xbf16>
    %47 = vector.shape_cast %46 : vector<16x16x64xbf16> to vector<256x64xbf16>
    %c0_34 = arith.constant 0 : index
    %c448 = arith.constant 448 : index
    %48 = vector.load %arg6[%c0_34, %c448] : memref<256x576xbf16, #tpu.memory_space<vmem>>, vector<256x64xbf16>
    tpu.vector_store %arg6[%c0_34, %c448], %47 {strides = array<i32>} : memref<256x576xbf16, #tpu.memory_space<vmem>>, vector<256x64xbf16>,
    %c2_i32_35 = arith.constant 2 : i32
    %49 = arith.addi %0, %c2_i32_35 : i32
    %c0_36 = arith.constant 0 : index
    %50 = arith.index_cast %49 : i32 to index
    %c2_37 = arith.constant 2 : index
    %c0_38 = arith.constant 0 : index
    %51 = vector.load %arg2[%c0_36, %50, %c2_37, %c0_38] : memref<1x18x18x64xbf16, #tpu.memory_space<vmem>>, vector<1x16x16x64xbf16>
    %52 = vector.shape_cast %51 : vector<1x16x16x64xbf16> to vector<16x16x64xbf16>
    %53 = vector.shape_cast %52 : vector<16x16x64xbf16> to vector<256x64xbf16>
    %c0_39 = arith.constant 0 : index
    %c512 = arith.constant 512 : index
    %54 = vector.load %arg6[%c0_39, %c512] : memref<256x576xbf16, #tpu.memory_space<vmem>>, vector<256x64xbf16>
    tpu.vector_store %arg6[%c0_39, %c512], %53 {strides = array<i32>} : memref<256x576xbf16, #tpu.memory_space<vmem>>, vector<256x64xbf16>,
    %c0_40 = arith.constant 0 : index
    %c0_41 = arith.constant 0 : index
    %55 = vector.load %arg6[%c0_40, %c0_41] : memref<256x576xbf16, #tpu.memory_space<vmem>>, vector<256x576xbf16>
    %c0_42 = arith.constant 0 : index
    %c0_43 = arith.constant 0 : index
    %56 = vector.load %arg3[%c0_42, %c0_43] : memref<576x64xbf16, #tpu.memory_space<vmem>>, vector<576x64xbf16>
    %cst = arith.constant dense<0.000000e+00> : vector<256x64xf32>
    %57 = tpu.matmul %55, %56, %cst {dimension_numbers = #tpu.dot_dimension_numbers<[1], [0], [0], [1], [0, 0, 1, 1], [], []>} : vector<256x576xbf16>, vector<576x64xbf16>, vector<256x64xf32> -> vector<256x64xf32>
    %58 = arith.truncf %57 : vector<256x64xf32> to vector<256x64xbf16>
    %c0_44 = arith.constant 0 : index
    %c0_45 = arith.constant 0 : index
    %59 = vector.load %arg4[%c0_44, %c0_45] : memref<256x64xbf16, #tpu.memory_space<vmem>>, vector<256x64xbf16>
    tpu.vector_store %arg4[%c0_44, %c0_45], %58 {strides = array<i32>} : memref<256x64xbf16, #tpu.memory_space<vmem>>, vector<256x64xbf16>,
    %cst_46 = arith.constant dense<0.000000e+00> : vector<64xf32>
    %60 = vector.multi_reduction <add>, %57, %cst_46 [0] : vector<256x64xf32> to vector<64xf32>
    %61 = vector.shape_cast %60 : vector<64xf32> to vector<1x64xf32>
    %62 = arith.mulf %57, %57 : vector<256x64xf32>
    %cst_47 = arith.constant dense<0.000000e+00> : vector<64xf32>
    %63 = vector.multi_reduction <add>, %62, %cst_47 [0] : vector<256x64xf32> to vector<64xf32>
    %64 = vector.shape_cast %63 : vector<64xf32> to vector<1x64xf32>
    %65 = tpu.concatenate %61, %64 in 1 : vector<1x64xf32>, vector<1x64xf32> -> vector<1x128xf32>
    %66 = vector.shape_cast %65 : vector<1x128xf32> to vector<1x1x128xf32>
    %c0_48 = arith.constant 0 : index
    %c0_49 = arith.constant 0 : index
    %c0_50 = arith.constant 0 : index
    %67 = vector.load %arg5[%c0_48, %c0_49, %c0_50] : memref<1x1x128xf32, #tpu.memory_space<vmem>>, vector<1x1x128xf32>
    tpu.vector_store %arg5[%c0_48, %c0_49, %c0_50], %66 {strides = array<i32>} : memref<1x1x128xf32, #tpu.memory_space<vmem>>, vector<1x1x128xf32>,
    return
  }
  func.func @transform_0(%arg0: i32, %arg1: i32) -> (i32, i32, i32, i32) {
    %c0_i32 = arith.constant 0 : i32
    %c0_i32_0 = arith.constant 0 : i32
    %c0_i32_1 = arith.constant 0 : i32
    %c0_i32_2 = arith.constant 0 : i32
    return %arg0, %c0_i32, %c0_i32_0, %c0_i32_1 : i32, i32, i32, i32
  }
  func.func @transform_1(%arg0: i32, %arg1: i32) -> (i32, i32) {
    %c0_i32 = arith.constant 0 : i32
    %c0_i32_0 = arith.constant 0 : i32
    %c0_i32_1 = arith.constant 0 : i32
    return %c0_i32, %c0_i32_0 : i32, i32
  }
  func.func @transform_2(%arg0: i32, %arg1: i32) -> (i32, i32) {
    %c1_i32 = arith.constant 1 : i32
    %0 = arith.muli %arg0, %c1_i32 : i32
    %1 = arith.addi %0, %arg1 : i32
    %c0_i32 = arith.constant 0 : i32
    %c0_i32_0 = arith.constant 0 : i32
    return %1, %c0_i32 : i32, i32
  }
  func.func @transform_3(%arg0: i32, %arg1: i32) -> (i32, i32, i32) {
    %c1_i32 = arith.constant 1 : i32
    %0 = arith.muli %arg0, %c1_i32 : i32
    %1 = arith.addi %0, %arg1 : i32
    %c0_i32 = arith.constant 0 : i32
    %c0_i32_0 = arith.constant 0 : i32
    %c0_i32_1 = arith.constant 0 : i32
    return %1, %c0_i32, %c0_i32_0 : i32, i32, i32
  }
}

module attributes {stable_mosaic.version = 11 : i64} {
  func.func @_bn_act_kernel(%arg0: i32, %arg1: memref<256x128xbf16, #tpu.memory_space<vmem>>, %arg2: memref<1x128xf32, #tpu.memory_space<vmem>>, %arg3: memref<1x128xf32, #tpu.memory_space<vmem>>, %arg4: memref<256x128xbf16, #tpu.memory_space<vmem>>) attributes {dimension_semantics = [#tpu.dimension_semantics<parallel>], iteration_bounds = array<i64: 1>, scalar_prefetch = 0 : i64, scratch_operands = 0 : i64, tpu.core_type = #tpu.core_type<tc>, window_params = [{transform_indices = @transform_0, window_bounds = array<i64: 256, 128>}, {pipeline_mode = #tpu.pipeline_mode<synchronous>, transform_indices = @transform_1, window_bounds = array<i64: 1, 128>}, {pipeline_mode = #tpu.pipeline_mode<synchronous>, transform_indices = @transform_2, window_bounds = array<i64: 1, 128>}, {transform_indices = @transform_3, window_bounds = array<i64: 256, 128>}]} {
    %c0 = arith.constant 0 : index
    %c0_0 = arith.constant 0 : index
    %0 = vector.load %arg1[%c0, %c0_0] : memref<256x128xbf16, #tpu.memory_space<vmem>>, vector<256x128xbf16>
    %1 = arith.extf %0 : vector<256x128xbf16> to vector<256x128xf32>
    %c0_1 = arith.constant 0 : index
    %c0_2 = arith.constant 0 : index
    %2 = vector.load %arg2[%c0_1, %c0_2] : memref<1x128xf32, #tpu.memory_space<vmem>>, vector<1x128xf32>
    %3 = vector.broadcast %2 : vector<1x128xf32> to vector<256x128xf32>
    %4 = arith.mulf %1, %3 : vector<256x128xf32>
    %c0_3 = arith.constant 0 : index
    %c0_4 = arith.constant 0 : index
    %5 = vector.load %arg3[%c0_3, %c0_4] : memref<1x128xf32, #tpu.memory_space<vmem>>, vector<1x128xf32>
    %6 = vector.broadcast %5 : vector<1x128xf32> to vector<256x128xf32>
    %7 = arith.addf %4, %6 : vector<256x128xf32>
    %cst = arith.constant 0.000000e+00 : f32
    %8 = vector.broadcast %cst : f32 to vector<256x128xf32>
    %9 = arith.maximumf %7, %8 : vector<256x128xf32>
    %10 = arith.truncf %9 : vector<256x128xf32> to vector<256x128xbf16>
    %c0_5 = arith.constant 0 : index
    %c0_6 = arith.constant 0 : index
    %11 = vector.load %arg4[%c0_5, %c0_6] : memref<256x128xbf16, #tpu.memory_space<vmem>>, vector<256x128xbf16>
    tpu.vector_store %arg4[%c0_5, %c0_6], %10 {strides = array<i32>} : memref<256x128xbf16, #tpu.memory_space<vmem>>, vector<256x128xbf16>,
    return
  }
  func.func @transform_0(%arg0: i32) -> (i32, i32) {
    %c0_i32 = arith.constant 0 : i32
    %c0_i32_0 = arith.constant 0 : i32
    return %arg0, %c0_i32 : i32, i32
  }
  func.func @transform_1(%arg0: i32) -> (i32, i32) {
    %c0_i32 = arith.constant 0 : i32
    %c0_i32_0 = arith.constant 0 : i32
    %c0_i32_1 = arith.constant 0 : i32
    return %c0_i32, %c0_i32_0 : i32, i32
  }
  func.func @transform_2(%arg0: i32) -> (i32, i32) {
    %c0_i32 = arith.constant 0 : i32
    %c0_i32_0 = arith.constant 0 : i32
    %c0_i32_1 = arith.constant 0 : i32
    return %c0_i32, %c0_i32_0 : i32, i32
  }
  func.func @transform_3(%arg0: i32) -> (i32, i32) {
    %c0_i32 = arith.constant 0 : i32
    %c0_i32_0 = arith.constant 0 : i32
    return %arg0, %c0_i32 : i32, i32
  }
}

module attributes {stable_mosaic.version = 11 : i64} {
  func.func @_bn_add_relu_kernel(%arg0: i32, %arg1: memref<256x128xbf16, #tpu.memory_space<vmem>>, %arg2: memref<256x128xbf16, #tpu.memory_space<vmem>>, %arg3: memref<1x128xf32, #tpu.memory_space<vmem>>, %arg4: memref<1x128xf32, #tpu.memory_space<vmem>>, %arg5: memref<256x128xf32, #tpu.memory_space<vmem>>) attributes {dimension_semantics = [#tpu.dimension_semantics<parallel>], iteration_bounds = array<i64: 1>, scalar_prefetch = 0 : i64, scratch_operands = 0 : i64, tpu.core_type = #tpu.core_type<tc>, window_params = [{transform_indices = @transform_0, window_bounds = array<i64: 256, 128>}, {transform_indices = @transform_1, window_bounds = array<i64: 256, 128>}, {pipeline_mode = #tpu.pipeline_mode<synchronous>, transform_indices = @transform_2, window_bounds = array<i64: 1, 128>}, {pipeline_mode = #tpu.pipeline_mode<synchronous>, transform_indices = @transform_3, window_bounds = array<i64: 1, 128>}, {transform_indices = @transform_4, window_bounds = array<i64: 256, 128>}]} {
    %c0 = arith.constant 0 : index
    %c0_0 = arith.constant 0 : index
    %0 = vector.load %arg1[%c0, %c0_0] : memref<256x128xbf16, #tpu.memory_space<vmem>>, vector<256x128xbf16>
    %1 = arith.extf %0 : vector<256x128xbf16> to vector<256x128xf32>
    %c0_1 = arith.constant 0 : index
    %c0_2 = arith.constant 0 : index
    %2 = vector.load %arg3[%c0_1, %c0_2] : memref<1x128xf32, #tpu.memory_space<vmem>>, vector<1x128xf32>
    %3 = vector.broadcast %2 : vector<1x128xf32> to vector<256x128xf32>
    %4 = arith.mulf %1, %3 : vector<256x128xf32>
    %c0_3 = arith.constant 0 : index
    %c0_4 = arith.constant 0 : index
    %5 = vector.load %arg4[%c0_3, %c0_4] : memref<1x128xf32, #tpu.memory_space<vmem>>, vector<1x128xf32>
    %6 = vector.broadcast %5 : vector<1x128xf32> to vector<256x128xf32>
    %7 = arith.addf %4, %6 : vector<256x128xf32>
    %c0_5 = arith.constant 0 : index
    %c0_6 = arith.constant 0 : index
    %8 = vector.load %arg2[%c0_5, %c0_6] : memref<256x128xbf16, #tpu.memory_space<vmem>>, vector<256x128xbf16>
    %9 = arith.extf %8 : vector<256x128xbf16> to vector<256x128xf32>
    %10 = arith.addf %7, %9 : vector<256x128xf32>
    %cst = arith.constant 0.000000e+00 : f32
    %11 = vector.broadcast %cst : f32 to vector<256x128xf32>
    %12 = arith.maximumf %10, %11 : vector<256x128xf32>
    %c0_7 = arith.constant 0 : index
    %c0_8 = arith.constant 0 : index
    %13 = vector.load %arg5[%c0_7, %c0_8] : memref<256x128xf32, #tpu.memory_space<vmem>>, vector<256x128xf32>
    tpu.vector_store %arg5[%c0_7, %c0_8], %12 {strides = array<i32>} : memref<256x128xf32, #tpu.memory_space<vmem>>, vector<256x128xf32>,
    return
  }
  func.func @transform_0(%arg0: i32) -> (i32, i32) {
    %c0_i32 = arith.constant 0 : i32
    %c0_i32_0 = arith.constant 0 : i32
    return %arg0, %c0_i32 : i32, i32
  }
  func.func @transform_1(%arg0: i32) -> (i32, i32) {
    %c0_i32 = arith.constant 0 : i32
    %c0_i32_0 = arith.constant 0 : i32
    return %arg0, %c0_i32 : i32, i32
  }
  func.func @transform_2(%arg0: i32) -> (i32, i32) {
    %c0_i32 = arith.constant 0 : i32
    %c0_i32_0 = arith.constant 0 : i32
    %c0_i32_1 = arith.constant 0 : i32
    return %c0_i32, %c0_i32_0 : i32, i32
  }
  func.func @transform_3(%arg0: i32) -> (i32, i32) {
    %c0_i32 = arith.constant 0 : i32
    %c0_i32_0 = arith.constant 0 : i32
    %c0_i32_1 = arith.constant 0 : i32
    return %c0_i32, %c0_i32_0 : i32, i32
  }
  func.func @transform_4(%arg0: i32) -> (i32, i32) {
    %c0_i32 = arith.constant 0 : i32
    %c0_i32_0 = arith.constant 0 : i32
    return %arg0, %c0_i32 : i32, i32
  }
}

</mosaic_0001>

<bundles_post_ra>
// kernel: _lambda_.5
= control target key start
LH: loop header
LB: loop body
LE: loop exit
PB: predicated region body
PF: predicated region fallthrough
CT: control target
= control target key end

     0   :  { %s782_s0 = inlined_call_operand.vmem [shape: bf16[256,128], index: 0, kind: input, shape index: {}]   ;;  %s783_s1 = inlined_call_operand.vmem [shape: f32[1,128], index: 1, kind: input, shape index: {}]   ;;  %s784_s2 = inlined_call_operand.vmem [shape: f32[1,128], index: 2, kind: input, shape index: {}]   ;;  %s785_s3 = inlined_call_operand.vmem [shape: bf16[256,128], index: 3, kind: output, shape index: {}]  }
   0x1   :  { %v419_v0 = vld [vmem:[%s782_s0] sm:$0xff]   ;;  %v562_v4 = vld [vmem:[%s782_s0 + $0x8] sm:$0xff]   ;;  %v563_v5 = vld [vmem:[%s782_s0 + $0x10] sm:$0xff]  }
   0x2   :  { %v618_v1 = vld [vmem:[%s783_s1] ss:$0 sm:$0xff]  ;;  %v420_v2 = vunpack.c.l.bf16 %v419_v0  ;;  %v421_v3 = vunpack.c.h.bf16 %v419_v0  ;;  %v564_v6 = vld [vmem:[%s782_s0 + $0x18] sm:$0xff]   ;;  %v424_v8 = vunpack.c.l.bf16 %v562_v4  ;;  %v425_v9 = vunpack.c.h.bf16 %v562_v4  ;;  %v566_v33 = vld [vmem:[%s782_s0 + $0x28] sm:$0xff]  }
   0x3   :  { %v632_v7 = vld [vmem:[%s784_s2] ss:$0 sm:$0xff]  ;;  %v428_v10 = vunpack.c.l.bf16 %v563_v5  ;;  %v429_v11 = vunpack.c.h.bf16 %v563_v5  ;;  %v432_v14 = vunpack.c.l.bf16 %v564_v6  ;;  %v433_v15 = vunpack.c.h.bf16 %v564_v6  ;;  %v567_v38 = vld [vmem:[%s782_s0 + $0x30] sm:$0xff]   ;;  %v568_v43 = vld [vmem:[%s782_s0 + $0x38] sm:$0xff]  }
   0x4   :  { %v85_v12 = vmul.f32 %v420_v2, %v618_v1  ;;  %v86_v13 = vmul.f32 %v421_v3, %v618_v1  ;;  %v87_v16 = vmul.f32 %v424_v8, %v618_v1  ;;  %v88_v17 = vmul.f32 %v425_v9, %v618_v1  ;;  %v565_v28 = vld [vmem:[%s782_s0 + $0x20] sm:$0xff]  }
   0x5   :  { %v89_v18 = vmul.f32 %v428_v10, %v618_v1  ;;  %v90_v19 = vmul.f32 %v429_v11, %v618_v1  ;;  %v91_v22 = vmul.f32 %v432_v14, %v618_v1  ;;  %v92_v23 = vmul.f32 %v433_v15, %v618_v1  ;;  %v569_v0 = vld [vmem:[%s782_s0 + $0x40] sm:$0xff]   ;;  %v570_v11 = vld [vmem:[%s782_s0 + $0x48] sm:$0xff]  }
   0x6   :  { %v124_v20 = vadd.f32 %v632_v7, %v85_v12  ;;  %v125_v21 = vadd.f32 %v632_v7, %v86_v13  ;;  %v126_v24 = vadd.f32 %v632_v7, %v87_v16  ;;  %v127_v25 = vadd.f32 %v632_v7, %v88_v17  ;;  %v571_v16 = vld [vmem:[%s782_s0 + $0x50] sm:$0xff]  }
   0x7   :  { %v128_v26 = vadd.f32 %v632_v7, %v89_v18  ;;  %v129_v27 = vadd.f32 %v632_v7, %v90_v19  ;;  %v130_v31 = vadd.f32 %v632_v7, %v91_v22  ;;  %v131_v32 = vadd.f32 %v632_v7, %v92_v23 }
   0x8   :  { %v156_v29 = vmax.f32 %v124_v20, 0.0  ;;  %v157_v30 = vmax.f32 %v125_v21, 0.0  ;;  %v158_v34 = vmax.f32 %v126_v24, 0.0  ;;  %v159_v35 = vmax.f32 %v127_v25, 0.0  ;;  %v572_v25 = vld [vmem:[%s782_s0 + $0x58] sm:$0xff]  }
   0x9   :  { %v160_v36 = vmax.f32 %v128_v26, 0.0  ;;  %v161_v37 = vmax.f32 %v129_v27, 0.0  ;;  %v162_v40 = vmax.f32 %v130_v31, 0.0  ;;  %v163_v41 = vmax.f32 %v131_v32, 0.0 }
   0xa   :  { %v485_v39 = vpack.c.bf16 %v157_v30, %v156_v29  ;;  %v436_v42 = vunpack.c.l.bf16 %v565_v28  ;;  %v490_v44 = vpack.c.bf16 %v159_v35, %v158_v34  ;;  %v437_v46 = vunpack.c.h.bf16 %v565_v28 }
   0xb   :  { %v495_v45 = vpack.c.bf16 %v161_v37, %v160_v36  ;;  %v440_v47 = vunpack.c.l.bf16 %v566_v33  ;;  %v500_v48 = vpack.c.bf16 %v163_v41, %v162_v40  ;;  %v441_v50 = vunpack.c.h.bf16 %v566_v33 }
   0xc   :  { %486 = vst [vmem:[%s785_s3] sm:$0xff] %v485_v39   ;;  %v93_v49 = vmul.f32 %v436_v42, %v618_v1  ;;  %v444_v51 = vunpack.c.l.bf16 %v567_v38  ;;  %577 = vst [vmem:[%s785_s3 + $0x8] sm:$0xff] %v490_v44   ;;  %v94_v52 = vmul.f32 %v437_v46, %v618_v1  ;;  %v445_v54 = vunpack.c.h.bf16 %v567_v38  ;;  %v573_v38 = vld [vmem:[%s782_s0 + $0x60] sm:$0xff]  }
   0xd   :  { %578 = vst [vmem:[%s785_s3 + $0x10] sm:$0xff] %v495_v45   ;;  %v95_v53 = vmul.f32 %v440_v47, %v618_v1  ;;  %v448_v55 = vunpack.c.l.bf16 %v568_v43  ;;  %579 = vst [vmem:[%s785_s3 + $0x18] sm:$0xff] %v500_v48   ;;  %v96_v57 = vmul.f32 %v441_v50, %v618_v1  ;;  %v449_v59 = vunpack.c.h.bf16 %v568_v43 }
   0xe   :  { %v132_v56 = vadd.f32 %v632_v7, %v93_v49  ;;  %v97_v58 = vmul.f32 %v444_v51, %v618_v1  ;;  %v133_v60 = vadd.f32 %v632_v7, %v94_v52  ;;  %v98_v62 = vmul.f32 %v445_v54, %v618_v1  ;;  %v574_v51 = vld [vmem:[%s782_s0 + $0x68] sm:$0xff]  }
   0xf   :  { %v134_v61 = vadd.f32 %v632_v7, %v95_v53  ;;  %v99_v63 = vmul.f32 %v448_v55, %v618_v1  ;;  %v135_v3 = vadd.f32 %v632_v7, %v96_v57  ;;  %v100_v5 = vmul.f32 %v449_v59, %v618_v1 }
  0x10   :  { %v164_v2 = vmax.f32 %v132_v56, 0.0  ;;  %v136_v4 = vadd.f32 %v632_v7, %v97_v58  ;;  %v165_v6 = vmax.f32 %v133_v60, 0.0  ;;  %v137_v9 = vadd.f32 %v632_v7, %v98_v62  ;;  %v575_v60 = vld [vmem:[%s782_s0 + $0x70] sm:$0xff]  }
  0x11   :  { %v166_v8 = vmax.f32 %v134_v61, 0.0  ;;  %v138_v10 = vadd.f32 %v632_v7, %v99_v63  ;;  %v167_v12 = vmax.f32 %v135_v3, 0.0  ;;  %v139_v14 = vadd.f32 %v632_v7, %v100_v5 }
  0x12   :  { %v168_v13 = vmax.f32 %v136_v4, 0.0  ;;  %v452_v15 = vunpack.c.l.bf16 %v569_v0  ;;  %v505_v17 = vpack.c.bf16 %v165_v6, %v164_v2  ;;  %v169_v18 = vmax.f32 %v137_v9, 0.0  ;;  %v576_v2 = vld [vmem:[%s782_s0 + $0x78] sm:$0xff]  }
  0x13   :  { %v170_v19 = vmax.f32 %v138_v10, 0.0  ;;  %v453_v20 = vunpack.c.h.bf16 %v569_v0  ;;  %v510_v21 = vpack.c.bf16 %v167_v12, %v166_v8  ;;  %v171_v22 = vmax.f32 %v139_v14, 0.0 }
  0x14   :  { %v101_v23 = vmul.f32 %v452_v15, %v618_v1  ;;  %v456_v24 = vunpack.c.l.bf16 %v570_v11  ;;  %580 = vst [vmem:[%s785_s3 + $0x20] sm:$0xff] %v505_v17   ;;  %v515_v26 = vpack.c.bf16 %v169_v18, %v168_v13  ;;  %v457_v28 = vunpack.c.h.bf16 %v570_v11 }
  0x15   :  { %v102_v27 = vmul.f32 %v453_v20, %v618_v1  ;;  %v460_v29 = vunpack.c.l.bf16 %v571_v16  ;;  %581 = vst [vmem:[%s785_s3 + $0x28] sm:$0xff] %v510_v21   ;;  %v520_v30 = vpack.c.bf16 %v171_v22, %v170_v19  ;;  %v461_v33 = vunpack.c.h.bf16 %v571_v16 }
  0x16   :  { %v140_v31 = vadd.f32 %v632_v7, %v101_v23  ;;  %v103_v32 = vmul.f32 %v456_v24, %v618_v1  ;;  %582 = vst [vmem:[%s785_s3 + $0x30] sm:$0xff] %v515_v26   ;;  %v104_v35 = vmul.f32 %v457_v28, %v618_v1  ;;  %v464_v37 = vunpack.c.l.bf16 %v572_v25 }
  0x17   :  { %v141_v34 = vadd.f32 %v632_v7, %v102_v27  ;;  %v105_v36 = vmul.f32 %v460_v29, %v618_v1  ;;  %583 = vst [vmem:[%s785_s3 + $0x38] sm:$0xff] %v520_v30   ;;  %v106_v41 = vmul.f32 %v461_v33, %v618_v1  ;;  %v465_v42 = vunpack.c.h.bf16 %v572_v25 }
  0x18   :  { %v172_v39 = vmax.f32 %v140_v31, 0.0  ;;  %v142_v40 = vadd.f32 %v632_v7, %v103_v32  ;;  %v143_v44 = vadd.f32 %v632_v7, %v104_v35  ;;  %v107_v46 = vmul.f32 %v464_v37, %v618_v1 }
  0x19   :  { %v173_v43 = vmax.f32 %v141_v34, 0.0  ;;  %v144_v45 = vadd.f32 %v632_v7, %v105_v36  ;;  %v145_v48 = vadd.f32 %v632_v7, %v106_v41  ;;  %v108_v49 = vmul.f32 %v465_v42, %v618_v1 }
  0x1a   :  { %v174_v47 = vmax.f32 %v142_v40, 0.0  ;;  %v468_v50 = vunpack.c.l.bf16 %v573_v38  ;;  %v175_v53 = vmax.f32 %v143_v44, 0.0  ;;  %v146_v55 = vadd.f32 %v632_v7, %v107_v46 }
  0x1b   :  { %v525_v52 = vpack.c.bf16 %v173_v43, %v172_v39  ;;  %v176_v54 = vmax.f32 %v144_v45, 0.0  ;;  %v177_v56 = vmax.f32 %v145_v48, 0.0  ;;  %v147_v57 = vadd.f32 %v632_v7, %v108_v49 }
  0x1c   :  { %v469_v58 = vunpack.c.h.bf16 %v573_v38  ;;  %v109_v59 = vmul.f32 %v468_v50, %v618_v1  ;;  %v530_v61 = vpack.c.bf16 %v175_v53, %v174_v47  ;;  %v178_v62 = vmax.f32 %v146_v55, 0.0 }
  0x1d   :  { %584 = vst [vmem:[%s785_s3 + $0x40] sm:$0xff] %v525_v52   ;;  %v472_v63 = vunpack.c.l.bf16 %v574_v51  ;;  %v473_v0 = vunpack.c.h.bf16 %v574_v51  ;;  %v535_v3 = vpack.c.bf16 %v177_v56, %v176_v54  ;;  %v179_v4 = vmax.f32 %v147_v57, 0.0 }
  0x1e   :  { %v110_v5 = vmul.f32 %v469_v58, %v618_v1  ;;  %v148_v6 = vadd.f32 %v632_v7, %v109_v59  ;;  %585 = vst [vmem:[%s785_s3 + $0x48] sm:$0xff] %v530_v61   ;;  %v476_v10 = vunpack.c.l.bf16 %v575_v60  ;;  %v477_v11 = vunpack.c.h.bf16 %v575_v60 }
  0x1f   :  { %v111_v8 = vmul.f32 %v472_v63, %v618_v1  ;;  %v112_v9 = vmul.f32 %v473_v0, %v618_v1  ;;  %586 = vst [vmem:[%s785_s3 + $0x50] sm:$0xff] %v535_v3   ;;  %v540_v12 = vpack.c.bf16 %v179_v4, %v178_v62  ;;  %v480_v15 = vunpack.c.l.bf16 %v576_v2 }
  0x20   :  { %v149_v13 = vadd.f32 %v632_v7, %v110_v5  ;;  %v180_v14 = vmax.f32 %v148_v6, 0.0  ;;  %v113_v18 = vmul.f32 %v476_v10, %v618_v1  ;;  %v114_v19 = vmul.f32 %v477_v11, %v618_v1 }
  0x21   :  { %v150_v16 = vadd.f32 %v632_v7, %v111_v8  ;;  %v151_v17 = vadd.f32 %v632_v7, %v112_v9  ;;  %587 = vst [vmem:[%s785_s3 + $0x58] sm:$0xff] %v540_v12   ;;  %v481_v21 = vunpack.c.h.bf16 %v576_v2  ;;  %v115_v22 = vmul.f32 %v480_v15, %v618_v1 }
  0x22   :  { %v181_v20 = vmax.f32 %v149_v13, 0.0  ;;  %v152_v25 = vadd.f32 %v632_v7, %v113_v18  ;;  %v153_v26 = vadd.f32 %v632_v7, %v114_v19 }
  0x23   :  { %v182_v23 = vmax.f32 %v150_v16, 0.0  ;;  %v183_v24 = vmax.f32 %v151_v17, 0.0  ;;  %v116_v28 = vmul.f32 %v481_v21, %v618_v1  ;;  %v154_v29 = vadd.f32 %v632_v7, %v115_v22 }
  0x24   :  { %v545_v27 = vpack.c.bf16 %v181_v20, %v180_v14  ;;  %v184_v31 = vmax.f32 %v152_v25, 0.0  ;;  %v185_v32 = vmax.f32 %v153_v26, 0.0 }
  0x25   :  { %v550_v30 = vpack.c.bf16 %v183_v24, %v182_v23  ;;  %v155_v33 = vadd.f32 %v632_v7, %v116_v28  ;;  %v186_v34 = vmax.f32 %v154_v29, 0.0 }
  0x26   :  { %588 = vst [vmem:[%s785_s3 + $0x60] sm:$0xff] %v545_v27   ;;  %v555_v35 = vpack.c.bf16 %v185_v32, %v184_v31 }
  0x27   :  { %589 = vst [vmem:[%s785_s3 + $0x68] sm:$0xff] %v550_v30   ;;  %v187_v36 = vmax.f32 %v155_v33, 0.0 }
  0x28   :  { %590 = vst [vmem:[%s785_s3 + $0x70] sm:$0xff] %v555_v35  }
  0x29   :  { %v560_v1 = vpack.c.bf16 %v187_v36, %v186_v34 }
  0x2b   :  { %591 = vst [vmem:[%s785_s3 + $0x78] sm:$0xff] %v560_v1  }

// kernel: _lambda_.7
= control target key start
LH: loop header
LB: loop body
LE: loop exit
PB: predicated region body
PF: predicated region fallthrough
CT: control target
= control target key end

     0   :  { %s774_s0 = inlined_call_operand.vmem [shape: bf16[256,128], index: 0, kind: input, shape index: {}]   ;;  %s775_s1 = inlined_call_operand.vmem [shape: bf16[256,128], index: 1, kind: input, shape index: {}]   ;;  %s776_s2 = inlined_call_operand.vmem [shape: f32[1,128], index: 2, kind: input, shape index: {}]   ;;  %s777_s3 = inlined_call_operand.vmem [shape: f32[1,128], index: 3, kind: input, shape index: {}]   ;;  %s778_s4 = inlined_call_operand.vmem [shape: f32[256,128], index: 4, kind: output, shape index: {}]  }
   0x1   :  { %v326_v0 = vld [vmem:[%s774_s0] sm:$0xff]   ;;  %v453_v5 = vld [vmem:[%s774_s0 + $0x8] sm:$0xff]   ;;  %v454_v12 = vld [vmem:[%s774_s0 + $0x10] sm:$0xff]  }
   0x2   :  { %v514_v1 = vld [vmem:[%s776_s2] ss:$0 sm:$0xff]  ;;  %v327_v2 = vunpack.c.l.bf16 %v326_v0  ;;  %v328_v4 = vunpack.c.h.bf16 %v326_v0  ;;  %v468_v6 = vld [vmem:[%s775_s1 + $0x8] sm:$0xff]   ;;  %v331_v10 = vunpack.c.l.bf16 %v453_v5  ;;  %v469_v13 = vld [vmem:[%s775_s1 + $0x10] sm:$0xff]   ;;  %v332_v16 = vunpack.c.h.bf16 %v453_v5 }
   0x3   :  { %v390_v3 = vld [vmem:[%s775_s1] sm:$0xff]   ;;  %v395_v11 = vunpack.c.l.bf16 %v468_v6  ;;  %v396_v17 = vunpack.c.h.bf16 %v468_v6  ;;  %v455_v18 = vld [vmem:[%s774_s0 + $0x18] sm:$0xff]   ;;  %v335_v20 = vunpack.c.l.bf16 %v454_v12  ;;  %v399_v21 = vunpack.c.l.bf16 %v469_v13  ;;  %v457_v54 = vld [vmem:[%s774_s0 + $0x28] sm:$0xff]  }
   0x4   :  { %v528_v7 = vld [vmem:[%s777_s3] ss:$0 sm:$0xff]  ;;  %v391_v8 = vunpack.c.l.bf16 %v390_v3  ;;  %v392_v9 = vunpack.c.h.bf16 %v390_v3  ;;  %v88_v14 = vmul.f32 %v327_v2, %v514_v1  ;;  %v89_v15 = vmul.f32 %v328_v4, %v514_v1  ;;  %v470_v23 = vld [vmem:[%s775_s1 + $0x18] sm:$0xff]   ;;  %v472_v55 = vld [vmem:[%s775_s1 + $0x28] sm:$0xff]  }
   0x5   :  { %v90_v19 = vmul.f32 %v331_v10, %v514_v1  ;;  %v336_v22 = vunpack.c.h.bf16 %v454_v12  ;;  %v91_v26 = vmul.f32 %v332_v16, %v514_v1  ;;  %v400_v27 = vunpack.c.h.bf16 %v469_v13  ;;  %v456_v40 = vld [vmem:[%s774_s0 + $0x20] sm:$0xff]   ;;  %v458_v0 = vld [vmem:[%s774_s0 + $0x30] sm:$0xff]   ;;  %v459_v16 = vld [vmem:[%s774_s0 + $0x38] sm:$0xff]  }
   0x6   :  { %v127_v24 = vadd.f32 %v528_v7, %v88_v14  ;;  %v128_v25 = vadd.f32 %v528_v7, %v89_v15  ;;  %v92_v29 = vmul.f32 %v335_v20, %v514_v1  ;;  %v339_v31 = vunpack.c.l.bf16 %v455_v18  ;;  %v471_v45 = vld [vmem:[%s775_s1 + $0x20] sm:$0xff]   ;;  %v473_v2 = vld [vmem:[%s775_s1 + $0x30] sm:$0xff]  }
   0x7   :  { %v129_v28 = vadd.f32 %v528_v7, %v90_v19  ;;  %v93_v30 = vmul.f32 %v336_v22, %v514_v1  ;;  %v130_v34 = vadd.f32 %v528_v7, %v91_v26  ;;  %v403_v35 = vunpack.c.l.bf16 %v470_v23 }
   0x8   :  { %v223_v32 = vadd.f32 %v391_v8, %v127_v24  ;;  %v224_v33 = vadd.f32 %v392_v9, %v128_v25  ;;  %v131_v37 = vadd.f32 %v528_v7, %v92_v29  ;;  %v94_v39 = vmul.f32 %v339_v31, %v514_v1 }
   0x9   :  { %v225_v36 = vadd.f32 %v395_v11, %v129_v28  ;;  %v132_v38 = vadd.f32 %v528_v7, %v93_v30  ;;  %v226_v43 = vadd.f32 %v396_v17, %v130_v34  ;;  %v340_v44 = vunpack.c.h.bf16 %v455_v18  ;;  %v460_v34 = vld [vmem:[%s774_s0 + $0x40] sm:$0xff]  }
   0xa   :  { %v255_v41 = vmax.f32 %v223_v32, 0.0  ;;  %v256_v42 = vmax.f32 %v224_v33, 0.0  ;;  %v227_v47 = vadd.f32 %v399_v21, %v131_v37  ;;  %v133_v49 = vadd.f32 %v528_v7, %v94_v39  ;;  %v474_v21 = vld [vmem:[%s775_s1 + $0x38] sm:$0xff]   ;;  %v475_v39 = vld [vmem:[%s775_s1 + $0x40] sm:$0xff]  }
   0xb   :  { %v257_v46 = vmax.f32 %v225_v36, 0.0  ;;  %v228_v48 = vadd.f32 %v400_v27, %v132_v38  ;;  %v258_v50 = vmax.f32 %v226_v43, 0.0  ;;  %v95_v51 = vmul.f32 %v340_v44, %v514_v1 }
   0xc   :  { %287 = vst [vmem:[%s778_s4] sm:$0xff] %v255_v41  ;;  %288 = vst [vmem:[%s778_s4 + $0x8] sm:$0xff] %v256_v42  ;;  %v404_v52 = vunpack.c.h.bf16 %v470_v23  ;;  %v343_v53 = vunpack.c.l.bf16 %v456_v40  ;;  %v259_v56 = vmax.f32 %v227_v47, 0.0  ;;  %v229_v58 = vadd.f32 %v403_v35, %v133_v49  ;;  %v476_v49 = vld [vmem:[%s775_s1 + $0x48] sm:$0xff]  }
   0xd   :  { %289 = vst [vmem:[%s778_s4 + $0x10] sm:$0xff] %v257_v46  ;;  %v260_v57 = vmax.f32 %v228_v48, 0.0  ;;  %v407_v59 = vunpack.c.l.bf16 %v471_v45  ;;  %290 = vst [vmem:[%s778_s4 + $0x18] sm:$0xff] %v258_v50  ;;  %v134_v60 = vadd.f32 %v528_v7, %v95_v51  ;;  %v344_v62 = vunpack.c.h.bf16 %v456_v40  ;;  %v461_v48 = vld [vmem:[%s774_s0 + $0x48] sm:$0xff]  }
   0xe   :  { %v96_v61 = vmul.f32 %v343_v53, %v514_v1  ;;  %v408_v63 = vunpack.c.h.bf16 %v471_v45  ;;  %291 = vst [vmem:[%s778_s4 + $0x20] sm:$0xff] %v259_v56  ;;  %v261_v3 = vmax.f32 %v229_v58, 0.0  ;;  %v347_v4 = vunpack.c.l.bf16 %v457_v54  ;;  %v462_v58 = vld [vmem:[%s774_s0 + $0x50] sm:$0xff]  }
   0xf   :  { %292 = vst [vmem:[%s778_s4 + $0x28] sm:$0xff] %v260_v57  ;;  %v411_v5 = vunpack.c.l.bf16 %v472_v55  ;;  %v348_v6 = vunpack.c.h.bf16 %v457_v54  ;;  %v230_v8 = vadd.f32 %v404_v52, %v134_v60  ;;  %v97_v10 = vmul.f32 %v344_v62, %v514_v1 }
  0x10   :  { %v135_v9 = vadd.f32 %v528_v7, %v96_v61  ;;  %v412_v11 = vunpack.c.h.bf16 %v472_v55  ;;  %293 = vst [vmem:[%s778_s4 + $0x30] sm:$0xff] %v261_v3  ;;  %v98_v12 = vmul.f32 %v347_v4, %v514_v1  ;;  %v351_v14 = vunpack.c.l.bf16 %v458_v0 }
  0x11   :  { %v99_v13 = vmul.f32 %v348_v6, %v514_v1  ;;  %v415_v15 = vunpack.c.l.bf16 %v473_v2  ;;  %v262_v17 = vmax.f32 %v230_v8, 0.0  ;;  %v136_v19 = vadd.f32 %v528_v7, %v97_v10  ;;  %v463_v10 = vld [vmem:[%s774_s0 + $0x58] sm:$0xff]  }
  0x12   :  { %v231_v18 = vadd.f32 %v407_v59, %v135_v9  ;;  %v352_v20 = vunpack.c.h.bf16 %v458_v0  ;;  %v137_v22 = vadd.f32 %v528_v7, %v98_v12  ;;  %v100_v24 = vmul.f32 %v351_v14, %v514_v1 }
  0x13   :  { %v138_v23 = vadd.f32 %v528_v7, %v99_v13  ;;  %v416_v25 = vunpack.c.h.bf16 %v473_v2  ;;  %294 = vst [vmem:[%s778_s4 + $0x38] sm:$0xff] %v262_v17  ;;  %v232_v27 = vadd.f32 %v408_v63, %v136_v19  ;;  %v355_v29 = vunpack.c.l.bf16 %v459_v16  ;;  %v477_v63 = vld [vmem:[%s775_s1 + $0x50] sm:$0xff]   ;;  %v478_v19 = vld [vmem:[%s775_s1 + $0x58] sm:$0xff]  }
  0x14   :  { %v263_v26 = vmax.f32 %v231_v18, 0.0  ;;  %v101_v28 = vmul.f32 %v352_v20, %v514_v1  ;;  %v233_v30 = vadd.f32 %v411_v5, %v137_v22  ;;  %v139_v32 = vadd.f32 %v528_v7, %v100_v24 }
  0x15   :  { %v234_v31 = vadd.f32 %v412_v11, %v138_v23  ;;  %v419_v33 = vunpack.c.l.bf16 %v474_v21  ;;  %v264_v35 = vmax.f32 %v232_v27, 0.0  ;;  %v102_v37 = vmul.f32 %v355_v29, %v514_v1 }
  0x16   :  { %295 = vst [vmem:[%s778_s4 + $0x40] sm:$0xff] %v263_v26  ;;  %v140_v36 = vadd.f32 %v528_v7, %v101_v28  ;;  %v356_v38 = vunpack.c.h.bf16 %v459_v16  ;;  %v265_v40 = vmax.f32 %v233_v30, 0.0  ;;  %v235_v42 = vadd.f32 %v415_v15, %v139_v32  ;;  %v464_v28 = vld [vmem:[%s774_s0 + $0x60] sm:$0xff]  }
  0x17   :  { %v266_v41 = vmax.f32 %v234_v31, 0.0  ;;  %v420_v43 = vunpack.c.h.bf16 %v474_v21  ;;  %296 = vst [vmem:[%s778_s4 + $0x48] sm:$0xff] %v264_v35  ;;  %v141_v45 = vadd.f32 %v528_v7, %v102_v37  ;;  %v359_v47 = vunpack.c.l.bf16 %v460_v34 }
  0x18   :  { %v236_v44 = vadd.f32 %v416_v25, %v140_v36  ;;  %v103_v46 = vmul.f32 %v356_v38, %v514_v1  ;;  %297 = vst [vmem:[%s778_s4 + $0x50] sm:$0xff] %v265_v40  ;;  %v267_v50 = vmax.f32 %v235_v42, 0.0  ;;  %v423_v51 = vunpack.c.l.bf16 %v475_v39  ;;  %v465_v42 = vld [vmem:[%s774_s0 + $0x68] sm:$0xff]  }
  0x19   :  { %298 = vst [vmem:[%s778_s4 + $0x58] sm:$0xff] %v266_v41  ;;  %v360_v52 = vunpack.c.h.bf16 %v460_v34  ;;  %v424_v53 = vunpack.c.h.bf16 %v475_v39  ;;  %v237_v55 = vadd.f32 %v419_v33, %v141_v45  ;;  %v104_v57 = vmul.f32 %v359_v47, %v514_v1  ;;  %v479_v33 = vld [vmem:[%s775_s1 + $0x60] sm:$0xff]  }
  0x1a   :  { %v268_v54 = vmax.f32 %v236_v44, 0.0  ;;  %v142_v56 = vadd.f32 %v528_v7, %v103_v46  ;;  %299 = vst [vmem:[%s778_s4 + $0x60] sm:$0xff] %v267_v50  ;;  %v363_v60 = vunpack.c.l.bf16 %v461_v48  ;;  %v427_v61 = vunpack.c.l.bf16 %v476_v49 }
  0x1b   :  { %v105_v59 = vmul.f32 %v360_v52, %v514_v1  ;;  %v364_v62 = vunpack.c.h.bf16 %v461_v48  ;;  %v269_v0 = vmax.f32 %v237_v55, 0.0  ;;  %v143_v3 = vadd.f32 %v528_v7, %v104_v57  ;;  %v466_v52 = vld [vmem:[%s774_s0 + $0x70] sm:$0xff]  }
  0x1c   :  { %300 = vst [vmem:[%s778_s4 + $0x68] sm:$0xff] %v268_v54  ;;  %v238_v2 = vadd.f32 %v420_v43, %v142_v56  ;;  %v428_v4 = vunpack.c.h.bf16 %v476_v49  ;;  %v106_v6 = vmul.f32 %v363_v60, %v514_v1  ;;  %v367_v9 = vunpack.c.l.bf16 %v462_v58  ;;  %v480_v43 = vld [vmem:[%s775_s1 + $0x68] sm:$0xff]   ;;  %v481_v57 = vld [vmem:[%s775_s1 + $0x70] sm:$0xff]  }
  0x1d   :  { %v144_v5 = vadd.f32 %v528_v7, %v105_v59  ;;  %v107_v8 = vmul.f32 %v364_v62, %v514_v1  ;;  %301 = vst [vmem:[%s778_s4 + $0x70] sm:$0xff] %v269_v0  ;;  %v239_v12 = vadd.f32 %v423_v51, %v143_v3  ;;  %v431_v13 = vunpack.c.l.bf16 %v477_v63  ;;  %v467_v3 = vld [vmem:[%s774_s0 + $0x78] sm:$0xff]  }
  0x1e   :  { %v270_v11 = vmax.f32 %v238_v2, 0.0  ;;  %v368_v14 = vunpack.c.h.bf16 %v462_v58  ;;  %v145_v16 = vadd.f32 %v528_v7, %v106_v6  ;;  %v108_v18 = vmul.f32 %v367_v9, %v514_v1 }
  0x1f   :  { %v240_v15 = vadd.f32 %v424_v53, %v144_v5  ;;  %v146_v17 = vadd.f32 %v528_v7, %v107_v8  ;;  %v271_v20 = vmax.f32 %v239_v12, 0.0  ;;  %v432_v22 = vunpack.c.h.bf16 %v477_v63 }
  0x20   :  { %302 = vst [vmem:[%s778_s4 + $0x78] sm:$0xff] %v270_v11  ;;  %v109_v21 = vmul.f32 %v368_v14, %v514_v1  ;;  %v371_v23 = vunpack.c.l.bf16 %v463_v10  ;;  %v241_v25 = vadd.f32 %v427_v61, %v145_v16  ;;  %v147_v27 = vadd.f32 %v528_v7, %v108_v18 }
  0x21   :  { %v272_v24 = vmax.f32 %v240_v15, 0.0  ;;  %v242_v26 = vadd.f32 %v428_v4, %v146_v17  ;;  %303 = vst [vmem:[%s778_s4 + $0x80] sm:$0xff] %v271_v20  ;;  %v435_v31 = vunpack.c.l.bf16 %v478_v19  ;;  %v372_v32 = vunpack.c.h.bf16 %v463_v10 }
  0x22   :  { %v148_v29 = vadd.f32 %v528_v7, %v109_v21  ;;  %v110_v30 = vmul.f32 %v371_v23, %v514_v1  ;;  %v273_v34 = vmax.f32 %v241_v25, 0.0  ;;  %v243_v36 = vadd.f32 %v431_v13, %v147_v27  ;;  %v482_v13 = vld [vmem:[%s775_s1 + $0x78] sm:$0xff]  }
  0x23   :  { %304 = vst [vmem:[%s778_s4 + $0x88] sm:$0xff] %v272_v24  ;;  %v274_v35 = vmax.f32 %v242_v26, 0.0  ;;  %v436_v37 = vunpack.c.h.bf16 %v478_v19  ;;  %v111_v40 = vmul.f32 %v372_v32, %v514_v1  ;;  %v375_v41 = vunpack.c.l.bf16 %v464_v28 }
  0x24   :  { %v244_v38 = vadd.f32 %v432_v22, %v148_v29  ;;  %v149_v39 = vadd.f32 %v528_v7, %v110_v30  ;;  %305 = vst [vmem:[%s778_s4 + $0x90] sm:$0xff] %v273_v34  ;;  %v275_v44 = vmax.f32 %v243_v36, 0.0  ;;  %v439_v45 = vunpack.c.l.bf16 %v479_v33 }
  0x25   :  { %306 = vst [vmem:[%s778_s4 + $0x98] sm:$0xff] %v274_v35  ;;  %v376_v46 = vunpack.c.h.bf16 %v464_v28  ;;  %v440_v47 = vunpack.c.h.bf16 %v479_v33  ;;  %v150_v50 = vadd.f32 %v528_v7, %v111_v40  ;;  %v112_v51 = vmul.f32 %v375_v41, %v514_v1 }
  0x26   :  { %v276_v48 = vmax.f32 %v244_v38, 0.0  ;;  %v245_v49 = vadd.f32 %v435_v31, %v149_v39  ;;  %307 = vst [vmem:[%s778_s4 + $0xa0] sm:$0xff] %v275_v44  ;;  %v379_v54 = vunpack.c.l.bf16 %v465_v42  ;;  %v443_v55 = vunpack.c.l.bf16 %v480_v43 }
  0x27   :  { %v113_v53 = vmul.f32 %v376_v46, %v514_v1  ;;  %v380_v56 = vunpack.c.h.bf16 %v465_v42  ;;  %v246_v59 = vadd.f32 %v436_v37, %v150_v50  ;;  %v151_v60 = vadd.f32 %v528_v7, %v112_v51 }
  0x28   :  { %308 = vst [vmem:[%s778_s4 + $0xa8] sm:$0xff] %v276_v48  ;;  %v277_v58 = vmax.f32 %v245_v49, 0.0  ;;  %v444_v61 = vunpack.c.h.bf16 %v480_v43  ;;  %v114_v63 = vmul.f32 %v379_v54, %v514_v1  ;;  %v383_v2 = vunpack.c.l.bf16 %v466_v52 }
  0x29   :  { %v152_v62 = vadd.f32 %v528_v7, %v113_v53  ;;  %v115_v0 = vmul.f32 %v380_v56, %v514_v1  ;;  %v278_v4 = vmax.f32 %v246_v59, 0.0  ;;  %v247_v5 = vadd.f32 %v439_v45, %v151_v60 }
  0x2a   :  { %309 = vst [vmem:[%s778_s4 + $0xb0] sm:$0xff] %v277_v58  ;;  %v447_v6 = vunpack.c.l.bf16 %v481_v57  ;;  %v384_v8 = vunpack.c.h.bf16 %v466_v52  ;;  %v153_v10 = vadd.f32 %v528_v7, %v114_v63  ;;  %v116_v12 = vmul.f32 %v383_v2, %v514_v1 }
  0x2b   :  { %v248_v9 = vadd.f32 %v440_v47, %v152_v62  ;;  %v154_v11 = vadd.f32 %v528_v7, %v115_v0  ;;  %310 = vst [vmem:[%s778_s4 + $0xb8] sm:$0xff] %v278_v4  ;;  %v279_v14 = vmax.f32 %v247_v5, 0.0  ;;  %v448_v16 = vunpack.c.h.bf16 %v481_v57 }
  0x2c   :  { %v117_v15 = vmul.f32 %v384_v8, %v514_v1  ;;  %v387_v17 = vunpack.c.l.bf16 %v467_v3  ;;  %v249_v19 = vadd.f32 %v443_v55, %v153_v10  ;;  %v155_v21 = vadd.f32 %v528_v7, %v116_v12 }
  0x2d   :  { %v280_v18 = vmax.f32 %v248_v9, 0.0  ;;  %v250_v20 = vadd.f32 %v444_v61, %v154_v11  ;;  %311 = vst [vmem:[%s778_s4 + $0xc0] sm:$0xff] %v279_v14  ;;  %v451_v24 = vunpack.c.l.bf16 %v482_v13  ;;  %v388_v25 = vunpack.c.h.bf16 %v467_v3 }
  0x2e   :  { %v156_v22 = vadd.f32 %v528_v7, %v117_v15  ;;  %v118_v23 = vmul.f32 %v387_v17, %v514_v1  ;;  %v281_v26 = vmax.f32 %v249_v19, 0.0  ;;  %v251_v28 = vadd.f32 %v447_v6, %v155_v21 }
  0x2f   :  { %312 = vst [vmem:[%s778_s4 + $0xc8] sm:$0xff] %v280_v18  ;;  %v282_v27 = vmax.f32 %v250_v20, 0.0  ;;  %v119_v31 = vmul.f32 %v388_v25, %v514_v1  ;;  %v452_v32 = vunpack.c.h.bf16 %v482_v13 }
  0x30   :  { %v252_v29 = vadd.f32 %v448_v16, %v156_v22  ;;  %v157_v30 = vadd.f32 %v528_v7, %v118_v23  ;;  %313 = vst [vmem:[%s778_s4 + $0xd0] sm:$0xff] %v281_v26  ;;  %v283_v33 = vmax.f32 %v251_v28, 0.0 }
  0x31   :  { %314 = vst [vmem:[%s778_s4 + $0xd8] sm:$0xff] %v282_v27  ;;  %v158_v36 = vadd.f32 %v528_v7, %v119_v31 }
  0x32   :  { %v284_v34 = vmax.f32 %v252_v29, 0.0  ;;  %v253_v35 = vadd.f32 %v451_v24, %v157_v30  ;;  %315 = vst [vmem:[%s778_s4 + $0xe0] sm:$0xff] %v283_v33 }
  0x33   :  { %v254_v37 = vadd.f32 %v452_v32, %v158_v36 }
  0x34   :  { %316 = vst [vmem:[%s778_s4 + $0xe8] sm:$0xff] %v284_v34  ;;  %v285_v1 = vmax.f32 %v253_v35, 0.0 }
  0x35   :  { %v286_v38 = vmax.f32 %v254_v37, 0.0 }
  0x36   :  { %317 = vst [vmem:[%s778_s4 + $0xf0] sm:$0xff] %v285_v1 }
  0x37   :  { %318 = vst [vmem:[%s778_s4 + $0xf8] sm:$0xff] %v286_v38 }

// kernel: _lambda_.4
= control target key start
LH: loop header
LB: loop body
LE: loop exit
PB: predicated region body
PF: predicated region fallthrough
CT: control target
= control target key end

     0   :  { %s5555_s12 = smov 0   ;;  %s5557_s13 = smov 0   ;;  %s7099_s0 = inlined_call_operand.vmem [shape: bf16[2,18,18,64], index: 0, kind: input, shape index: {}]   ;;  %s7100_s1 = inlined_call_operand.vmem [shape: bf16[576,64], index: 1, kind: input, shape index: {}]   ;;  %s7101_s2 = inlined_call_operand.vmem [shape: bf16[512,64], index: 2, kind: output, shape index: {0}]   ;;  %s7102_s3 = inlined_call_operand.vmem [shape: f32[2,1,128], index: 3, kind: output, shape index: {1}]  }
   0x1   :  { %s5559_s14 = smov 0  }
   0x2 LB: > { %s26_s15 = sadd.s32 1, %s5528_s13  ;;  %p4530_p0 = scmp.ge.s32.totalorder %s5532_s14, 1  ;;  %s5532_s14 = sphi %s5559_s14, %s14_s14   ;;  %s5528_s13 = sphi %s5557_s13, %s7108_s13   ;;  %s5524_s12 = sphi %s5555_s12, %s7107_s12  }
   0x3   : > { %p28_p1 = scmp.ge.s32.totalorder %s26_s15, 2  ;;  %p156_p2 = scmp.lt.s32.totalorder %s5532_s14, 3 }
   0x5   : > { %s7110_s15 = smov (%p28_p1, %s26_s15), 0  ;;  %p157_p3 = pnand %p4530_p0, %p156_p2 }
   0x6   : > { %p185_p4 = scmp.lt.s32.totalorder (!%p157_p3), %s5524_s12, 1  ;;  %v5442_v0 = vld [vmem:[%s7100_s1 + $0x40] sm:$0xff] (!%p157_p3)   ;;  %vm401_vm0 = vsmask.f32 (!%p157_p3), 3328  ;;  %vm402_vm1 = vsmask.f32 (!%p157_p3), 7440 }
   0x7   : > { %160 = sbr.rel (%p157_p3) target bundleno = 700 (0x2bc), region = 28  ;;  %v5443_v1 = vld [vmem:[%s7100_s1] sm:$0xff] (!%p157_p3)   ;;  %5100 = vmatprep.subr.bf16.mxu0 (!%p157_p3), %v5442_v0  ;;  %5384 = vmatprep.subr.bf16.mxu1 (!%p157_p3), %v5442_v0  ;;  %s5534_s25 = smov (!%p157_p3), 64   ;;  %vm5606_vm2 = vmor (!%p157_p3), %vm401_vm0, %vm402_vm1  ;;  %vm997_vm3 = vcmask (!%p157_p3), 1042432   ;;  %vm998_vm4 = vcmask (!%p157_p3), 1046532   ;;  %vm336_vm6 = vcmask (!%p157_p3), 523264  }
   0x8   : > { %5101 = vmatpush3.bf16.msra.mxu0 (!%p157_p3), %v5443_v1  ;;  %5392 = vmatpush3.bf16.msra.mxu1 (!%p157_p3), %v5443_v1  ;;  %vm5698_vm5 = vmor (!%p157_p3), %vm997_vm3, %vm998_vm4  ;;  %vm884_vm7 = vcmask (!%p157_p3), 1048064   ;;  %vm4211_vm8 = vcmask (!%p157_p3), 519168  }
   0xe   : > { %s5577_s16 = scalar_select %p185_p4, %s5524_s12, 1 }
  0x10   : > { %s5400_s21 = smul.u32 216, %s5577_s16  ;;  %s201_s17 = scalar_lea.vmem %s7102_s3, %s5577_s16 }
  0x12   : > { %s5589_s24 = scalar_lea.vmem %s7099_s0, %s5400_s21 }
  0x13   : > { %v5426_v2 = vld [vmem:[%s5589_s24 + $0xc] sm:$0xff]   ;;  %v5427_v3 = vld [vmem:[%s5589_s24 + $0x9c] sm:$0xff]   ;;  %v354_v5 = vld [vmem:[%s5589_s24 + $0x4] sm:$0xf] }
  0x14   : > { %1308 = vrot.lane.b32.xlu0 %v5426_v2, %s5534_s25  ;;  %v353_v4 = vld [vmem:[%s5589_s24] sm:$0xf]  ;;  %v355_v6 = vld [vmem:[%s5589_s24 + $0x8] sm:$0x1]  ;;  %v414_v9 = vshll.u32 %v354_v5, 16  ;;  %v418_v10 = vshrl.u32 %v354_v5, 16 }
  0x15   : > { %v405_v7 = vshrl.u32 %v353_v4, 16  ;;  %v408_v8 = vshll.u32 %v353_v4, 16  ;;  %v424_v11 = vshll.u32 %v355_v6, 16  ;;  %v5428_v12 = vld [vmem:[%s5589_s24 + $0x18] sm:$0xff]   ;;  %v389_v13 = vld [vmem:[%s5589_s24 + $0x90] sm:$0xf] }
  0x16   : > { %v416_v16 = vrot.slane %v414_v9, 5  ;;  %v420_v17 = vrot.slane %v418_v10, 4  ;;  %v390_v18 = vld [vmem:[%s5589_s24 + $0x94] sm:$0xf]  ;;  %v391_v20 = vld [vmem:[%s5589_s24 + $0x98] sm:$0x1] }
  0x17   : > { %v407_v14 = vrot.slane %v405_v7, 4  ;;  %v410_v15 = vrot.slane %v408_v8, 5  ;;  %v426_v19 = vrot.slane %v424_v11, 5  ;;  %v693_v21 = vshrl.u32 %v389_v13, 16  ;;  %v356_v28 = vld [vmem:[%s5589_s24 + $0xc] sm:$0xf] }
  0x18   : > { %1332 = vrot.lane.b32.xlu0 %v5427_v3, %s5534_s25  ;;  %v696_v22 = vshll.u32 %v389_v13, 16  ;;  %v702_v23 = vshll.u32 %v390_v18, 16  ;;  %v421_v25 = vor.u32 %v420_v17, %v416_v16  ;;  %v706_v26 = vshrl.u32 %v390_v18, 16  ;;  %v357_v29 = vld [vmem:[%s5589_s24 + $0x10] sm:$0xf]  ;;  %v5429_v7 = vld [vmem:[%s5589_s24 + $0xa8] sm:$0xff]  }
  0x19   : > { %v411_v24 = vor.u32 %v410_v15, %v407_v14  ;;  %v712_v27 = vshll.u32 %v391_v20, 16  ;;  %v695_v31 = vrot.slane %v693_v21, 4  ;;  %v358_v34 = vld [vmem:[%s5589_s24 + $0x14] sm:$0x1]  ;;  %v429_v35 = vshrl.u32 %v356_v28, 16 }
  0x1a   : > { %v698_v32 = vrot.slane %v696_v22, 5  ;;  %v704_v33 = vrot.slane %v702_v23, 5  ;;  %v422_v37 = vrot.slane %v421_v25, 4  ;;  %v708_v38 = vrot.slane %v706_v26, 4  ;;  %v392_v52 = vld [vmem:[%s5589_s24 + $0x9c] sm:$0xf] }
  0x1b   : > { %v412_v36 = vrot.slane %v411_v24, 4  ;;  %v714_v39 = vrot.slane %v712_v27, 5  ;;  %v431_v41 = vrot.slane %v429_v35, 4  ;;  %v432_v42 = vshll.u32 %v356_v28, 16  ;;  %v393_v56 = vld [vmem:[%s5589_s24 + $0xa0] sm:$0xf] }
  0x1c   : > { %1310 = vrot.lane.b32.xlu0 %v5428_v12, %s5534_s25  ;;  %v699_v40 = vor.u32 %v698_v32, %v695_v31  ;;  %v438_v43 = vshll.u32 %v357_v29, 16  ;;  %v427_v45 = vsel %vm5606_vm2, %v422_v37, %v426_v19  ;;  %v709_v46 = vor.u32 %v708_v38, %v704_v33  ;;  %v394_v60 = vld [vmem:[%s5589_s24 + $0xa4] sm:$0x1]  ;;  %v359_v63 = vld [vmem:[%s5589_s24 + $0x18] sm:$0xf] }
  0x1d   : > { %v417_v44 = vsel %vm5606_vm2, %v412_v36, %v416_v16  ;;  %v442_v47 = vshrl.u32 %v357_v29, 16  ;;  %v434_v50 = vrot.slane %v432_v42, 5  ;;  %v448_v55 = vshll.u32 %v358_v34, 16  ;;  %v360_v4 = vld [vmem:[%s5589_s24 + $0x1c] sm:$0xf]  ;;  %v5430_v29 = vld [vmem:[%s5589_s24 + $0x24] sm:$0xff]  }
  0x1e   : > { %v4550_v48 = vcombine.low %v417_v44, %v427_v45  ;;  %v700_v49 = vrot.slane %v699_v40, 4  ;;  %v440_v51 = vrot.slane %v438_v43, 5  ;;  %v710_v53 = vrot.slane %v709_v46, 4  ;;  %v361_v10 = vld [vmem:[%s5589_s24 + $0x20] sm:$0x1] }
  0x1f   : > { %v444_v54 = vrot.slane %v442_v47, 4  ;;  %v717_v57 = vshrl.u32 %v392_v52, 16  ;;  %v435_v59 = vor.u32 %v434_v50, %v431_v41  ;;  %v720_v61 = vshll.u32 %v392_v52, 16  ;;  %v395_v23 = vld [vmem:[%s5589_s24 + $0xa8] sm:$0xf] }
  0x20   : > { %836 = vrot.lane.b32.xlu1 %v4550_v48, %s5534_s25  ;;  %v705_v58 = vsel %vm5606_vm2, %v700_v49, %v704_v33  ;;  %v726_v62 = vshll.u32 %v393_v56, 16  ;;  %v715_v0 = vsel %vm5606_vm2, %v710_v53, %v714_v39  ;;  %v450_v2 = vrot.slane %v448_v55, 5  ;;  %v396_v28 = vld [vmem:[%s5589_s24 + $0xac] sm:$0xf]  ;;  %v397_v37 = vld [vmem:[%s5589_s24 + $0xb0] sm:$0x1] }
  0x21   : > { %v445_v1 = vor.u32 %v444_v54, %v440_v51  ;;  %v719_v3 = vrot.slane %v717_v57, 4  ;;  %v4562_v5 = vcombine.low %v705_v58, %v715_v0  ;;  %v436_v6 = vrot.slane %v435_v59, 4  ;;  %v362_v40 = vld [vmem:[%s5589_s24 + $0x24] sm:$0xf]  ;;  %v363_v45 = vld [vmem:[%s5589_s24 + $0x28] sm:$0xf] }
  0x22   : > { %v722_v8 = vrot.slane %v720_v61, 5  ;;  %v728_v9 = vrot.slane %v726_v62, 5  ;;  %v730_v12 = vshrl.u32 %v393_v56, 16  ;;  %v736_v13 = vshll.u32 %v394_v60, 16  ;;  %v364_v50 = vld [vmem:[%s5589_s24 + $0x2c] sm:$0x1] }
  0x23   : > { %v446_v11 = vrot.slane %v445_v1, 4  ;;  %v453_v14 = vshrl.u32 %v359_v63, 16  ;;  %v441_v15 = vsel %vm5606_vm2, %v436_v6, %v440_v51  ;;  %v456_v17 = vshll.u32 %v359_v63, 16  ;;  %v398_v59 = vld [vmem:[%s5589_s24 + $0xb4] sm:$0xf] }
  0x24   : > { %860 = vrot.lane.b32.xlu1 %v4562_v5, %s5534_s25  ;;  %v723_v16 = vor.u32 %v722_v8, %v719_v3  ;;  %v462_v18 = vshll.u32 %v360_v4, 16  ;;  %v732_v20 = vrot.slane %v730_v12, 4  ;;  %v738_v21 = vrot.slane %v736_v13, 5  ;;  %v5431_v0 = vld [vmem:[%s5589_s24 + $0xb4] sm:$0xff]  }
  0x25   : > { %v451_v19 = vsel %vm5606_vm2, %v446_v11, %v450_v2  ;;  %v455_v22 = vrot.slane %v453_v14, 4  ;;  %v458_v26 = vrot.slane %v456_v17, 5  ;;  %v466_v32 = vshrl.u32 %v360_v4, 16  ;;  %v399_v8 = vld [vmem:[%s5589_s24 + $0xb8] sm:$0xf] }
  0x26   : > { %v4551_v24 = vcombine.low %v441_v15, %v451_v19  ;;  %v724_v25 = vrot.slane %v723_v16, 4  ;;  %v464_v27 = vrot.slane %v462_v18, 5  ;;  %v733_v31 = vor.u32 %v732_v20, %v728_v9  ;;  %v400_v14 = vld [vmem:[%s5589_s24 + $0xbc] sm:$0x1]  ;;  %v365_v19 = vld [vmem:[%s5589_s24 + $0x30] sm:$0xf] }
  0x27   : > { %v472_v33 = vshll.u32 %v361_v10, 16  ;;  %v741_v34 = vshrl.u32 %v395_v23, 16  ;;  %v459_v36 = vor.u32 %v458_v26, %v455_v22  ;;  %v744_v38 = vshll.u32 %v395_v23, 16  ;;  %v5432_v20 = vld [vmem:[%s5589_s24 + $0x30] sm:$0xff]  }
  0x28   : > { %838 = vrot.lane.b32.xlu0 %v4551_v24, %s5534_s25  ;;  %1334 = vrot.lane.b32.xlu1 %v5429_v7, %s5534_s25  ;;  %v729_v35 = vsel %vm5606_vm2, %v724_v25, %v728_v9  ;;  %v750_v39 = vshll.u32 %v396_v28, 16  ;;  %v734_v41 = vrot.slane %v733_v31, 4  ;;  %v468_v42 = vrot.slane %v466_v32, 4  ;;  %v366_v25 = vld [vmem:[%s5589_s24 + $0x34] sm:$0xf] }
  0x29   : > { %v474_v43 = vrot.slane %v472_v33, 5  ;;  %v743_v44 = vrot.slane %v741_v34, 4  ;;  %v460_v46 = vrot.slane %v459_v36, 4  ;;  %v746_v47 = vrot.slane %v744_v38, 5  ;;  %v367_v31 = vld [vmem:[%s5589_s24 + $0x38] sm:$0x1] }
  0x2a   : > { %v752_v48 = vrot.slane %v750_v39, 5  ;;  %v754_v49 = vshrl.u32 %v396_v28, 16  ;;  %v739_v51 = vsel %vm5606_vm2, %v734_v41, %v738_v21  ;;  %v469_v52 = vor.u32 %v468_v42, %v464_v27 }
  0x2b   : > { %v760_v53 = vshll.u32 %v397_v37, 16  ;;  %v477_v54 = vshrl.u32 %v362_v40, 16  ;;  %v4563_v55 = vcombine.low %v729_v35, %v739_v51  ;;  %v465_v56 = vsel %vm5606_vm2, %v460_v46, %v464_v27  ;;  %v5444_v51 = vld [vmem:[%s7100_s1 + $0x48] sm:$0xff]  }
  0x2c   : > { %1312 = vrot.lane.b32.xlu0 %v5430_v29, %s5534_s25  ;;  %v747_v57 = vor.u32 %v746_v47, %v743_v44  ;;  %v756_v58 = vrot.slane %v754_v49, 4  ;;  %v470_v60 = vrot.slane %v469_v52, 4  ;;  %v480_v63 = vshll.u32 %v362_v40, 16  ;;  %v5433_v40 = vld [vmem:[%s5589_s24 + $0xc0] sm:$0xff]   ;;  %5102 = vmatprep.subr.bf16.mxu0 %v5444_v51 }
  0x2d   : > { %v762_v61 = vrot.slane %v760_v53, 5  ;;  %v479_v62 = vrot.slane %v477_v54, 4  ;;  %862 = vrot.lane.b32.xlu1 %v4563_v55, %s5534_s25  ;;  %v486_v3 = vshll.u32 %v363_v45, 16  ;;  %v490_v4 = vshrl.u32 %v363_v45, 16  ;;  %v4838_v45 = vld [vmem:[%s5589_s24 + $0x18] sm:$0xf]  ;;  %5385 = vmatprep.subr.bf16.mxu1 %v5444_v51 }
  0x2e   : > { %v748_v1 = vrot.slane %v747_v57, 4  ;;  %v757_v2 = vor.u32 %v756_v58, %v752_v48  ;;  %v475_v5 = vsel %vm5606_vm2, %v470_v60, %v474_v43  ;;  %v482_v6 = vrot.slane %v480_v63, 5  ;;  %v5434_v53 = vld [vmem:[%s5589_s24 + $0x3c] sm:$0xff]   ;;  %v5445_v58 = vld [vmem:[%s7100_s1 + $0x8] sm:$0xff]   ;;  %v4713_v51 = vld [vmem:[%s5589_s24 + $0x18] sm:$0xe] }
  0x2f   : > { %v496_v7 = vshll.u32 %v364_v50, 16  ;;  %v765_v9 = vshrl.u32 %v398_v59, 16  ;;  %v4552_v10 = vcombine.low %v465_v56, %v475_v5  ;;  %v488_v13 = vrot.slane %v486_v3, 5  ;;  %v4839_v50 = vld [vmem:[%s5589_s24 + $0x1c] sm:$0xf]  ;;  %5103 = vmatpush3.bf16.msra.mxu0 %v5445_v58  ;;  %5393 = vmatpush3.bf16.msra.mxu1 %v5445_v58 }
  0x30   : > { %v753_v11 = vsel %vm5606_vm2, %v748_v1, %v752_v48  ;;  %v758_v12 = vrot.slane %v757_v2, 4  ;;  %v483_v15 = vor.u32 %v482_v6, %v479_v62  ;;  %v492_v16 = vrot.slane %v490_v4, 4  ;;  %v4840_v57 = vld [vmem:[%s5589_s24 + $0x20] sm:$0x1]  ;;  %v4710_v63 = vld [vmem:[%s5589_s24 + $0xc] sm:$0xe] }
  0x31   : > { %v498_v17 = vrot.slane %v496_v7, 5  ;;  %v767_v18 = vrot.slane %v765_v9, 4  ;;  %840 = vrot.lane.b32.xlu0 %v4552_v10, %s5534_s25  ;;  %1336 = vrot.lane.b32.xlu1 %v5431_v0, %s5534_s25  ;;  %v768_v22 = vshll.u32 %v398_v59, 16  ;;  %v774_v23 = vshll.u32 %v399_v8, 16  ;;  %v5446_v0 = vld [vmem:[%s7100_s1 + $0x50] sm:$0xff]  }
  0x32   : > { %v763_v21 = vsel %vm5606_vm2, %v758_v12, %v762_v61  ;;  %v778_v24 = vshrl.u32 %v399_v8, 16  ;;  %v484_v27 = vrot.slane %v483_v15, 4  ;;  %v493_v28 = vor.u32 %v492_v16, %v488_v13  ;;  %v4711_v5 = vld [vmem:[%s5589_s24 + $0x10] sm:$0xf]  ;;  %v4712_v6 = vld [vmem:[%s5589_s24 + $0x14] sm:$0x1]  ;;  %5104 = vmatprep.subr.bf16.mxu0 %v5446_v0  ;;  %5386 = vmatprep.subr.bf16.mxu1 %v5446_v0 }
  0x33   : > { %v4564_v26 = vcombine.low %v753_v11, %v763_v21  ;;  %v784_v29 = vshll.u32 %v400_v14, 16  ;;  %v770_v32 = vrot.slane %v768_v22, 5  ;;  %v776_v33 = vrot.slane %v774_v23, 5  ;;  %v368_v11 = vld [vmem:[%s5589_s24 + $0x3c] sm:$0xf]  ;;  %v5447_v21 = vld [vmem:[%s7100_s1 + $0x10] sm:$0xff]  }
  0x34   : > { %v780_v34 = vrot.slane %v778_v24, 4  ;;  %v501_v35 = vshrl.u32 %v365_v19, 16  ;;  %v489_v36 = vsel %vm5606_vm2, %v484_v27, %v488_v13  ;;  %v494_v37 = vrot.slane %v493_v28, 4  ;;  %v5448_v27 = vld [vmem:[%s7100_s1 + $0x58] sm:$0xff]   ;;  %5105 = vmatpush3.bf16.msra.mxu0 %v5447_v21  ;;  %5394 = vmatpush3.bf16.msra.mxu1 %v5447_v21  ;;  %v373_v21 = vld [vmem:[%s5589_s24 + $0x50] sm:$0x1] }
  0x35   : > { %v786_v38 = vrot.slane %v784_v29, 5  ;;  %v504_v39 = vshll.u32 %v365_v19, 16  ;;  %1314 = vrot.lane.b32.xlu0 %v5432_v20, %s5534_s25  ;;  %864 = vrot.lane.b32.xlu1 %v4564_v26, %s5534_s25  ;;  %v771_v41 = vor.u32 %v770_v32, %v767_v18  ;;  %v510_v44 = vshll.u32 %v366_v25, 16  ;;  %v369_v26 = vld [vmem:[%s5589_s24 + $0x40] sm:$0xf] }
  0x36   : > { %v781_v42 = vor.u32 %v780_v34, %v776_v33  ;;  %v503_v43 = vrot.slane %v501_v35, 4  ;;  %v499_v46 = vsel %vm5606_vm2, %v494_v37, %v498_v17  ;;  %v514_v48 = vshrl.u32 %v366_v25, 16  ;;  %v370_v37 = vld [vmem:[%s5589_s24 + $0x44] sm:$0x1]  ;;  %5106 = vmatprep.subr.bf16.mxu0 %v5448_v27  ;;  %5387 = vmatprep.subr.bf16.mxu1 %v5448_v27 }
  0x37   : > { %v506_v47 = vrot.slane %v504_v39, 5  ;;  %v520_v49 = vshll.u32 %v367_v31, 16  ;;  %v4553_v52 = vcombine.low %v489_v36, %v499_v46  ;;  %v772_v54 = vrot.slane %v771_v41, 4  ;;  %v5435_v36 = vld [vmem:[%s5589_s24 + $0x48] sm:$0xff]   ;;  %v4841_v39 = vld [vmem:[%s5589_s24 + $0x24] sm:$0xf] }
  0x38   : > { %v782_v55 = vrot.slane %v781_v42, 4  ;;  %v512_v56 = vrot.slane %v510_v44, 5  ;;  %v516_v60 = vrot.slane %v514_v48, 4  ;;  %v2401_v62 = vshrl.u32 %v4838_v45, 16  ;;  %v4842_v44 = vld [vmem:[%s5589_s24 + $0x28] sm:$0xf] }
  0x39   : > { %v507_v59 = vor.u32 %v506_v47, %v503_v43  ;;  %v522_v61 = vrot.slane %v520_v49, 5  ;;  %842 = vrot.lane.b32.xlu0 %v4553_v52, %s5534_s25  ;;  %1338 = vrot.lane.b32.xlu1 %v5433_v40, %s5534_s25  ;;  %v777_v1 = vsel %vm5606_vm2, %v772_v54, %v776_v33  ;;  %v2404_v3 = vshll.u32 %v4838_v45, 16  ;;  %v5449_v45 = vld [vmem:[%s7100_s1 + $0x18] sm:$0xff]  }
  0x3a   : > { %v787_v2 = vsel %vm5606_vm2, %v782_v55, %v786_v38  ;;  %v2410_v4 = vshll.u32 %v4839_v50, 16  ;;  %v517_v9 = vor.u32 %v516_v60, %v512_v56  ;;  %v2403_v10 = vrot.slane %v2401_v62, 4  ;;  %5107 = vmatpush3.bf16.msra.mxu0 %v5449_v45  ;;  %5395 = vmatpush3.bf16.msra.mxu1 %v5449_v45  ;;  %v4714_v60 = vld [vmem:[%s5589_s24 + $0x1c] sm:$0xf] }
  0x3b   : > { %v4565_v7 = vcombine.low %v777_v1, %v787_v2  ;;  %v508_v8 = vrot.slane %v507_v59, 4  ;;  %v2406_v12 = vrot.slane %v2404_v3, 5  ;;  %v2414_v14 = vshrl.u32 %v4839_v50, 16  ;;  %v4843_v50 = vld [vmem:[%s5589_s24 + $0x2c] sm:$0x1] }
  0x3c   : > { %v2412_v13 = vrot.slane %v2410_v4, 5  ;;  %v2420_v15 = vshll.u32 %v4840_v57, 16  ;;  %v518_v18 = vrot.slane %v517_v9, 4  ;;  %v4758_v19 = vrot.slane %v4710_v63, 9  ;;  %v4715_v1 = vld [vmem:[%s5589_s24 + $0x20] sm:$0x1] }
  0x3d   : > { %v513_v17 = vsel %vm5606_vm2, %v508_v8, %v512_v56  ;;  %v1982_v20 = vrot.slane %v4711_v5, 5  ;;  %1316 = vrot.lane.b32.xlu0 %v5434_v53, %s5534_s25  ;;  %866 = vrot.lane.b32.xlu1 %v4565_v7, %s5534_s25  ;;  %v2407_v22 = vor.u32 %v2406_v12, %v2403_v10  ;;  %v2416_v23 = vrot.slane %v2414_v14, 4  ;;  %v371_v10 = vld [vmem:[%s5589_s24 + $0x48] sm:$0xf] }
  0x3e   : > { %v2422_v24 = vrot.slane %v2420_v15, 5  ;;  %v1985_v25 = vrot.slane %v4712_v6, 5  ;;  %v523_v28 = vsel %vm5606_vm2, %v518_v18, %v522_v61  ;;  %v525_v32 = vshrl.u32 %v368_v11, 16  ;;  %v372_v15 = vld [vmem:[%s5589_s24 + $0x4c] sm:$0xf] }
  0x3f   : > { %v5717_v29 = vsel %vm5698_vm5, %v4758_v19, %v1982_v20  ;;  %v1984_v31 = vrot.slane %v1982_v20, 4  ;;  %v4554_v33 = vcombine.low %v513_v17, %v523_v28  ;;  %v2408_v34 = vrot.slane %v2407_v22, 4  ;;  %v4844_v22 = vld [vmem:[%s5589_s24 + $0x30] sm:$0xf] }
  0x40   : > { %v2417_v35 = vor.u32 %v2416_v23, %v2412_v13  ;;  %v528_v38 = vshll.u32 %v368_v11, 16  ;;  %v527_v41 = vrot.slane %v525_v32, 4  ;;  %v534_v42 = vshll.u32 %v369_v26, 16  ;;  %v4845_v32 = vld [vmem:[%s5589_s24 + $0x34] sm:$0xf] }
  0x41   : > { %v1986_v40 = vsel %vm5698_vm5, %v1984_v31, %v1985_v25  ;;  %v538_v43 = vshrl.u32 %v369_v26, 16  ;;  %844 = vrot.lane.b32.xlu0 %v4554_v33, %s5534_s25  ;;  %v2413_v46 = vsel %vm5606_vm2, %v2408_v34, %v2412_v13  ;;  %v544_v54 = vshll.u32 %v370_v37, 16  ;;  %v5450_v33 = vld [vmem:[%s7100_s1 + $0x60] sm:$0xff]  }
  0x42   : > { %v2418_v47 = vrot.slane %v2417_v35, 4  ;;  %v4774_v48 = vcombine.low %v5717_v29, %v1986_v40  ;;  %v530_v49 = vrot.slane %v528_v38, 5  ;;  %v536_v52 = vrot.slane %v534_v42, 5  ;;  %5108 = vmatprep.subr.bf16.mxu0 %v5450_v33  ;;  %5388 = vmatprep.subr.bf16.mxu1 %v5450_v33 }
  0x43   : > { %v540_v53 = vrot.slane %v538_v43, 4  ;;  %v2425_v55 = vshrl.u32 %v4841_v39, 16  ;;  %v2428_v58 = vshll.u32 %v4841_v39, 16  ;;  %v2434_v59 = vshll.u32 %v4842_v44, 16  ;;  %v4846_v43 = vld [vmem:[%s5589_s24 + $0x38] sm:$0x1] }
  0x44   : > { %v2423_v56 = vsel %vm5606_vm2, %v2418_v47, %v2422_v24  ;;  %v531_v57 = vor.u32 %v530_v49, %v527_v41  ;;  %v546_v63 = vrot.slane %v544_v54, 5  ;;  %v2438_v5 = vshrl.u32 %v4842_v44, 16  ;;  %v5451_v49 = vld [vmem:[%s7100_s1 + $0x20] sm:$0xff]   ;;  %v4717_v54 = vld [vmem:[%s5589_s24 + $0x28] sm:$0xf] }
  0x45   : > { %v4886_v61 = vcombine.low %v2413_v46, %v2423_v56  ;;  %v541_v62 = vor.u32 %v540_v53, %v536_v52  ;;  %v2427_v0 = vrot.slane %v2425_v55, 4  ;;  %1318 = vrot.lane.b32.xlu0 %v5435_v36, %s5534_s25  ;;  %v2430_v3 = vrot.slane %v2428_v58, 5  ;;  %v5436_v36 = vld [vmem:[%s5589_s24 + $0x54] sm:$0xff]   ;;  %v4718_v55 = vld [vmem:[%s5589_s24 + $0x2c] sm:$0x1]  ;;  %5109 = vmatpush3.bf16.msra.mxu0 %v5451_v49 }
  0x46   : > { %v532_v2 = vrot.slane %v531_v57, 4  ;;  %v2436_v4 = vrot.slane %v2434_v59, 5  ;;  %v2444_v7 = vshll.u32 %v4843_v50, 16  ;;  %v4759_v8 = vrot.slane %v4713_v51, 9  ;;  %v5452_v56 = vld [vmem:[%s7100_s1 + $0x68] sm:$0xff]   ;;  %5396 = vmatpush3.bf16.msra.mxu1 %v5451_v49 }
  0x47   : > { %2832 = vrot.lane.b32.xlu1 %v4886_v61, %s5534_s25  ;;  %v542_v6 = vrot.slane %v541_v62, 4  ;;  %v1989_v9 = vrot.slane %v4714_v60, 5  ;;  %v2431_v12 = vor.u32 %v2430_v3, %v2427_v0  ;;  %v2440_v13 = vrot.slane %v2438_v5, 4  ;;  %v374_v61 = vld [vmem:[%s5589_s24 + $0x54] sm:$0xf]  ;;  %5110 = vmatprep.subr.bf16.mxu0 %v5452_v56 }
  0x48   : > { %v537_v11 = vsel %vm5606_vm2, %v532_v2, %v536_v52  ;;  %v1992_v14 = vrot.slane %v4715_v1, 5  ;;  %v2446_v18 = vrot.slane %v2444_v7, 5  ;;  %v549_v26 = vshrl.u32 %v371_v10, 16  ;;  %v375_v2 = vld [vmem:[%s5589_s24 + $0x58] sm:$0xf]  ;;  %v5453_v7 = vld [vmem:[%s7100_s1 + $0x28] sm:$0xff]   ;;  %5389 = vmatprep.subr.bf16.mxu1 %v5452_v56 }
  0x49   : > { %v547_v17 = vsel %vm5606_vm2, %v542_v6, %v546_v63  ;;  %v5748_v19 = vsel %vm5698_vm5, %v4759_v8, %v1989_v9  ;;  %v1991_v20 = vrot.slane %v1989_v9, 4  ;;  %v2432_v24 = vrot.slane %v2431_v12, 4  ;;  %5111 = vmatpush3.bf16.msra.mxu0 %v5453_v7  ;;  %v377_v56 = vld [vmem:[%s5589_s24 + $0x60] sm:$0xf] }
  0x4a   : > { %v4555_v23 = vcombine.low %v537_v11, %v547_v17  ;;  %v2441_v25 = vor.u32 %v2440_v13, %v2436_v4  ;;  %v552_v28 = vshll.u32 %v371_v10, 16  ;;  %v558_v29 = vshll.u32 %v372_v15, 16  ;;  %v376_v11 = vld [vmem:[%s5589_s24 + $0x5c] sm:$0x1]  ;;  %5397 = vmatpush3.bf16.msra.mxu1 %v5453_v7 }
  0x4b   : > { %2140 = vrot.lane.b32.xlu1 %v4774_v48, %s5534_s25  ;;  %v5755_v27 = vsel %vm5698_vm5, %v1991_v20, %v1992_v14  ;;  %v562_v31 = vshrl.u32 %v372_v15, 16  ;;  %v2437_v34 = vsel %vm5606_vm2, %v2432_v24, %v2436_v4  ;;  %v551_v38 = vrot.slane %v549_v26, 4  ;;  %v4716_v48 = vld [vmem:[%s5589_s24 + $0x24] sm:$0xe] }
  0x4c   : > { %846 = vrot.lane.b32.xlu0 %v4555_v23, %s5534_s25  ;;  %v2442_v35 = vrot.slane %v2441_v25, 4  ;;  %v4775_v37 = vcombine.low %v5748_v19, %v5755_v27  ;;  %v554_v39 = vrot.slane %v552_v28, 5  ;;  %v560_v40 = vrot.slane %v558_v29, 5  ;;  %v5437_v19 = vld [vmem:[%s5589_s24 + $0x60] sm:$0xff]   ;;  %v5455_v29 = vld [vmem:[%s7100_s1 + $0x70] sm:$0xff]  }
  0x4d   : > { %v564_v41 = vrot.slane %v562_v31, 4  ;;  %v568_v42 = vshll.u32 %v373_v21, 16  ;;  %v2449_v45 = vshrl.u32 %v4844_v22, 16  ;;  %v2452_v46 = vshll.u32 %v4844_v22, 16  ;;  %v4848_v28 = vld [vmem:[%s5589_s24 + $0x40] sm:$0xf]  ;;  %5112 = vmatprep.subr.bf16.mxu0 %v5455_v29  ;;  %5390 = vmatprep.subr.bf16.mxu1 %v5455_v29 }
  0x4e   : > { %v2447_v44 = vsel %vm5606_vm2, %v2442_v35, %v2446_v18  ;;  %v2458_v47 = vshll.u32 %v4845_v32, 16  ;;  %v555_v51 = vor.u32 %v554_v39, %v551_v38  ;;  %v2462_v60 = vshrl.u32 %v4845_v32, 16  ;;  %v4847_v18 = vld [vmem:[%s5589_s24 + $0x3c] sm:$0xf] }
  0x4f   : > { %v4887_v50 = vcombine.low %v2437_v34, %v2447_v44  ;;  %v565_v52 = vor.u32 %v564_v41, %v560_v40  ;;  %v570_v53 = vrot.slane %v568_v42, 5  ;;  %v2451_v57 = vrot.slane %v2449_v45, 4  ;;  %v4849_v34 = vld [vmem:[%s5589_s24 + $0x44] sm:$0x1]  ;;  %v4719_v41 = vld [vmem:[%s5589_s24 + $0x30] sm:$0xe] }
  0x50   : > { %1320 = vrot.lane.b32.xlu0 %v5436_v36, %s5534_s25  ;;  %v2454_v58 = vrot.slane %v2452_v46, 5  ;;  %v2460_v59 = vrot.slane %v2458_v47, 5  ;;  %v556_v62 = vrot.slane %v555_v51, 4  ;;  %v2468_v0 = vshll.u32 %v4846_v43, 16  ;;  %v5456_v36 = vld [vmem:[%s7100_s1 + $0x30] sm:$0xff]  }
  0x51   : > { %2834 = vrot.lane.b32.xlu1 %v4887_v50, %s5534_s25  ;;  %v566_v63 = vrot.slane %v565_v52, 4  ;;  %v4760_v1 = vrot.slane %v4716_v48, 9  ;;  %v2464_v4 = vrot.slane %v2462_v60, 4  ;;  %v1996_v5 = vrot.slane %v4717_v54, 5  ;;  %v4720_v42 = vld [vmem:[%s5589_s24 + $0x34] sm:$0xf]  ;;  %5113 = vmatpush3.bf16.msra.mxu0 %v5456_v36 }
  0x52   : > { %v2455_v3 = vor.u32 %v2454_v58, %v2451_v57  ;;  %v1999_v6 = vrot.slane %v4718_v55, 5  ;;  %v561_v8 = vsel %vm5606_vm2, %v556_v62, %v560_v40  ;;  %v2470_v10 = vrot.slane %v2468_v0, 5  ;;  %v4721_v47 = vld [vmem:[%s5589_s24 + $0x38] sm:$0x1]  ;;  %5398 = vmatpush3.bf16.msra.mxu1 %v5456_v36  ;;  %v4722_v36 = vld [vmem:[%s5589_s24 + $0x3c] sm:$0xe] }
  0x53   : > { %v571_v9 = vsel %vm5606_vm2, %v566_v63, %v570_v53  ;;  %v573_v12 = vshrl.u32 %v374_v61, 16  ;;  %v2465_v15 = vor.u32 %v2464_v4, %v2460_v59  ;;  %v5793_v17 = vsel %vm5698_vm5, %v4760_v1, %v1996_v5 }
  0x54   : > { %v4556_v13 = vcombine.low %v561_v8, %v571_v9  ;;  %v2456_v14 = vrot.slane %v2455_v3, 4  ;;  %v1998_v20 = vrot.slane %v1996_v5, 4  ;;  %v576_v22 = vshll.u32 %v374_v61, 16  ;;  %v378_v61 = vld [vmem:[%s5589_s24 + $0x64] sm:$0xf] }
  0x55   : > { %2142 = vrot.lane.b32.xlu1 %v4775_v37, %s5534_s25  ;;  %v575_v21 = vrot.slane %v573_v12, 4  ;;  %v582_v23 = vshll.u32 %v375_v2, 16  ;;  %v2466_v25 = vrot.slane %v2465_v15, 4  ;;  %v586_v26 = vshrl.u32 %v375_v2, 16  ;;  %v5458_v2 = vld [vmem:[%s7100_s1 + $0x78] sm:$0xff]   ;;  %v5438_v15 = vld [vmem:[%s5589_s24 + $0x6c] sm:$0xff]  }
  0x56   : > { %848 = vrot.lane.b32.xlu0 %v4556_v13, %s5534_s25  ;;  %v2461_v24 = vsel %vm5606_vm2, %v2456_v14, %v2460_v59  ;;  %v592_v27 = vshll.u32 %v376_v11, 16  ;;  %v2000_v31 = vsel %vm5698_vm5, %v1998_v20, %v1999_v6  ;;  %v578_v32 = vrot.slane %v576_v22, 5  ;;  %v379_v6 = vld [vmem:[%s5589_s24 + $0x68] sm:$0x1]  ;;  %5114 = vmatprep.subr.bf16.mxu0 %v5458_v2  ;;  %v5459_v13 = vld [vmem:[%s7100_s1 + $0x38] sm:$0xff]  }
  0x57   : > { %v584_v33 = vrot.slane %v582_v23, 5  ;;  %v2473_v35 = vshrl.u32 %v4847_v18, 16  ;;  %v2471_v37 = vsel %vm5606_vm2, %v2466_v25, %v2470_v10  ;;  %v4776_v38 = vcombine.low %v5793_v17, %v2000_v31  ;;  %v4850_v12 = vld [vmem:[%s5589_s24 + $0x48] sm:$0xf]  ;;  %v4851_v20 = vld [vmem:[%s5589_s24 + $0x4c] sm:$0xf]  ;;  %5391 = vmatprep.subr.bf16.mxu1 %v5458_v2  ;;  %5115 = vmatpush3.bf16.msra.mxu0 %v5459_v13 }
  0x58   : > { %v588_v39 = vrot.slane %v586_v26, 4  ;;  %v594_v40 = vrot.slane %v592_v27, 5  ;;  %v4888_v43 = vcombine.low %v2461_v24, %v2471_v37  ;;  %v579_v44 = vor.u32 %v578_v32, %v575_v21  ;;  %v4852_v25 = vld [vmem:[%s5589_s24 + $0x50] sm:$0x1]  ;;  %5399 = vmatpush3.bf16.msra.mxu1 %v5459_v13  ;;  %v5461_v31 = vld [vmem:[%s7100_s1 + $0xc0] sm:$0xff]  }
  0x59   : > { %v2475_v45 = vrot.slane %v2473_v35, 4  ;;  %v2476_v46 = vshll.u32 %v4847_v18, 16  ;;  %v2482_v49 = vshll.u32 %v4848_v28, 16  ;;  %v2486_v50 = vshrl.u32 %v4848_v28, 16  ;;  %v4723_v37 = vld [vmem:[%s5589_s24 + $0x40] sm:$0xf]  ;;  %5212 = vmatprep.subr.bf16.mxu1 %v5461_v31 }
  0x5a   : > { %1322 = vrot.lane.b32.xlu0 %v5437_v19, %s5534_s25  ;;  %v589_v48 = vor.u32 %v588_v39, %v584_v33  ;;  %v2492_v51 = vshll.u32 %v4849_v34, 16  ;;  %2836 = vrot.lane.b32.xlu1 %v4888_v43, %s5534_s25  ;;  %v580_v52 = vrot.slane %v579_v44, 4  ;;  %v4761_v54 = vrot.slane %v4719_v41, 9  ;;  %v5858_v43 = vld [vmem:[%s7100_s1 + $0x100] sm:$0xff]   ;;  %v4854_v13 = vld [vmem:[%s5589_s24 + $0x58] sm:$0xf] }
  0x5b   : > { %v2478_v53 = vrot.slane %v2476_v46, 5  ;;  %v2003_v55 = vrot.slane %v4720_v42, 5  ;;  %v2484_v58 = vrot.slane %v2482_v49, 5  ;;  %v2488_v59 = vrot.slane %v2486_v50, 4  ;;  %v4724_v42 = vld [vmem:[%s5589_s24 + $0x44] sm:$0x1]  ;;  %5344 = vmatprep.subr.bf16.mxu0 %v5858_v43 }
  0x5c   : > { %v590_v57 = vrot.slane %v589_v48, 4  ;;  %v2494_v60 = vrot.slane %v2492_v51, 5  ;;  %v585_v62 = vsel %vm5606_vm2, %v580_v52, %v584_v33  ;;  %v2006_v5 = vrot.slane %v4721_v47, 5  ;;  %v380_v52 = vld [vmem:[%s5589_s24 + $0x6c] sm:$0xf] }
  0x5d   : > { %v2479_v63 = vor.u32 %v2478_v53, %v2475_v45  ;;  %v5825_v0 = vsel %vm5698_vm5, %v4761_v54, %v2003_v55  ;;  %v2005_v1 = vrot.slane %v2003_v55, 4  ;;  %v2489_v4 = vor.u32 %v2488_v59, %v2484_v58 }
  0x5e   : > { %v595_v3 = vsel %vm5606_vm2, %v590_v57, %v594_v40  ;;  %v597_v7 = vshrl.u32 %v377_v56, 16  ;;  %2144 = vrot.lane.b32.xlu1 %v4776_v38, %s5534_s25  ;;  %v600_v10 = vshll.u32 %v377_v56, 16  ;;  %v606_v11 = vshll.u32 %v378_v61, 16  ;;  %v381_v57 = vld [vmem:[%s5589_s24 + $0x70] sm:$0xf] }
  0x5f   : > { %v4557_v8 = vcombine.low %v585_v62, %v595_v3  ;;  %v2480_v9 = vrot.slane %v2479_v63, 4  ;;  %v2490_v14 = vrot.slane %v2489_v4, 4  ;;  %v2007_v17 = vsel %vm5698_vm5, %v2005_v1, %v2006_v5  ;;  %v5439_v4 = vld [vmem:[%s5589_s24 + $0x78] sm:$0xff]  }
  0x60   : > { %v599_v18 = vrot.slane %v597_v7, 4  ;;  %v610_v19 = vshrl.u32 %v378_v61, 16  ;;  %v4777_v22 = vcombine.low %v5825_v0, %v2007_v17  ;;  %v602_v23 = vrot.slane %v600_v10, 5  ;;  %v382_v0 = vld [vmem:[%s5589_s24 + $0x74] sm:$0x1] }
  0x61   : > { %850 = vrot.lane.b32.xlu0 %v4557_v8, %s5534_s25  ;;  %v2485_v21 = vsel %vm5606_vm2, %v2480_v9, %v2484_v58  ;;  %v608_v24 = vrot.slane %v606_v11, 5  ;;  %v2495_v26 = vsel %vm5606_vm2, %v2490_v14, %v2494_v60  ;;  %v616_v28 = vshll.u32 %v379_v6, 16  ;;  %v4853_v8 = vld [vmem:[%s5589_s24 + $0x54] sm:$0xf]  ;;  %v4855_v14 = vld [vmem:[%s5589_s24 + $0x5c] sm:$0x1] }
  0x62   : > { %v612_v27 = vrot.slane %v610_v19, 4  ;;  %v2497_v29 = vshrl.u32 %v4850_v12, 16  ;;  %v4889_v32 = vcombine.low %v2485_v21, %v2495_v26  ;;  %v603_v33 = vor.u32 %v602_v23, %v599_v18  ;;  %v4727_v26 = vld [vmem:[%s5589_s24 + $0x50] sm:$0x1] }
  0x63   : > { %v2500_v34 = vshll.u32 %v4850_v12, 16  ;;  %v2506_v35 = vshll.u32 %v4851_v20, 16  ;;  %v618_v39 = vrot.slane %v616_v28, 5  ;;  %v2510_v41 = vshrl.u32 %v4851_v20, 16  ;;  %v4725_v20 = vld [vmem:[%s5589_s24 + $0x48] sm:$0xe] }
  0x64   : > { %v613_v38 = vor.u32 %v612_v27, %v608_v24  ;;  %v2499_v40 = vrot.slane %v2497_v29, 4  ;;  %2838 = vrot.lane.b32.xlu1 %v4889_v32, %s5534_s25  ;;  %v604_v44 = vrot.slane %v603_v33, 4  ;;  %v2516_v47 = vshll.u32 %v4852_v25, 16  ;;  %v4726_v25 = vld [vmem:[%s5589_s24 + $0x4c] sm:$0xf] }
  0x65   : > { %1324 = vrot.lane.b32.xlu0 %v5438_v15, %s5534_s25  ;;  %v2502_v45 = vrot.slane %v2500_v34, 5  ;;  %v2508_v46 = vrot.slane %v2506_v35, 5  ;;  %v2512_v49 = vrot.slane %v2510_v41, 4  ;;  %v4762_v50 = vrot.slane %v4722_v36, 9  ;;  %v383_v32 = vld [vmem:[%s5589_s24 + $0x78] sm:$0xf] }
  0x66   : > { %v614_v48 = vrot.slane %v613_v38, 4  ;;  %v2010_v51 = vrot.slane %v4723_v37, 5  ;;  %v609_v53 = vsel %vm5606_vm2, %v604_v44, %v608_v24  ;;  %v2518_v55 = vrot.slane %v2516_v47, 5  ;;  %v384_v37 = vld [vmem:[%s5589_s24 + $0x7c] sm:$0xf] }
  0x67   : > { %v2503_v54 = vor.u32 %v2502_v45, %v2499_v40  ;;  %v2013_v56 = vrot.slane %v4724_v42, 5  ;;  %v2513_v59 = vor.u32 %v2512_v49, %v2508_v46  ;;  %v621_v1 = vshrl.u32 %v380_v52, 16  ;;  %v385_v42 = vld [vmem:[%s5589_s24 + $0x80] sm:$0x1] }
  0x68   : > { %v619_v58 = vsel %vm5606_vm2, %v614_v48, %v618_v39  ;;  %v2011_v60 = vsel %vm5698_vm5, %v4762_v50, %v2010_v51  ;;  %v2012_v61 = vrot.slane %v2010_v51, 4  ;;  %2146 = vrot.lane.b32.xlu1 %v4777_v22, %s5534_s25  ;;  %v624_v2 = vshll.u32 %v380_v52, 16 }
  0x69   : > { %v4558_v62 = vcombine.low %v609_v53, %v619_v58  ;;  %v2504_v63 = vrot.slane %v2503_v54, 4  ;;  %v2514_v3 = vrot.slane %v2513_v59, 4  ;;  %v630_v6 = vshll.u32 %v381_v57, 16  ;;  %v5440_v54 = vld [vmem:[%s5589_s24 + $0x84] sm:$0xff]  }
  0x6a   : > { %v2014_v5 = vsel %vm5698_vm5, %v2012_v61, %v2013_v56  ;;  %v634_v7 = vshrl.u32 %v381_v57, 16  ;;  %v623_v11 = vrot.slane %v621_v1, 4  ;;  %v626_v12 = vrot.slane %v624_v2, 5  ;;  %v4856_v57 = vld [vmem:[%s5589_s24 + $0x60] sm:$0xf] }
  0x6b   : > { %852 = vrot.lane.b32.xlu0 %v4558_v62, %s5534_s25  ;;  %v2509_v9 = vsel %vm5606_vm2, %v2504_v63, %v2508_v46  ;;  %v4778_v10 = vcombine.low %v2011_v60, %v2014_v5  ;;  %v2519_v15 = vsel %vm5606_vm2, %v2514_v3, %v2518_v55  ;;  %v632_v17 = vrot.slane %v630_v6, 5  ;;  %v4857_v62 = vld [vmem:[%s5589_s24 + $0x64] sm:$0xf] }
  0x6c   : > { %v636_v18 = vrot.slane %v634_v7, 4  ;;  %v640_v19 = vshll.u32 %v382_v0, 16  ;;  %v4890_v21 = vcombine.low %v2509_v9, %v2519_v15  ;;  %v627_v22 = vor.u32 %v626_v12, %v623_v11  ;;  %v4858_v7 = vld [vmem:[%s5589_s24 + $0x68] sm:$0x1] }
  0x6d   : > { %v2521_v23 = vshrl.u32 %v4853_v8, 16  ;;  %v2524_v24 = vshll.u32 %v4853_v8, 16  ;;  %v2530_v29 = vshll.u32 %v4854_v13, 16  ;;  %v2534_v31 = vshrl.u32 %v4854_v13, 16  ;;  %v4728_v8 = vld [vmem:[%s5589_s24 + $0x54] sm:$0xe] }
  0x6e   : > { %v637_v27 = vor.u32 %v636_v18, %v632_v17  ;;  %v642_v28 = vrot.slane %v640_v19, 5  ;;  %2840 = vrot.lane.b32.xlu1 %v4890_v21, %s5534_s25  ;;  %v628_v33 = vrot.slane %v627_v22, 4  ;;  %v2540_v36 = vshll.u32 %v4855_v14, 16  ;;  %v4729_v13 = vld [vmem:[%s5589_s24 + $0x58] sm:$0xf] }
  0x6f   : > { %1326 = vrot.lane.b32.xlu0 %v5439_v4, %s5534_s25  ;;  %v2523_v34 = vrot.slane %v2521_v23, 4  ;;  %v2526_v35 = vrot.slane %v2524_v24, 5  ;;  %v2532_v39 = vrot.slane %v2530_v29, 5  ;;  %v2536_v40 = vrot.slane %v2534_v31, 4  ;;  %v4730_v19 = vld [vmem:[%s5589_s24 + $0x5c] sm:$0x1] }
  0x70   : > { %v638_v38 = vrot.slane %v637_v27, 4  ;;  %v4763_v41 = vrot.slane %v4725_v20, 9  ;;  %v633_v44 = vsel %vm5606_vm2, %v628_v33, %v632_v17  ;;  %v2542_v46 = vrot.slane %v2540_v36, 5  ;;  %v386_v24 = vld [vmem:[%s5589_s24 + $0x84] sm:$0xf] }
  0x71   : > { %v2527_v45 = vor.u32 %v2526_v35, %v2523_v34  ;;  %v2017_v47 = vrot.slane %v4726_v25, 5  ;;  %v2537_v49 = vor.u32 %v2536_v40, %v2532_v39  ;;  %v2020_v50 = vrot.slane %v4727_v26, 5  ;;  %v387_v29 = vld [vmem:[%s5589_s24 + $0x88] sm:$0xf]  ;;  %v388_v35 = vld [vmem:[%s5589_s24 + $0x8c] sm:$0x1] }
  0x72   : > { %v643_v48 = vsel %vm5606_vm2, %v638_v38, %v642_v28  ;;  %v645_v51 = vshrl.u32 %v383_v32, 16  ;;  %2148 = vrot.lane.b32.xlu1 %v4778_v10, %s5534_s25  ;;  %v648_v60 = vshll.u32 %v383_v32, 16  ;;  %v654_v61 = vshll.u32 %v384_v37, 16 }
  0x73   : > { %v4559_v52 = vcombine.low %v633_v44, %v643_v48  ;;  %v2528_v53 = vrot.slane %v2527_v45, 4  ;;  %v2018_v55 = vsel %vm5698_vm5, %v4763_v41, %v2017_v47  ;;  %v2019_v56 = vrot.slane %v2017_v47, 4  ;;  %v4859_v45 = vld [vmem:[%s5589_s24 + $0x6c] sm:$0xf] }
  0x74   : > { %v2538_v58 = vrot.slane %v2537_v49, 4  ;;  %v647_v59 = vrot.slane %v645_v51, 4  ;;  %v658_v1 = vshrl.u32 %v384_v37, 16  ;;  %v664_v2 = vshll.u32 %v385_v42, 16  ;;  %v4861_v51 = vld [vmem:[%s5589_s24 + $0x74] sm:$0x1] }
  0x75   : > { %854 = vrot.lane.b32.xlu0 %v4559_v52, %s5534_s25  ;;  %v2533_v63 = vsel %vm5606_vm2, %v2528_v53, %v2532_v39  ;;  %v2021_v0 = vsel %vm5698_vm5, %v2019_v56, %v2020_v50  ;;  %v650_v5 = vrot.slane %v648_v60, 5  ;;  %v656_v6 = vrot.slane %v654_v61, 5  ;;  %v4731_v56 = vld [vmem:[%s5589_s24 + $0x60] sm:$0xe] }
  0x76   : > { %v2543_v3 = vsel %vm5606_vm2, %v2538_v58, %v2542_v46  ;;  %v4779_v4 = vcombine.low %v2018_v55, %v2021_v0  ;;  %v660_v10 = vrot.slane %v658_v1, 4  ;;  %v666_v11 = vrot.slane %v664_v2, 5  ;;  %v4860_v46 = vld [vmem:[%s5589_s24 + $0x70] sm:$0xf]  ;;  %v4732_v2 = vld [vmem:[%s5589_s24 + $0x64] sm:$0xf] }
  0x77   : > { %v4891_v9 = vcombine.low %v2533_v63, %v2543_v3  ;;  %v2545_v12 = vshrl.u32 %v4856_v57, 16  ;;  %v651_v14 = vor.u32 %v650_v5, %v647_v59  ;;  %v2548_v15 = vshll.u32 %v4856_v57, 16  ;;  %v5441_v59 = vld [vmem:[%s5589_s24 + $0x90] sm:$0xff]  }
  0x78   : > { %v2554_v17 = vshll.u32 %v4857_v62, 16  ;;  %v2558_v18 = vshrl.u32 %v4857_v62, 16  ;;  %v661_v20 = vor.u32 %v660_v10, %v656_v6  ;;  %v2564_v22 = vshll.u32 %v4858_v7, 16  ;;  %v4733_v7 = vld [vmem:[%s5589_s24 + $0x68] sm:$0x1] }
  0x79   : > { %2842 = vrot.lane.b32.xlu1 %v4891_v9, %s5534_s25  ;;  %1328 = vrot.lane.b32.xlu0 %v5440_v54, %s5534_s25  ;;  %v2547_v21 = vrot.slane %v2545_v12, 4  ;;  %v4764_v23 = vrot.slane %v4728_v8, 9  ;;  %v652_v25 = vrot.slane %v651_v14, 4  ;;  %v2550_v26 = vrot.slane %v2548_v15, 5  ;;  %v4862_v12 = vld [vmem:[%s5589_s24 + $0x78] sm:$0xf] }
  0x7a   : > { %v2556_v27 = vrot.slane %v2554_v17, 5  ;;  %v2560_v28 = vrot.slane %v2558_v18, 4  ;;  %v662_v31 = vrot.slane %v661_v20, 4  ;;  %v2566_v32 = vrot.slane %v2564_v22, 5  ;;  %v4863_v18 = vld [vmem:[%s5589_s24 + $0x7c] sm:$0xf] }
  0x7b   : > { %v2024_v33 = vrot.slane %v4729_v13, 5  ;;  %v2027_v34 = vrot.slane %v4730_v19, 5  ;;  %v657_v36 = vsel %vm5606_vm2, %v652_v25, %v656_v6  ;;  %v2551_v37 = vor.u32 %v2550_v26, %v2547_v21 }
  0x7c   : > { %v2561_v38 = vor.u32 %v2560_v28, %v2556_v27  ;;  %v669_v39 = vshrl.u32 %v386_v24, 16  ;;  %v667_v40 = vsel %vm5606_vm2, %v662_v31, %v666_v11  ;;  %v672_v44 = vshll.u32 %v386_v24, 16 }
  0x7d   : > { %2150 = vrot.lane.b32.xlu1 %v4779_v4, %s5534_s25  ;;  %v2025_v41 = vsel %vm5698_vm5, %v4764_v23, %v2024_v33  ;;  %v2026_v42 = vrot.slane %v2024_v33, 4  ;;  %v4560_v47 = vcombine.low %v657_v36, %v667_v40  ;;  %v2552_v48 = vrot.slane %v2551_v37, 4  ;;  %v4734_v33 = vld [vmem:[%s5589_s24 + $0x6c] sm:$0xe] }
  0x7e   : > { %v2562_v49 = vrot.slane %v2561_v38, 4  ;;  %v671_v50 = vrot.slane %v669_v39, 4  ;;  %v674_v53 = vrot.slane %v672_v44, 5  ;;  %v678_v54 = vshll.u32 %v387_v29, 16  ;;  %v4735_v38 = vld [vmem:[%s5589_s24 + $0x70] sm:$0xf] }
  0x7f   : > { %v2028_v52 = vsel %vm5698_vm5, %v2026_v42, %v2027_v34  ;;  %v682_v55 = vshrl.u32 %v387_v29, 16  ;;  %856 = vrot.lane.b32.xlu0 %v4560_v47, %s5534_s25  ;;  %v2557_v57 = vsel %vm5606_vm2, %v2552_v48, %v2556_v27  ;;  %v688_v61 = vshll.u32 %v388_v35, 16  ;;  %v4864_v29 = vld [vmem:[%s5589_s24 + $0x80] sm:$0x1]  ;;  %v4736_v39 = vld [vmem:[%s5589_s24 + $0x74] sm:$0x1] }
  0x80   : > { %v2567_v58 = vsel %vm5606_vm2, %v2562_v49, %v2566_v32  ;;  %v4780_v60 = vcombine.low %v2025_v41, %v2028_v52  ;;  %v675_v63 = vor.u32 %v674_v53, %v671_v50  ;;  %v680_v0 = vrot.slane %v678_v54, 5 }
  0x81   : > { %v4892_v62 = vcombine.low %v2557_v57, %v2567_v58  ;;  %v684_v1 = vrot.slane %v682_v55, 4  ;;  %v690_v3 = vrot.slane %v688_v61, 5  ;;  %v2569_v4 = vshrl.u32 %v4859_v45, 16  ;;  %v4737_v61 = vld [vmem:[%s5589_s24 + $0x78] sm:$0xe] }
  0x82   : > { %v2572_v5 = vshll.u32 %v4859_v45, 16  ;;  %v2578_v6 = vshll.u32 %v4860_v46, 16  ;;  %v676_v8 = vrot.slane %v675_v63, 4  ;;  %v2582_v10 = vshrl.u32 %v4860_v46, 16  ;;  %v4865_v46 = vld [vmem:[%s5589_s24 + $0x84] sm:$0xf] }
  0x83   : > { %2844 = vrot.lane.b32.xlu1 %v4892_v62, %s5534_s25  ;;  %v685_v9 = vor.u32 %v684_v1, %v680_v0  ;;  %v2588_v11 = vshll.u32 %v4861_v51, 16  ;;  %1330 = vrot.lane.b32.xlu0 %v5441_v59, %s5534_s25  ;;  %v2571_v13 = vrot.slane %v2569_v4, 4  ;;  %v4765_v17 = vrot.slane %v4731_v56, 9  ;;  %v4866_v51 = vld [vmem:[%s5589_s24 + $0x88] sm:$0xf] }
  0x84   : > { %v2574_v14 = vrot.slane %v2572_v5, 5  ;;  %v2580_v15 = vrot.slane %v2578_v6, 5  ;;  %v681_v19 = vsel %vm5606_vm2, %v676_v8, %v680_v0  ;;  %v2584_v21 = vrot.slane %v2582_v10, 4  ;;  %v4867_v56 = vld [vmem:[%s5589_s24 + $0x8c] sm:$0x1]  ;;  %v5457_v10 = vld [vmem:[%s5589_s24 + $0x90] sm:$0xff]  }
  0x85   : > { %v686_v20 = vrot.slane %v685_v9, 4  ;;  %v2590_v22 = vrot.slane %v2588_v11, 5  ;;  %v2031_v24 = vrot.slane %v4732_v2, 5  ;;  %v2034_v25 = vrot.slane %v4733_v7, 5  ;;  %v4738_v2 = vld [vmem:[%s5589_s24 + $0x7c] sm:$0xf] }
  0x86   : > { %v2575_v23 = vor.u32 %v2574_v14, %v2571_v13  ;;  %v2593_v26 = vshrl.u32 %v4862_v12, 16  ;;  %v2585_v28 = vor.u32 %v2584_v21, %v2580_v15  ;;  %v2596_v31 = vshll.u32 %v4862_v12, 16  ;;  %v5956_v40 = vpop.permute.xlu0 %1308  ;;  %v5454_v9 = vld [vmem:[%s5589_s24] sm:$0xff]   ;;  %v5460_v11 = vld [vmem:[%s5589_s24 + $0xc] sm:$0xff]   ;;  %v5465_v13 = vld [vmem:[%s5589_s24 + $0x18] sm:$0xff]   ;;  %349 = vst.msk [vmem:[#allocation2 + $0x1e0] sm:$0xff] %vm336_vm6, %v5457_v10 }
  0x87   : > { %2152 = vrot.lane.b32.xlu1 %v4780_v60, %s5534_s25  ;;  %v691_v27 = vsel %vm5606_vm2, %v686_v20, %v690_v3  ;;  %v2602_v32 = vshll.u32 %v4863_v18, 16  ;;  %v5952_v36 = vsel %vm5698_vm5, %v4765_v17, %v2031_v24  ;;  %v2033_v37 = vrot.slane %v2031_v24, 4  ;;  %v5974_v3 = vld [vmem:[%s5589_s24 + $0x80] sm:$0x1]  ;;  %v5468_v14 = vld [vmem:[%s5589_s24 + $0xa8] sm:$0xff]   ;;  %337 = vst.msk [vmem:[#allocation2] sm:$0xff] %vm336_vm6, %v5454_v9 }
  0x88   : > { %v4561_v34 = vcombine.low %v681_v19, %v691_v27  ;;  %v2576_v35 = vrot.slane %v2575_v23, 4  ;;  %v2586_v41 = vrot.slane %v2585_v28, 4  ;;  %v2595_v42 = vrot.slane %v2593_v26, 4  ;;  %v5463_v12 = vld [vmem:[%s5589_s24 + $0x9c] sm:$0xff]   ;;  %v5471_v21 = vld [vmem:[%s5589_s24 + $0x24] sm:$0xff]   ;;  %v5474_v26 = vld [vmem:[%s5589_s24 + $0xb4] sm:$0xff]  }
  0x89   : > { %v2598_v44 = vrot.slane %v2596_v31, 5  ;;  %v5958_v45 = vrot.slane %v2602_v32, 5  ;;  %v2035_v48 = vsel %vm5698_vm5, %v2033_v37, %v2034_v25  ;;  %v2606_v49 = vshrl.u32 %v4863_v18, 16  ;;  %v5994_v20 = vld [vmem:[%s5589_s24] sm:$0xe]  ;;  %v5477_v27 = vld [vmem:[%s5589_s24 + $0x30] sm:$0xff]  }
  0x8a   : > { %858 = vrot.lane.b32.xlu0 %v4561_v34, %s5534_s25  ;;  %v2581_v47 = vsel %vm5606_vm2, %v2576_v35, %v2580_v15  ;;  %v2612_v50 = vshll.u32 %v4864_v29, 16  ;;  %v2591_v52 = vsel %vm5606_vm2, %v2586_v41, %v2590_v22  ;;  %v4781_v53 = vcombine.low %v5952_v36, %v2035_v48  ;;  %v5982_v8 = vpop.permute.xlu0 %1332  ;;  %v5478_v28 = vld [vmem:[%s5589_s24 + $0x18] sm:$0xff]   ;;  %v902_v34 = vld [vmem:[%s5589_s24 + $0x4] sm:$0xf]  ;;  %v6007_v35 = vld [vmem:[%s5589_s24 + $0x8] sm:$0x1] }
  0x8b   : > { %v2599_v54 = vor.u32 %v2598_v44, %v2595_v42  ;;  %v4766_v55 = vrot.slane %v4734_v33, 9  ;;  %v4893_v57 = vcombine.low %v2581_v47, %v2591_v52  ;;  %v2608_v58 = vrot.slane %v2606_v49, 4  ;;  %v937_v41 = vld [vmem:[%s5589_s24 + $0x90] sm:$0xe]  ;;  %v938_v47 = vld [vmem:[%s5589_s24 + $0x94] sm:$0xf] }
  0x8c   : > { %v2614_v59 = vrot.slane %v2612_v50, 5  ;;  %v2038_v60 = vrot.slane %v4735_v38, 5  ;;  %v2041_v63 = vrot.slane %v4736_v39, 5  ;;  %v2617_v0 = vshrl.u32 %v4865_v46, 16  ;;  %v939_v48 = vld [vmem:[%s5589_s24 + $0x98] sm:$0x1] }
  0x8d   : > { %v2600_v62 = vrot.slane %v2599_v54, 4  ;;  %v2620_v1 = vshll.u32 %v4865_v46, 16  ;;  %2846 = vrot.lane.b32.xlu1 %v4893_v57, %s5534_s25  ;;  %v2609_v4 = vor.u32 %v2608_v58, %v5958_v45  ;;  %v2626_v7 = vshll.u32 %v4866_v51, 16  ;;  %v4868_v52 = vld [vmem:[%s5589_s24 + $0x90] sm:$0xf]  ;;  %338 = vst.msk [vmem:[#allocation2 + $0x28] sm:$0xff] %vm336_vm6, %v5460_v11 }
  0x8e   : > { %v5980_v5 = vsel %vm5698_vm5, %v4766_v55, %v2038_v60  ;;  %v2040_v6 = vrot.slane %v2038_v60, 4  ;;  %v2619_v17 = vrot.slane %v2617_v0, 4  ;;  %v2630_v19 = vshrl.u32 %v4866_v51, 16  ;;  %350 = vst.msk [vmem:[#allocation2 + $0x208] sm:$0xff] %vm336_vm6, %v5463_v12  ;;  %339 = vst.msk [vmem:[#allocation2 + $0x50] sm:$0xff] %vm336_vm6, %v5465_v13 }
  0x8f   : > { %v2605_v15 = vsel %vm5606_vm2, %v2600_v62, %v5958_v45  ;;  %v2622_v18 = vrot.slane %v2620_v1, 5  ;;  %v2610_v22 = vrot.slane %v2609_v4, 4  ;;  %v5999_v24 = vrot.slane %v2626_v7, 5  ;;  %351 = vst.msk [vmem:[#allocation2 + $0x230] sm:$0xff] %vm336_vm6, %v5468_v14  ;;  %340 = vst.msk [vmem:[#allocation2 + $0x78] sm:$0xff] %vm336_vm6, %v5471_v21 }
  0x90   : > { %v2042_v23 = vsel %vm5698_vm5, %v2040_v6, %v2041_v63  ;;  %v2636_v25 = vshll.u32 %v4867_v56, 16  ;;  %v2632_v32 = vrot.slane %v2630_v19, 4  ;;  %v4767_v33 = vrot.slane %v4737_v61, 9  ;;  %352 = vst.msk [vmem:[#allocation2 + $0x258] sm:$0xff] %vm336_vm6, %v5474_v26  ;;  %341 = vst.msk [vmem:[#allocation2 + $0xa0] sm:$0xff] %vm336_vm6, %v5477_v27 }
  0x91   : > { %v4782_v29 = vcombine.low %v5980_v5, %v2042_v23  ;;  %v2623_v31 = vor.u32 %v2622_v18, %v2619_v17  ;;  %2154 = vrot.lane.b32.xlu1 %v4781_v53, %s5534_s25  ;;  %v2615_v36 = vsel %vm5606_vm2, %v2610_v22, %v2614_v59  ;;  %v2045_v38 = vrot.slane %v4738_v2, 5  ;;  %v6022_v53 = vpop.permute.xlu0 %1310  ;;  %2336 = vst.msk [vmem:[#allocation2 + $0x18] sm:$0xff] %vm336_vm6, %v5478_v28  ;;  %v4869_v58 = vld [vmem:[%s5589_s24 + $0x94] sm:$0xf]  ;;  %v5484_v59 = vld [vmem:[%s5589_s24 + $0x3c] sm:$0xff]   ;;  %v5485_v2 = vld [vmem:[%s5589_s24 + $0x24] sm:$0xff]  }
  0x92   : > { %v2638_v37 = vrot.slane %v2636_v25, 5  ;;  %v2048_v39 = vrot.slane %v5974_v3, 5  ;;  %v837_v42 = vpop.permute.xlu1 %836  ;;  %v4894_v44 = vcombine.low %v2605_v15, %v2615_v36  ;;  %v2633_v46 = vor.u32 %v2632_v32, %v5999_v24  ;;  %v4870_v0 = vld [vmem:[%s5589_s24 + $0x98] sm:$0x1]  ;;  %v4740_v7 = vld [vmem:[%s5589_s24 + $0x84] sm:$0xe] }
  0x93   : > { %v2624_v45 = vrot.slane %v2623_v31, 4  ;;  %v2046_v49 = vsel %vm5698_vm5, %v4767_v33, %v2045_v38  ;;  %v2047_v50 = vrot.slane %v2045_v38, 4  ;;  %v4566_v51 = vrot.slane %v5994_v20, 9  ;;  %885 = vst.msk [vmem:[#allocation2] sm:$0xff] %vm884_vm7, %v837_v42  ;;  %v4741_v9 = vld [vmem:[%s5589_s24 + $0x88] sm:$0xf] }
  0x94   : > { %2848 = vrot.lane.b32.xlu0 %v4894_v44, %s5534_s25  ;;  %v2634_v55 = vrot.slane %v2633_v46, 4  ;;  %v1002_v56 = vrot.slane %v902_v34, 5  ;;  %v1005_v57 = vrot.slane %v6007_v35, 5  ;;  %v4578_v61 = vrot.slane %v937_v41, 9  ;;  %v6053_v10 = vld [vmem:[%s5589_s24 + $0x8c] sm:$0x1] }
  0x95   : > { %v2629_v54 = vsel %vm5606_vm2, %v2624_v45, %v5999_v24  ;;  %2156 = vrot.lane.b32.xlu1 %v4782_v29, %s5534_s25  ;;  %v2049_v60 = vsel %vm5698_vm5, %v2047_v50, %v2048_v39  ;;  %v1086_v62 = vrot.slane %v938_v47, 5  ;;  %v1089_v63 = vrot.slane %v939_v48, 5  ;;  %342 = vst.msk [vmem:[#allocation2 + $0xc8] sm:$0xff] %vm336_vm6, %v5484_v59  ;;  %v904_v15 = vld [vmem:[%s5589_s24 + $0xc] sm:$0xe]  ;;  %2337 = vst.msk [vmem:[#allocation2 + $0x40] sm:$0xff] %vm336_vm6, %v5485_v2 }
  0x96   : > { %v861_v1 = vpop.permute.xlu1 %860  ;;  %v2639_v3 = vsel %vm5606_vm2, %v2634_v55, %v2638_v37  ;;  %v4783_v4 = vcombine.low %v2046_v49, %v2049_v60  ;;  %v1003_v5 = vsel %vm5698_vm5, %v4566_v51, %v1002_v56  ;;  %v1004_v6 = vrot.slane %v1002_v56, 4  ;;  %v905_v21 = vld [vmem:[%s5589_s24 + $0x10] sm:$0xf]  ;;  %v906_v26 = vld [vmem:[%s5589_s24 + $0x14] sm:$0x1]  ;;  %v5488_v38 = vld [vmem:[%s5589_s24 + $0x48] sm:$0xff]  }
  0x97   : > { %897 = vst.msk [vmem:[#allocation2 + $0x1e0] sm:$0xff] %vm884_vm7, %v861_v1  ;;  %v4895_v11 = vcombine.low %v2629_v54, %v2639_v3  ;;  %v1087_v12 = vsel %vm5698_vm5, %v4578_v61, %v1086_v62  ;;  %v1088_v13 = vrot.slane %v1086_v62, 4  ;;  %v2641_v14 = vshrl.u32 %v4868_v52, 16  ;;  %v940_v28 = vld [vmem:[%s5589_s24 + $0x9c] sm:$0xe]  ;;  %v5489_v45 = vld [vmem:[%s5589_s24 + $0x30] sm:$0xff]  }
  0x98   : > { %v1006_v17 = vsel %vm5698_vm5, %v1004_v6, %v1005_v57  ;;  %v2644_v18 = vshll.u32 %v4868_v52, 16  ;;  %v2650_v19 = vshll.u32 %v4869_v58, 16  ;;  %v2654_v20 = vshrl.u32 %v4869_v58, 16  ;;  %v941_v35 = vld [vmem:[%s5589_s24 + $0xa0] sm:$0xf]  ;;  %343 = vst.msk [vmem:[#allocation2 + $0xf0] sm:$0xff] %vm336_vm6, %v5488_v38 }
  0x99   : > { %2850 = vrot.lane.b32.xlu0 %v4895_v11, %s5534_s25  ;;  %2158 = vrot.lane.b32.xlu1 %v4783_v4, %s5534_s25  ;;  %v4582_v22 = vcombine.low %v1003_v5, %v1006_v17  ;;  %v1090_v23 = vsel %vm5698_vm5, %v1088_v13, %v1089_v63  ;;  %v2643_v24 = vrot.slane %v2641_v14, 4  ;;  %v2660_v25 = vshll.u32 %v4870_v0, 16  ;;  %v6075_v36 = vld [vmem:[%s5589_s24 + $0xa4] sm:$0x1]  ;;  %v6078_v37 = vld [vmem:[%s5589_s24 + $0x9c] sm:$0xf] }
  0x9a   : > { %v839_v27 = vpop.permute.xlu0 %838  ;;  %v6070_v29 = vpop.permute.xlu1 %1334  ;;  %v4594_v31 = vcombine.low %v1087_v12, %v1090_v23  ;;  %v2646_v32 = vrot.slane %v2644_v18, 5  ;;  %v2652_v33 = vrot.slane %v2650_v19, 5  ;;  %v2656_v34 = vrot.slane %v2654_v20, 4  ;;  %v4872_v54 = vld [vmem:[%s5589_s24 + $0xa0] sm:$0xf]  ;;  %2338 = vst.msk [vmem:[#allocation2 + $0x68] sm:$0xff] %vm336_vm6, %v5489_v45 }
  0x9b   : > { %886 = vst.msk [vmem:[#allocation2 + $0x28] sm:$0xff] %vm884_vm7, %v839_v27  ;;  %v2662_v39 = vrot.slane %v2660_v25, 5  ;;  %v4768_v41 = vrot.slane %v4740_v7, 9  ;;  %v2052_v42 = vrot.slane %v4741_v9, 5  ;;  %v2055_v44 = vrot.slane %v6053_v10, 5  ;;  %v5490_v61 = vld [vmem:[%s5589_s24 + $0x54] sm:$0xff]  }
  0x9c   : > { %1176 = vst.msk [vmem:[#allocation2 + $0x8] sm:$0xff] %vm336_vm6, %v4582_v22  ;;  %1188 = vst.msk [vmem:[#allocation2 + $0x1e8] sm:$0xff] %vm336_vm6, %v4594_v31  ;;  %v2647_v46 = vor.u32 %v2646_v32, %v2643_v24  ;;  %v2657_v47 = vor.u32 %v2656_v34, %v2652_v33  ;;  %v4567_v48 = vrot.slane %v904_v15, 9  ;;  %v1009_v49 = vrot.slane %v905_v21, 5  ;;  %v4743_v60 = vld [vmem:[%s5589_s24 + $0x90] sm:$0xe] }
  0x9d   : > { %1356 = vst.msk [vmem:[#allocation2 + $0x8] sm:$0xff] %vm884_vm7, %v5956_v40  ;;  %1368 = vst.msk [vmem:[#allocation2 + $0x1e8] sm:$0xff] %vm884_vm7, %v5982_v8  ;;  %v2053_v50 = vsel %vm5698_vm5, %v4768_v41, %v2052_v42  ;;  %v2054_v51 = vrot.slane %v2052_v42, 4  ;;  %v1012_v52 = vrot.slane %v906_v26, 5  ;;  %v4579_v40 = vrot.slane %v940_v28, 9  ;;  %v5491_v3 = vld [vmem:[%s5589_s24 + $0x3c] sm:$0xff]  }
  0x9e   : > { %v6093_v55 = vpop.permute.xlu0 %1312  ;;  %v2648_v56 = vrot.slane %v2647_v46, 4  ;;  %v2658_v57 = vrot.slane %v2657_v47, 4  ;;  %v1010_v58 = vsel %vm5698_vm5, %v4567_v48, %v1009_v49  ;;  %v1011_v59 = vrot.slane %v1009_v49, 4  ;;  %v4873_v8 = vld [vmem:[%s5589_s24 + $0xa4] sm:$0x1]  ;;  %344 = vst.msk [vmem:[#allocation2 + $0x118] sm:$0xff] %vm336_vm6, %v5490_v61 }
  0x9f   : > { %v2056_v62 = vsel %vm5698_vm5, %v2054_v51, %v2055_v44  ;;  %v1093_v63 = vrot.slane %v941_v35, 5  ;;  %v1096_v0 = vrot.slane %v6075_v36, 5  ;;  %v2665_v1 = vshrl.u32 %v6078_v37, 16  ;;  %v863_v2 = vpop.permute.xlu1 %862  ;;  %v3184_v9 = vld [vmem:[#allocation2] sm:$0xff]  ;;  %v4744_v10 = vld [vmem:[%s5589_s24 + $0x94] sm:$0xf] }
  0xa0   : > { %v2653_v4 = vsel %vm5606_vm2, %v2648_v56, %v2652_v33  ;;  %v2663_v5 = vsel %vm5606_vm2, %v2658_v57, %v2662_v39  ;;  %v4784_v6 = vcombine.low %v2053_v50, %v2056_v62  ;;  %v1013_v7 = vsel %vm5698_vm5, %v1011_v59, %v1012_v52  ;;  %v4745_v11 = vld [vmem:[%s5589_s24 + $0x98] sm:$0x1]  ;;  %898 = vst.msk [vmem:[#allocation2 + $0x208] sm:$0xff] %vm884_vm7, %v863_v2  ;;  %v6119_v17 = vld [vmem:[%s5589_s24 + $0x18] sm:$0xe]  ;;  %v3244_v19 = vld [vmem:[#allocation2 + $0x1e0] sm:$0xff] }
  0xa1   : > { %v4896_v12 = vcombine.low %v2653_v4, %v2663_v5  ;;  %v4583_v13 = vcombine.low %v1010_v58, %v1013_v7  ;;  %v1094_v14 = vsel %vm5698_vm5, %v4579_v40, %v1093_v63  ;;  %v1095_v15 = vrot.slane %v1093_v63, 4  ;;  %v6122_v18 = vld [vmem:[%s5589_s24 + $0x1c] sm:$0xf]  ;;  %v5464_v20 = vld [vmem:[%s7100_s1 + $0x80] sm:$0xff]   ;;  %v6130_v21 = vld [vmem:[%s7100_s1 + $0x108] sm:$0xff]   ;;  %2339 = vst.msk [vmem:[#allocation2 + $0x90] sm:$0xff] %vm336_vm6, %v5491_v3 }
  0xa2   : > { %2160 = vrot.lane.b32.xlu1 %v4784_v6, %s5534_s25  ;;  %v2667_v22 = vrot.slane %v2665_v1, 4  ;;  %v2668_v23 = vshll.u32 %v6078_v37, 16  ;;  %v2674_v24 = vshll.u32 %v4872_v54, 16  ;;  %v2678_v25 = vshrl.u32 %v4872_v54, 16  ;;  %v6136_v26 = vld [vmem:[%s5589_s24 + $0x20] sm:$0x1] }
  0xa3   : > { %v943_v27 = vld [vmem:[%s5589_s24 + $0xa8] sm:$0xe]  ;;  %2852 = vrot.lane.b32.xlu0 %v4896_v12, %s5534_s25  ;;  %1177 = vst.msk [vmem:[#allocation2 + $0x30] sm:$0xff] %vm336_vm6, %v4583_v13  ;;  %v1097_v32 = vsel %vm5698_vm5, %v1095_v15, %v1096_v0  ;;  %v2684_v33 = vshll.u32 %v4873_v8, 16  ;;  %v4769_v34 = vrot.slane %v4743_v60, 9  ;;  %v2059_v35 = vrot.slane %v4744_v10, 5  ;;  %v841_v36 = vpop.permute.xlu0 %840  ;;  %v6147_v38 = vpop.permute.xlu1 %1336 }
  0xa4   : > { %v5466_v28 = vld [vmem:[%s7100_s1 + $0xc8] sm:$0xff]   ;;  %1357 = vst.msk [vmem:[#allocation2 + $0x30] sm:$0xff] %vm884_vm7, %v6022_v53  ;;  %v4595_v39 = vcombine.low %v1094_v14, %v1097_v32  ;;  %v2670_v41 = vrot.slane %v2668_v23, 5  ;;  %v2676_v42 = vrot.slane %v2674_v24, 5  ;;  %v2680_v44 = vrot.slane %v2678_v25, 4  ;;  %887 = vst.msk [vmem:[#allocation2 + $0x50] sm:$0xff] %vm884_vm7, %v841_v36 }
  0xa5   : > { %v3185_v31 = vld [vmem:[#allocation2 + $0x8] sm:$0xff]  ;;  %v945_v46 = vld [vmem:[%s5589_s24 + $0xb0] sm:$0x1]  ;;  %v2686_v47 = vrot.slane %v2684_v33, 5  ;;  %v2060_v48 = vsel %vm5698_vm5, %v4769_v34, %v2059_v35  ;;  %v2061_v49 = vrot.slane %v2059_v35, 4  ;;  %v2062_v50 = vrot.slane %v4745_v11, 5 }
  0xa6   : > { %v944_v37 = vld [vmem:[%s5589_s24 + $0xac] sm:$0xf]  ;;  %3632 = vmatprep.mubr.bf16.mxu0 %v3185_v31  ;;  %1189 = vst.msk [vmem:[#allocation2 + $0x210] sm:$0xff] %vm336_vm6, %v4595_v39  ;;  %v2671_v51 = vor.u32 %v2670_v41, %v2667_v22  ;;  %v2681_v52 = vor.u32 %v2680_v44, %v2676_v42  ;;  %v4568_v40 = vrot.slane %v6119_v17, 9  ;;  %v1016_v54 = vrot.slane %v6122_v18, 5  ;;  %v5469_v57 = vld [vmem:[%s7100_s1 + $0xd0] sm:$0xff]  }
  0xa7   : > { %v3245_v45 = vld [vmem:[#allocation2 + $0x1e8] sm:$0xff]  ;;  %3633 = vmatmul.mubr.bf16.vlgmr.msra.gmra.mrb[0].mxu0 %v3184_v9  ;;  %1369 = vst.msk [vmem:[#allocation2 + $0x210] sm:$0xff] %vm884_vm7, %v6070_v29  ;;  %v2063_v58 = vsel %vm5698_vm5, %v2061_v49, %v2062_v50  ;;  %v1019_v59 = vrot.slane %v6136_v26, 5  ;;  %v4580_v8 = vrot.slane %v943_v27, 9  ;;  %v1100_v60 = vrot.slane %v944_v37, 5  ;;  %v865_v62 = vpop.permute.xlu1 %864  ;;  %v5492_v29 = vld [vmem:[%s7100_s1 + $0x110] sm:$0xff]  }
  0xa8   : > { %3728 = vmatprep.mubr.bf16.mxu1 %v3245_v45  ;;  %v5467_v53 = vld [vmem:[%s7100_s1 + $0x88] sm:$0xff]   ;;  %5345 = vmatpush3.bf16.msra.mxu0 %v5858_v43  ;;  %v6174_v43 = vpop.permute.xlu0 %1314  ;;  %v2672_v63 = vrot.slane %v2671_v51, 4  ;;  %v2682_v0 = vrot.slane %v2681_v52, 4  ;;  %v4785_v1 = vcombine.low %v2060_v48, %v2063_v58  ;;  %v1017_v2 = vsel %vm5698_vm5, %v4568_v40, %v1016_v54  ;;  %v4876_v3 = vld [vmem:[%s5589_s24 + $0xb0] sm:$0x1]  ;;  %899 = vst.msk [vmem:[#allocation2 + $0x230] sm:$0xff] %vm884_vm7, %v865_v62 }
  0xa9   : > { %3729 = vmatmul.mubr.bf16.vlgmr.msra.gmra.mrb[0].mxu1 %v3244_v19  ;;  %v4874_v56 = vld [vmem:[%s5589_s24 + $0xa8] sm:$0xf]  ;;  %v6172_v61 = vld [vmem:[%s5589_s24 + $0xac] sm:$0xf]  ;;  %5346 = vmatprep.subr.bf16.mxu0 %v6130_v21  ;;  %v6184_v5 = vld [vmem:[%s5589_s24 + $0x9c] sm:$0xe]  ;;  %v1101_v7 = vsel %vm5698_vm5, %v4580_v8, %v1100_v60 }
  0xaa   : > { %5213 = vmatpush3.bf16.msra.mxu1 %v5464_v20  ;;  %v3189_v4 = vld [vmem:[#allocation2 + $0x28] sm:$0xff]  ;;  %v1018_v6 = vrot.slane %v1016_v54, 4  ;;  %v1102_v9 = vrot.slane %v1100_v60, 4  ;;  %v1103_v10 = vrot.slane %v945_v46, 5  ;;  %v4747_v11 = vld [vmem:[%s5589_s24 + $0xa0] sm:$0xf]  ;;  %v2677_v17 = vsel %vm5606_vm2, %v2672_v63, %v2676_v42  ;;  %2162 = vrot.lane.b32.xlu1 %v4785_v1, %s5534_s25 }
  0xab   : > { %5214 = vmatprep.subr.bf16.mxu1 %v5466_v28  ;;  %v6191_v12 = vld [vmem:[%s5589_s24 + $0xa4] sm:$0x1]  ;;  %v6194_v13 = vld [vmem:[%s5589_s24 + $0x24] sm:$0xe]  ;;  %v5470_v14 = vld [vmem:[%s7100_s1 + $0x90] sm:$0xff]   ;;  %v2687_v18 = vsel %vm5606_vm2, %v2682_v0, %v2686_v47  ;;  %v2689_v19 = vshrl.u32 %v4874_v56, 16  ;;  %v6218_v34 = vpop.permute.xlu1 %1338 }
  0xac   : > { %v5493_v15 = vld [vmem:[%s5589_s24 + $0x60] sm:$0xff]   ;;  %v2692_v20 = vshll.u32 %v4874_v56, 16  ;;  %v911_v22 = vld [vmem:[%s5589_s24 + $0x28] sm:$0xf]  ;;  %v6207_v23 = vld [vmem:[%s5589_s24 + $0x2c] sm:$0x1]  ;;  %5347 = vmatpush3.bf16.msra.mxu0 %v6130_v21  ;;  %v4897_v25 = vcombine.low %v2677_v17, %v2687_v18  ;;  %v1020_v26 = vsel %vm5698_vm5, %v1018_v6, %v1019_v59  ;;  %v1104_v27 = vsel %vm5698_vm5, %v1102_v9, %v1103_v10  ;;  %v843_v33 = vpop.permute.xlu0 %842 }
  0xad   : > { %v5472_v24 = vld [vmem:[%s7100_s1 + $0xd8] sm:$0xff]   ;;  %v3190_v28 = vld [vmem:[#allocation2 + $0x30] sm:$0xff]  ;;  %v2698_v31 = vshll.u32 %v6172_v61, 16  ;;  %v3249_v32 = vld [vmem:[#allocation2 + $0x208] sm:$0xff]  ;;  %5348 = vmatprep.subr.bf16.mxu0 %v5492_v29  ;;  %345 = vst.msk [vmem:[#allocation2 + $0x140] sm:$0xff] %vm336_vm6, %v5493_v15  ;;  %v4584_v35 = vcombine.low %v1017_v2, %v1020_v26  ;;  %v4596_v21 = vcombine.low %v1101_v7, %v1104_v27  ;;  %v2691_v36 = vrot.slane %v2689_v19, 4 }
  0xae   : > { %5215 = vmatpush3.bf16.msra.mxu1 %v5467_v53  ;;  %3640 = vmatprep.mubr.bf16.mxu0 %v3190_v28  ;;  %v2694_v37 = vrot.slane %v2692_v20, 5  ;;  %888 = vst.msk [vmem:[#allocation2 + $0x78] sm:$0xff] %vm884_vm7, %v843_v33  ;;  %v2702_v41 = vshrl.u32 %v6172_v61, 16  ;;  %v2708_v42 = vshll.u32 %v4876_v3, 16  ;;  %v4770_v44 = vrot.slane %v6184_v5, 9  ;;  %v5473_v45 = vld [vmem:[%s7100_s1 + $0x98] sm:$0xff]  }
  0xaf   : > { %5216 = vmatprep.subr.bf16.mxu1 %v5469_v57  ;;  %2854 = vrot.lane.b32.xlu0 %v4897_v25, %s5534_s25  ;;  %v6223_v39 = vrot.slane %v2698_v31, 5  ;;  %1178 = vst.msk [vmem:[#allocation2 + $0x58] sm:$0xff] %vm336_vm6, %v4584_v35  ;;  %1190 = vst.msk [vmem:[#allocation2 + $0x238] sm:$0xff] %vm336_vm6, %v4596_v21  ;;  %v3250_v47 = vld [vmem:[#allocation2 + $0x210] sm:$0xff]  ;;  %v2066_v48 = vrot.slane %v4747_v11, 5  ;;  %v2069_v49 = vrot.slane %v6191_v12, 5  ;;  %v867_v57 = vpop.permute.xlu1 %866 }
  0xb0   : > { %3641 = vmatmul.mubr.bf16.gmra.mrb[4].mxu0 %v3189_v4  ;;  %v2695_v46 = vor.u32 %v2694_v37, %v2691_v36  ;;  %v4569_v50 = vrot.slane %v6194_v13, 9  ;;  %v5475_v53 = vld [vmem:[%s7100_s1 + $0xe0] sm:$0xff]   ;;  %1358 = vst.msk [vmem:[#allocation2 + $0x58] sm:$0xff] %vm884_vm7, %v6093_v55  ;;  %1370 = vst.msk [vmem:[#allocation2 + $0x238] sm:$0xff] %vm884_vm7, %v6147_v38  ;;  %v2704_v51 = vrot.slane %v2702_v41, 4  ;;  %v2710_v52 = vrot.slane %v2708_v42, 5  ;;  %3736 = vmatprep.mubr.bf16.mxu1 %v3250_v47  ;;  %v6242_v56 = vpop.permute.xlu0 %1316 }
  0xb1   : > { %5349 = vmatpush3.bf16.msra.mxu0 %v5492_v29  ;;  %v1023_v40 = vrot.slane %v911_v22, 5  ;;  %v1026_v54 = vrot.slane %v6207_v23, 5  ;;  %v2067_v59 = vsel %vm5698_vm5, %v4770_v44, %v2066_v48  ;;  %v2068_v55 = vrot.slane %v2066_v48, 4  ;;  %3737 = vmatmul.mubr.bf16.gmra.mrb[4].mxu1 %v3249_v32  ;;  %v946_v8 = vld [vmem:[%s5589_s24 + $0xb4] sm:$0xe]  ;;  %900 = vst.msk [vmem:[#allocation2 + $0x258] sm:$0xff] %vm884_vm7, %v867_v57 }
  0xb2   : > { %5217 = vmatpush3.bf16.msra.mxu1 %v5470_v14  ;;  %v2696_v58 = vrot.slane %v2695_v46, 4  ;;  %v947_v38 = vld [vmem:[%s5589_s24 + $0xb8] sm:$0xf]  ;;  %v2705_v60 = vor.u32 %v2704_v51, %v6223_v39  ;;  %v948_v29 = vld [vmem:[%s5589_s24 + $0xbc] sm:$0x1]  ;;  %v4581_v63 = vrot.slane %v946_v8, 9 }
  0xb3   : > { %5218 = vmatprep.subr.bf16.mxu1 %v5472_v24  ;;  %v1024_v61 = vsel %vm5698_vm5, %v4569_v50, %v1023_v40  ;;  %v1025_v62 = vrot.slane %v1023_v40, 4  ;;  %v2070_v1 = vsel %vm5698_vm5, %v2068_v55, %v2069_v49  ;;  %v1107_v2 = vrot.slane %v947_v38, 5  ;;  %v4877_v4 = vld [vmem:[%s5589_s24 + $0xb4] sm:$0xf]  ;;  %v4878_v9 = vld [vmem:[%s5589_s24 + $0xb8] sm:$0xf] }
  0xb4   : > { %v2701_v0 = vsel %vm5606_vm2, %v2696_v58, %v6223_v39  ;;  %v1110_v3 = vrot.slane %v948_v29, 5  ;;  %v2706_v5 = vrot.slane %v2705_v60, 4  ;;  %v4786_v6 = vcombine.low %v2067_v59, %v2070_v1  ;;  %v4879_v10 = vld [vmem:[%s5589_s24 + $0xbc] sm:$0x1]  ;;  %v845_v12 = vpop.permute.xlu0 %844  ;;  %v3194_v18 = vld [vmem:[#allocation2 + $0x50] sm:$0xff]  ;;  %v5476_v19 = vld [vmem:[%s7100_s1 + $0xa0] sm:$0xff]  }
  0xb5   : > { %v1027_v7 = vsel %vm5698_vm5, %v1025_v62, %v1026_v54  ;;  %v2713_v11 = vshrl.u32 %v4877_v4, 16  ;;  %v1108_v14 = vsel %vm5698_vm5, %v4581_v63, %v1107_v2  ;;  %v1109_v15 = vrot.slane %v1107_v2, 4  ;;  %889 = vst.msk [vmem:[#allocation2 + $0xa0] sm:$0xff] %vm884_vm7, %v845_v12  ;;  %v3254_v25 = vld [vmem:[#allocation2 + $0x230] sm:$0xff]  ;;  %v5479_v26 = vld [vmem:[%s7100_s1 + $0xe8] sm:$0xff]  }
  0xb6   : > { %5219 = vmatpush3.bf16.msra.mxu1 %v5473_v45  ;;  %v4585_v13 = vcombine.low %v1024_v61, %v1027_v7  ;;  %v2716_v17 = vshll.u32 %v4877_v4, 16  ;;  %v2711_v20 = vsel %vm5606_vm2, %v2706_v5, %v2710_v52  ;;  %2164 = vrot.lane.b32.xlu1 %v4786_v6, %s5534_s25  ;;  %v2722_v23 = vshll.u32 %v4878_v9, 16  ;;  %v4749_v21 = vld [vmem:[%s5589_s24 + $0xa8] sm:$0xe]  ;;  %v4750_v41 = vld [vmem:[%s5589_s24 + $0xac] sm:$0xf] }
  0xb7   : > { %5220 = vmatprep.subr.bf16.mxu1 %v5475_v53  ;;  %v2715_v22 = vrot.slane %v2713_v11, 4  ;;  %v2726_v24 = vshrl.u32 %v4878_v9, 16  ;;  %v4898_v27 = vcombine.low %v2701_v0, %v2711_v20  ;;  %v1111_v28 = vsel %vm5698_vm5, %v1109_v15, %v1110_v3  ;;  %v3195_v31 = vld [vmem:[#allocation2 + $0x58] sm:$0xff]  ;;  %v4751_v42 = vld [vmem:[%s5589_s24 + $0xb0] sm:$0x1]  ;;  %v5480_v50 = vld [vmem:[%s7100_s1 + $0xa8] sm:$0xff]  }
  0xb8   : > { %1179 = vst.msk [vmem:[#allocation2 + $0x80] sm:$0xff] %vm336_vm6, %v4585_v13  ;;  %v2718_v32 = vrot.slane %v2716_v17, 5  ;;  %v2732_v33 = vshll.u32 %v4879_v10, 16  ;;  %v3255_v35 = vld [vmem:[#allocation2 + $0x238] sm:$0xff]  ;;  %v4597_v36 = vcombine.low %v1108_v14, %v1111_v28  ;;  %3648 = vmatprep.mubr.bf16.mxu0 %v3195_v31  ;;  %v2724_v37 = vrot.slane %v2722_v23, 5  ;;  %v6283_v44 = vpop.permute.xlu0 %1318  ;;  %v5494_v8 = vld [vmem:[%s5589_s24 + $0x48] sm:$0xff]  }
  0xb9   : > { %1359 = vst.msk [vmem:[#allocation2 + $0x80] sm:$0xff] %vm884_vm7, %v6174_v43  ;;  %v2728_v39 = vrot.slane %v2726_v24, 4  ;;  %3744 = vmatprep.mubr.bf16.mxu1 %v3255_v35  ;;  %2856 = vrot.lane.b32.xlu0 %v4898_v27, %s5534_s25  ;;  %v4771_v47 = vrot.slane %v4749_v21, 9  ;;  %v2073_v48 = vrot.slane %v4750_v41, 5  ;;  %v913_v49 = vld [vmem:[%s5589_s24 + $0x30] sm:$0xe]  ;;  %v2833_v43 = vpop.permute.xlu1 %2832 }
  0xba   : > { %v2719_v45 = vor.u32 %v2718_v32, %v2715_v22  ;;  %v2734_v46 = vrot.slane %v2732_v33, 5  ;;  %3649 = vmatmul.mubr.bf16.gmra.mrb[8].mxu0 %v3194_v18  ;;  %1191 = vst.msk [vmem:[#allocation2 + $0x260] sm:$0xff] %vm336_vm6, %v4597_v36  ;;  %v2076_v51 = vrot.slane %v4751_v42, 5  ;;  %v914_v52 = vld [vmem:[%s5589_s24 + $0x34] sm:$0xf]  ;;  %v4570_v54 = vrot.slane %v913_v49, 9  ;;  %3745 = vmatmul.mubr.bf16.gmra.mrb[8].mxu1 %v3254_v25 }
  0xbb   : > { %v2729_v53 = vor.u32 %v2728_v39, %v2724_v37  ;;  %v915_v40 = vld [vmem:[%s5589_s24 + $0x38] sm:$0x1]  ;;  %2880 = vst.msk [vmem:[#allocation2 + $0x18] sm:$0xff] %vm884_vm7, %v2833_v43  ;;  %1371 = vst.msk [vmem:[#allocation2 + $0x260] sm:$0xff] %vm884_vm7, %v6218_v34  ;;  %v2074_v58 = vsel %vm5698_vm5, %v4771_v47, %v2073_v48  ;;  %v2075_v59 = vrot.slane %v2073_v48, 4  ;;  %v1030_v55 = vrot.slane %v914_v52, 5  ;;  %5221 = vmatpush3.bf16.msra.mxu1 %v5476_v19 }
  0xbc   : > { %v2720_v57 = vrot.slane %v2719_v45, 4  ;;  %v1033_v60 = vrot.slane %v915_v40, 5  ;;  %5222 = vmatprep.subr.bf16.mxu1 %v5479_v26  ;;  %v5481_v61 = vld [vmem:[%s7100_s1 + $0xf0] sm:$0xff]   ;;  %v3199_v0 = vld [vmem:[#allocation2 + $0x78] sm:$0xff]  ;;  %2340 = vst.msk [vmem:[#allocation2 + $0xb8] sm:$0xff] %vm336_vm6, %v5494_v8 }
  0xbd   : > { %v2730_v38 = vrot.slane %v2729_v53, 4  ;;  %v2077_v34 = vsel %vm5698_vm5, %v2075_v59, %v2076_v51  ;;  %v1031_v29 = vsel %vm5698_vm5, %v4570_v54, %v1030_v55  ;;  %v1032_v63 = vrot.slane %v1030_v55, 4  ;;  %v6308_v1 = vpop.permute.xlu1 %2140  ;;  %v5483_v2 = vld [vmem:[%s7100_s1 + $0xb0] sm:$0xff]   ;;  %v5486_v6 = vld [vmem:[%s7100_s1 + $0xf8] sm:$0xff]   ;;  %v4880_v13 = vld [vmem:[%s5589_s24 + $0xc0] sm:$0xf] }
  0xbe   : > { %v2725_v62 = vsel %vm5606_vm2, %v2720_v57, %v2724_v37  ;;  %v4787_v4 = vcombine.low %v2074_v58, %v2077_v34  ;;  %v847_v5 = vpop.permute.xlu0 %846  ;;  %v3259_v11 = vld [vmem:[#allocation2 + $0x258] sm:$0xff]  ;;  %v4881_v14 = vld [vmem:[%s5589_s24 + $0xc4] sm:$0xf]  ;;  %v4882_v15 = vld [vmem:[%s5589_s24 + $0xc8] sm:$0x1]  ;;  %v2737_v17 = vshrl.u32 %v4880_v13, 16 }
  0xbf   : > { %v2735_v3 = vsel %vm5606_vm2, %v2730_v38, %v2734_v46  ;;  %v1034_v9 = vsel %vm5698_vm5, %v1032_v63, %v1033_v60  ;;  %5223 = vmatpush3.bf16.msra.mxu1 %v5480_v50  ;;  %890 = vst.msk [vmem:[#allocation2 + $0xc8] sm:$0xff] %vm884_vm7, %v847_v5  ;;  %v2740_v18 = vshll.u32 %v4880_v13, 16  ;;  %v5487_v19 = vld [vmem:[%s7100_s1 + $0xb8] sm:$0xff]   ;;  %v2746_v20 = vshll.u32 %v4881_v14, 16  ;;  %v4752_v28 = vld [vmem:[%s5589_s24 + $0xb4] sm:$0xe] }
  0xc0   : > { %v4899_v7 = vcombine.low %v2725_v62, %v2735_v3  ;;  %v3200_v10 = vld [vmem:[#allocation2 + $0x80] sm:$0xff]  ;;  %2166 = vrot.lane.b32.xlu1 %v4787_v4, %s5534_s25  ;;  %v4586_v12 = vcombine.low %v1031_v29, %v1034_v9  ;;  %v2750_v22 = vshrl.u32 %v4881_v14, 16  ;;  %v2756_v23 = vshll.u32 %v4882_v15, 16  ;;  %5224 = vmatprep.subr.bf16.mxu1 %v5481_v61  ;;  %v4753_v21 = vld [vmem:[%s5589_s24 + $0xb8] sm:$0xf]  ;;  %v5495_v34 = vld [vmem:[%s5589_s24 + $0x6c] sm:$0xff]  }
  0xc1   : > { %3656 = vmatprep.mubr.bf16.mxu0 %v3200_v10  ;;  %v2739_v26 = vrot.slane %v2737_v17, 4  ;;  %v2742_v27 = vrot.slane %v2740_v18, 5  ;;  %v2748_v32 = vrot.slane %v2746_v20, 5  ;;  %v4772_v36 = vrot.slane %v4752_v28, 9  ;;  %v4754_v37 = vld [vmem:[%s5589_s24 + $0xbc] sm:$0x1] }
  0xc2   : > { %2858 = vrot.lane.b32.xlu0 %v4899_v7, %s5534_s25  ;;  %3657 = vmatmul.mubr.bf16.gmra.mrb[12].mxu0 %v3199_v0  ;;  %1180 = vst.msk [vmem:[#allocation2 + $0xa8] sm:$0xff] %vm336_vm6, %v4586_v12  ;;  %v3260_v24 = vld [vmem:[#allocation2 + $0x260] sm:$0xff]  ;;  %v6331_v25 = vpop.permute.xlu0 %1320  ;;  %v2752_v33 = vrot.slane %v2750_v22, 4  ;;  %v2758_v35 = vrot.slane %v2756_v23, 5  ;;  %v2080_v39 = vrot.slane %v4753_v21, 5  ;;  %v3187_v42 = vld [vmem:[#allocation2 + $0x18] sm:$0xff] }
  0xc3   : > { %1360 = vst.msk [vmem:[#allocation2 + $0xa8] sm:$0xff] %vm884_vm7, %v6242_v56  ;;  %3752 = vmatprep.mubr.bf16.mxu1 %v3260_v24  ;;  %5225 = vmatpush3.bf16.msra.mxu1 %v5483_v2  ;;  %v2835_v31 = vpop.permute.xlu1 %2834  ;;  %v2743_v56 = vor.u32 %v2742_v27, %v2739_v26  ;;  %v916_v41 = vld [vmem:[%s5589_s24 + $0x3c] sm:$0xe]  ;;  %v2083_v46 = vrot.slane %v4754_v37, 5  ;;  %v917_v47 = vld [vmem:[%s5589_s24 + $0x40] sm:$0xf] }
  0xc4   : > { %3753 = vmatmul.mubr.bf16.gmra.mrb[12].mxu1 %v3259_v11  ;;  %2881 = vst.msk [vmem:[#allocation2 + $0x40] sm:$0xff] %vm884_vm7, %v2835_v31  ;;  %5226 = vmatprep.subr.bf16.mxu1 %v5486_v6  ;;  %v2753_v45 = vor.u32 %v2752_v33, %v2748_v32  ;;  %v918_v48 = vld [vmem:[%s5589_s24 + $0x44] sm:$0x1]  ;;  %v4571_v49 = vrot.slane %v916_v41, 9  ;;  %v2081_v50 = vsel %vm5698_vm5, %v4772_v36, %v2080_v39  ;;  %v2082_v53 = vrot.slane %v2080_v39, 4  ;;  %v5496_v39 = vld [vmem:[%s5589_s24 + $0x54] sm:$0xff]  }
  0xc5   : > { %3793 = vmatprep.mubr.bf16.mxu1 %v3187_v42  ;;  %v2744_v43 = vrot.slane %v2743_v56, 4  ;;  %v1037_v51 = vrot.slane %v917_v47, 5  ;;  %v4646_v52 = vld [vmem:[%s5589_s24 + $0xc] sm:$0xf]  ;;  %v1040_v57 = vrot.slane %v918_v48, 5  ;;  %v3204_v62 = vld [vmem:[#allocation2 + $0xa0] sm:$0xff] }
  0xc6   : > { %v2754_v54 = vrot.slane %v2753_v45, 4  ;;  %v4647_v58 = vld [vmem:[%s5589_s24 + $0x10] sm:$0xf]  ;;  %v4648_v59 = vld [vmem:[%s5589_s24 + $0x14] sm:$0x1]  ;;  %v2084_v38 = vsel %vm5698_vm5, %v2082_v53, %v2083_v46  ;;  %v1421_v0 = vshrl.u32 %v4646_v52, 16 }
  0xc7   : > { %5227 = vmatpush3.bf16.msra.mxu1 %v5487_v19  ;;  %v6345_v40 = vpop.permute.xlu1 %2142  ;;  %v2749_v8 = vsel %vm5606_vm2, %v2744_v43, %v2748_v32  ;;  %v1038_v60 = vsel %vm5698_vm5, %v4571_v49, %v1037_v51  ;;  %v1039_v61 = vrot.slane %v1037_v51, 4  ;;  %v4788_v63 = vcombine.low %v2081_v50, %v2084_v38  ;;  %346 = vst.msk [vmem:[#allocation2 + $0x168] sm:$0xff] %vm336_vm6, %v5495_v34  ;;  %v4883_v22 = vld [vmem:[%s5589_s24 + $0xcc] sm:$0xf]  ;;  %v4884_v23 = vld [vmem:[%s5589_s24 + $0xd0] sm:$0xf] }
  0xc8   : > { %v849_v55 = vpop.permute.xlu0 %848  ;;  %v2759_v29 = vsel %vm5606_vm2, %v2754_v54, %v2758_v35  ;;  %v1424_v2 = vshll.u32 %v4646_v52, 16  ;;  %v1430_v5 = vshll.u32 %v4647_v58, 16  ;;  %v1434_v6 = vshrl.u32 %v4647_v58, 16  ;;  %v4885_v26 = vld [vmem:[%s5589_s24 + $0xd4] sm:$0x1]  ;;  %v3209_v48 = vld [vmem:[#allocation2 + $0xc8] sm:$0xff] }
  0xc9   : > { %891 = vst.msk [vmem:[#allocation2 + $0xf0] sm:$0xff] %vm884_vm7, %v849_v55  ;;  %v4900_v3 = vcombine.low %v2749_v8, %v2759_v29  ;;  %v1041_v4 = vsel %vm5698_vm5, %v1039_v61, %v1040_v57  ;;  %2168 = vrot.lane.b32.xlu1 %v4788_v63, %s5534_s25  ;;  %v1423_v9 = vrot.slane %v1421_v0, 4  ;;  %v1440_v11 = vshll.u32 %v4648_v59, 16  ;;  %v4755_v46 = vld [vmem:[%s5589_s24 + $0xc0] sm:$0xe] }
  0xca   : > { %v4587_v7 = vcombine.low %v1038_v60, %v1041_v4  ;;  %v1426_v10 = vrot.slane %v1424_v2, 5  ;;  %v3205_v12 = vld [vmem:[#allocation2 + $0xa8] sm:$0xff]  ;;  %v1432_v13 = vrot.slane %v1430_v5, 5  ;;  %v1436_v14 = vrot.slane %v1434_v6, 4  ;;  %v4756_v47 = vld [vmem:[%s5589_s24 + $0xc4] sm:$0xf] }
  0xcb   : > { %2860 = vrot.lane.b32.xlu0 %v4900_v3, %s5534_s25  ;;  %3664 = vmatprep.mubr.bf16.mxu0 %v3205_v12  ;;  %v1442_v19 = vrot.slane %v1440_v11, 5  ;;  %v2761_v27 = vshrl.u32 %v4883_v22, 16  ;;  %v2764_v28 = vshll.u32 %v4883_v22, 16  ;;  %v2770_v31 = vshll.u32 %v4884_v23, 16  ;;  %v4757_v53 = vld [vmem:[%s5589_s24 + $0xc8] sm:$0x1] }
  0xcc   : > { %v2837_v15 = vpop.permute.xlu1 %2836  ;;  %v6364_v17 = vpop.permute.xlu0 %1322  ;;  %1181 = vst.msk [vmem:[#allocation2 + $0xd0] sm:$0xff] %vm336_vm6, %v4587_v7  ;;  %v1427_v18 = vor.u32 %v1426_v10, %v1423_v9  ;;  %3665 = vmatmul.mubr.bf16.gmra.mrb[16].mxu0 %v3204_v62  ;;  %v1437_v20 = vor.u32 %v1436_v14, %v1432_v13  ;;  %v2774_v33 = vshrl.u32 %v4884_v23, 16  ;;  %v2780_v35 = vshll.u32 %v4885_v26, 16  ;;  %v919_v54 = vld [vmem:[%s5589_s24 + $0x48] sm:$0xe]  ;;  %2341 = vst.msk [vmem:[#allocation2 + $0xe0] sm:$0xff] %vm336_vm6, %v5496_v39 }
  0xcd   : > { %2882 = vst.msk [vmem:[#allocation2 + $0x68] sm:$0xff] %vm884_vm7, %v2837_v15  ;;  %1361 = vst.msk [vmem:[#allocation2 + $0xd0] sm:$0xff] %vm884_vm7, %v6283_v44  ;;  %v2763_v36 = vrot.slane %v2761_v27, 4  ;;  %v2766_v56 = vrot.slane %v2764_v28, 5  ;;  %v2772_v37 = vrot.slane %v2770_v31, 5  ;;  %v4773_v51 = vrot.slane %v4755_v46, 9 }
  0xce   : > { %v1428_v24 = vrot.slane %v1427_v18, 4  ;;  %v1438_v32 = vrot.slane %v1437_v20, 4  ;;  %v2776_v42 = vrot.slane %v2774_v33, 4  ;;  %v2782_v45 = vrot.slane %v2780_v35, 5  ;;  %v920_v59 = vld [vmem:[%s5589_s24 + $0x4c] sm:$0xf] }
  0xcf   : > { %v2767_v50 = vor.u32 %v2766_v56, %v2763_v36  ;;  %v2087_v52 = vrot.slane %v4756_v47, 5  ;;  %v2090_v58 = vrot.slane %v4757_v53, 5  ;;  %v921_v55 = vld [vmem:[%s5589_s24 + $0x50] sm:$0x1]  ;;  %v4572_v8 = vrot.slane %v919_v54, 9  ;;  %v3192_v28 = vld [vmem:[#allocation2 + $0x40] sm:$0xff] }
  0xd0   : > { %v6373_v21 = vpop.permute.xlu1 %2144  ;;  %v1433_v44 = vsel %vm5606_vm2, %v1428_v24, %v1432_v13  ;;  %v1443_v41 = vsel %vm5606_vm2, %v1438_v32, %v1442_v19  ;;  %v2777_v57 = vor.u32 %v2776_v42, %v2772_v37  ;;  %v1044_v62 = vrot.slane %v920_v59, 5  ;;  %v4649_v34 = vld [vmem:[%s5589_s24 + $0x18] sm:$0xf]  ;;  %v4650_v2 = vld [vmem:[%s5589_s24 + $0x1c] sm:$0xf] }
  0xd1   : > { %v4694_v43 = vcombine.low %v1433_v44, %v1443_v41  ;;  %v2768_v38 = vrot.slane %v2767_v50, 4  ;;  %v2088_v60 = vsel %vm5698_vm5, %v4773_v51, %v2087_v52  ;;  %v2089_v61 = vrot.slane %v2087_v52, 4  ;;  %v4651_v3 = vld [vmem:[%s5589_s24 + $0x20] sm:$0x1]  ;;  %v922_v20 = vld [vmem:[%s5589_s24 + $0x54] sm:$0xe] }
  0xd2   : > { %v2778_v63 = vrot.slane %v2777_v57, 4  ;;  %v1047_v0 = vrot.slane %v921_v55, 5  ;;  %v1045_v9 = vsel %vm5698_vm5, %v4572_v8, %v1044_v62  ;;  %v1445_v12 = vshrl.u32 %v4649_v34, 16  ;;  %v923_v22 = vld [vmem:[%s5589_s24 + $0x58] sm:$0xf] }
  0xd3   : > { %v851_v49 = vpop.permute.xlu0 %850  ;;  %1868 = vst.msk [vmem:[#allocation2 + $0x10] sm:$0xff] %vm336_vm6, %v4694_v43  ;;  %v2773_v6 = vsel %vm5606_vm2, %v2768_v38, %v2772_v37  ;;  %v2091_v7 = vsel %vm5698_vm5, %v2089_v61, %v2090_v58  ;;  %v1448_v13 = vshll.u32 %v4649_v34, 16  ;;  %v1454_v18 = vshll.u32 %v4650_v2, 16  ;;  %v924_v31 = vld [vmem:[%s5589_s24 + $0x5c] sm:$0x1] }
  0xd4   : > { %892 = vst.msk [vmem:[#allocation2 + $0x118] sm:$0xff] %vm884_vm7, %v851_v49  ;;  %v3210_v29 = vld [vmem:[#allocation2 + $0xd0] sm:$0xff]  ;;  %2188 = vst.msk [vmem:[#allocation2 + $0x10] sm:$0xff] %vm884_vm7, %v6308_v1  ;;  %v1046_v1 = vrot.slane %v1044_v62, 4  ;;  %v2783_v10 = vsel %vm5606_vm2, %v2778_v63, %v2782_v45  ;;  %v4789_v11 = vcombine.low %v2088_v60, %v2091_v7  ;;  %v1458_v19 = vshrl.u32 %v4650_v2, 16  ;;  %v5497_v53 = vld [vmem:[%s5589_s24 + $0x78] sm:$0xff]  }
  0xd5   : > { %3672 = vmatprep.mubr.bf16.mxu0 %v3210_v29  ;;  %v4901_v14 = vcombine.low %v2773_v6, %v2783_v10  ;;  %v1447_v24 = vrot.slane %v1445_v12, 4  ;;  %v1450_v26 = vrot.slane %v1448_v13, 5  ;;  %v1464_v27 = vshll.u32 %v4651_v3, 16  ;;  %v4652_v56 = vld [vmem:[%s5589_s24 + $0x24] sm:$0xf]  ;;  %347 = vst.msk [vmem:[#allocation2 + $0x190] sm:$0xff] %vm336_vm6, %v5497_v53 }
  0xd6   : > { %v2839_v4 = vpop.permute.xlu1 %2838  ;;  %3673 = vmatmul.mubr.bf16.gmra.mrb[20].mxu0 %v3209_v48  ;;  %v1048_v15 = vsel %vm5698_vm5, %v1046_v1, %v1047_v0  ;;  %2170 = vrot.lane.b32.xlu1 %v4789_v11, %s5534_s25  ;;  %v1456_v33 = vrot.slane %v1454_v18, 5  ;;  %v1460_v35 = vrot.slane %v1458_v19, 4  ;;  %v4573_v44 = vrot.slane %v922_v20, 9  ;;  %v4653_v42 = vld [vmem:[%s5589_s24 + $0x28] sm:$0xf]  ;;  %v3214_v3 = vld [vmem:[#allocation2 + $0xf0] sm:$0xff] }
  0xd7   : > { %v6396_v5 = vpop.permute.xlu0 %1324  ;;  %2883 = vst.msk [vmem:[#allocation2 + $0x90] sm:$0xff] %vm884_vm7, %v2839_v4  ;;  %v4588_v23 = vcombine.low %v1045_v9, %v1048_v15  ;;  %2862 = vrot.lane.b32.xlu0 %v4901_v14, %s5534_s25  ;;  %v1051_v36 = vrot.slane %v923_v22, 5  ;;  %v1451_v37 = vor.u32 %v1450_v26, %v1447_v24  ;;  %v1466_v39 = vrot.slane %v1464_v27, 5  ;;  %v4654_v45 = vld [vmem:[%s5589_s24 + $0x2c] sm:$0x1]  ;;  %v5498_v20 = vld [vmem:[%s5589_s24 + $0x60] sm:$0xff]  }
  0xd8   : > { %v1054_v41 = vrot.slane %v924_v31, 5  ;;  %v1461_v47 = vor.u32 %v1460_v35, %v1456_v33  ;;  %v1469_v50 = vshrl.u32 %v4652_v56, 16  ;;  %v1472_v52 = vshll.u32 %v4652_v56, 16  ;;  %v925_v62 = vld [vmem:[%s5589_s24 + $0x60] sm:$0xe]  ;;  %2342 = vst.msk [vmem:[#allocation2 + $0x108] sm:$0xff] %vm336_vm6, %v5498_v20 }
  0xd9   : > { %1182 = vst.msk [vmem:[#allocation2 + $0xf8] sm:$0xff] %vm336_vm6, %v4588_v23  ;;  %v1052_v49 = vsel %vm5698_vm5, %v4573_v44, %v1051_v36  ;;  %v1053_v43 = vrot.slane %v1051_v36, 4  ;;  %v1452_v51 = vrot.slane %v1451_v37, 4  ;;  %v1478_v54 = vshll.u32 %v4653_v42, 16  ;;  %v926_v4 = vld [vmem:[%s5589_s24 + $0x64] sm:$0xf] }
  0xda   : > { %v6413_v32 = vpop.permute.xlu1 %2146  ;;  %1362 = vst.msk [vmem:[#allocation2 + $0xf8] sm:$0xff] %vm884_vm7, %v6331_v25  ;;  %v1482_v57 = vshrl.u32 %v4653_v42, 16  ;;  %v1462_v58 = vrot.slane %v1461_v47, 4  ;;  %v1471_v59 = vrot.slane %v1469_v50, 4  ;;  %v1488_v55 = vshll.u32 %v4654_v45, 16 }
  0xdb   : > { %v3186_v48 = vld [vmem:[#allocation2 + $0x10] sm:$0xff]  ;;  %v1055_v25 = vsel %vm5698_vm5, %v1053_v43, %v1054_v41  ;;  %v1457_v8 = vsel %vm5606_vm2, %v1452_v51, %v1456_v33  ;;  %v1474_v60 = vrot.slane %v1472_v52, 5  ;;  %v1480_v61 = vrot.slane %v1478_v54, 5  ;;  %v927_v6 = vld [vmem:[%s5589_s24 + $0x68] sm:$0x1]  ;;  %v3219_v51 = vld [vmem:[#allocation2 + $0x118] sm:$0xff] }
  0xdc   : > { %3794 = vmatmul.mubr.bf16.vlgmr.msra.gmra.mrb[16].mxu1 %v3186_v48  ;;  %v4589_v38 = vcombine.low %v1052_v49, %v1055_v25  ;;  %v1467_v63 = vsel %vm5606_vm2, %v1462_v58, %v1466_v39  ;;  %v1484_v0 = vrot.slane %v1482_v57, 4  ;;  %v1490_v2 = vrot.slane %v1488_v55, 5  ;;  %v4655_v11 = vld [vmem:[%s5589_s24 + $0x30] sm:$0xf]  ;;  %v4656_v12 = vld [vmem:[%s5589_s24 + $0x34] sm:$0xf] }
  0xdd   : > { %v853_v46 = vpop.permute.xlu0 %852  ;;  %3801 = vmatprep.mubr.bf16.mxu1 %v3192_v28  ;;  %v4695_v7 = vcombine.low %v1457_v8, %v1467_v63  ;;  %v1475_v9 = vor.u32 %v1474_v60, %v1471_v59  ;;  %v4574_v1 = vrot.slane %v925_v62, 9  ;;  %v1058_v10 = vrot.slane %v926_v4, 5  ;;  %v4657_v15 = vld [vmem:[%s5589_s24 + $0x38] sm:$0x1]  ;;  %v928_v48 = vld [vmem:[%s5589_s24 + $0x6c] sm:$0xe] }
  0xde   : > { %893 = vst.msk [vmem:[#allocation2 + $0x140] sm:$0xff] %vm884_vm7, %v853_v46  ;;  %v1485_v13 = vor.u32 %v1484_v0, %v1480_v61  ;;  %v1061_v14 = vrot.slane %v927_v6, 5  ;;  %v1493_v18 = vshrl.u32 %v4655_v11, 16  ;;  %v1496_v19 = vshll.u32 %v4655_v11, 16  ;;  %v929_v49 = vld [vmem:[%s5589_s24 + $0x70] sm:$0xf] }
  0xdf   : > { %1183 = vst.msk [vmem:[#allocation2 + $0x120] sm:$0xff] %vm336_vm6, %v4589_v38  ;;  %1869 = vst.msk [vmem:[#allocation2 + $0x38] sm:$0xff] %vm336_vm6, %v4695_v7  ;;  %v1476_v22 = vrot.slane %v1475_v9, 4  ;;  %v1059_v24 = vsel %vm5698_vm5, %v4574_v1, %v1058_v10  ;;  %v1060_v26 = vrot.slane %v1058_v10, 4  ;;  %v1502_v27 = vshll.u32 %v4656_v12, 16  ;;  %v3197_v43 = vld [vmem:[#allocation2 + $0x68] sm:$0xff] }
  0xe0   : > { %v2841_v34 = vpop.permute.xlu1 %2840  ;;  %1363 = vst.msk [vmem:[#allocation2 + $0x120] sm:$0xff] %vm884_vm7, %v6364_v17  ;;  %2189 = vst.msk [vmem:[#allocation2 + $0x38] sm:$0xff] %vm884_vm7, %v6345_v40  ;;  %v1486_v17 = vrot.slane %v1485_v13, 4  ;;  %v1495_v31 = vrot.slane %v1493_v18, 4  ;;  %v1498_v33 = vrot.slane %v1496_v19, 5  ;;  %v1506_v35 = vshrl.u32 %v4656_v12, 16 }
  0xe1   : > { %v6432_v29 = vpop.permute.xlu0 %1326  ;;  %2884 = vst.msk [vmem:[#allocation2 + $0xb8] sm:$0xff] %vm884_vm7, %v2841_v34  ;;  %v3215_v23 = vld [vmem:[#allocation2 + $0xf8] sm:$0xff]  ;;  %v1481_v44 = vsel %vm5606_vm2, %v1476_v22, %v1480_v61  ;;  %v1062_v36 = vsel %vm5698_vm5, %v1060_v26, %v1061_v14  ;;  %v1504_v56 = vrot.slane %v1502_v27, 5  ;;  %v1512_v37 = vshll.u32 %v4657_v15, 16  ;;  %v930_v52 = vld [vmem:[%s5589_s24 + $0x74] sm:$0x1] }
  0xe2   : > { %3680 = vmatprep.mubr.bf16.mxu0 %v3215_v23  ;;  %v1491_v39 = vsel %vm5606_vm2, %v1486_v17, %v1490_v2  ;;  %v4590_v41 = vcombine.low %v1059_v24, %v1062_v36  ;;  %v1499_v42 = vor.u32 %v1498_v33, %v1495_v31  ;;  %v1508_v45 = vrot.slane %v1506_v35, 4  ;;  %v5499_v58 = vld [vmem:[%s7100_s1 + $0x118] sm:$0xff]   ;;  %v4659_v8 = vld [vmem:[%s5589_s24 + $0x40] sm:$0xf]  ;;  %v5500_v6 = vld [vmem:[%s5589_s24 + $0x84] sm:$0xff]  }
  0xe3   : > { %3681 = vmatmul.mubr.bf16.gmra.mrb[24].mxu0 %v3214_v3  ;;  %v4696_v46 = vcombine.low %v1481_v44, %v1491_v39  ;;  %v1514_v47 = vrot.slane %v1512_v37, 5  ;;  %v4575_v54 = vrot.slane %v928_v48, 9  ;;  %v1065_v57 = vrot.slane %v929_v49, 5  ;;  %v4658_v55 = vld [vmem:[%s5589_s24 + $0x3c] sm:$0xf]  ;;  %5350 = vmatprep.subr.bf16.mxu0 %v5499_v58  ;;  %v5501_v10 = vld [vmem:[%s5589_s24 + $0x6c] sm:$0xff]  }
  0xe4   : > { %v6449_v28 = vpop.permute.xlu1 %2148  ;;  %1184 = vst.msk [vmem:[#allocation2 + $0x148] sm:$0xff] %vm336_vm6, %v4590_v41  ;;  %v1500_v50 = vrot.slane %v1499_v42, 4  ;;  %v1509_v53 = vor.u32 %v1508_v45, %v1504_v56  ;;  %v1068_v59 = vrot.slane %v930_v52, 5  ;;  %v1517_v2 = vshrl.u32 %v4658_v55, 16  ;;  %5351 = vmatpush3.bf16.msra.mxu0 %v5499_v58  ;;  %v931_v15 = vld [vmem:[%s5589_s24 + $0x78] sm:$0xe] }
  0xe5   : > { %1870 = vst.msk [vmem:[#allocation2 + $0x60] sm:$0xff] %vm336_vm6, %v4696_v46  ;;  %v1066_v62 = vsel %vm5698_vm5, %v4575_v54, %v1065_v57  ;;  %v1067_v34 = vrot.slane %v1065_v57, 4  ;;  %v1526_v3 = vshll.u32 %v4659_v8, 16  ;;  %v1530_v4 = vshrl.u32 %v4659_v8, 16  ;;  %348 = vst.msk [vmem:[#allocation2 + $0x1b8] sm:$0xff] %vm336_vm6, %v5500_v6  ;;  %v3202_v33 = vld [vmem:[#allocation2 + $0x90] sm:$0xff] }
  0xe6   : > { %1364 = vst.msk [vmem:[#allocation2 + $0x148] sm:$0xff] %vm884_vm7, %v6396_v5  ;;  %2190 = vst.msk [vmem:[#allocation2 + $0x60] sm:$0xff] %vm884_vm7, %v6373_v21  ;;  %v1505_v60 = vsel %vm5606_vm2, %v1500_v50, %v1504_v56  ;;  %v1510_v61 = vrot.slane %v1509_v53, 4  ;;  %v4660_v5 = vld [vmem:[%s5589_s24 + $0x44] sm:$0x1]  ;;  %v1520_v21 = vshll.u32 %v4658_v55, 16 }
  0xe7   : > { %v855_v40 = vpop.permute.xlu0 %854  ;;  %v3220_v25 = vld [vmem:[#allocation2 + $0x120] sm:$0xff]  ;;  %v3191_v0 = vld [vmem:[#allocation2 + $0x38] sm:$0xff]  ;;  %v1069_v9 = vsel %vm5698_vm5, %v1067_v34, %v1068_v59  ;;  %v1536_v1 = vshll.u32 %v4660_v5, 16  ;;  %v1519_v13 = vrot.slane %v1517_v2, 4  ;;  %v1528_v19 = vrot.slane %v1526_v3, 5  ;;  %2343 = vst.msk [vmem:[#allocation2 + $0x130] sm:$0xff] %vm336_vm6, %v5501_v10 }
  0xe8   : > { %894 = vst.msk [vmem:[#allocation2 + $0x168] sm:$0xff] %vm884_vm7, %v855_v40  ;;  %3688 = vmatprep.mubr.bf16.mxu0 %v3220_v25  ;;  %3802 = vmatmul.mubr.bf16.gmra.mrb[20].mxu1 %v3191_v0  ;;  %v1515_v7 = vsel %vm5606_vm2, %v1510_v61, %v1514_v47  ;;  %v4591_v12 = vcombine.low %v1066_v62, %v1069_v9  ;;  %v1522_v14 = vrot.slane %v1520_v21, 5  ;;  %v1532_v20 = vrot.slane %v1530_v4, 4  ;;  %v932_v22 = vld [vmem:[%s5589_s24 + $0x7c] sm:$0xf]  ;;  %v3224_v36 = vld [vmem:[#allocation2 + $0x140] sm:$0xff] }
  0xe9   : > { %3809 = vmatprep.mubr.bf16.mxu1 %v3197_v43  ;;  %v4697_v11 = vcombine.low %v1505_v60, %v1515_v7  ;;  %v4576_v23 = vrot.slane %v931_v15, 9  ;;  %v1538_v26 = vrot.slane %v1536_v1, 5  ;;  %v933_v27 = vld [vmem:[%s5589_s24 + $0x80] sm:$0x1]  ;;  %v1072_v17 = vrot.slane %v932_v22, 5  ;;  %v5502_v8 = vld [vmem:[%s5589_s24 + $0x78] sm:$0xff]  }
  0xea   : > { %1185 = vst.msk [vmem:[#allocation2 + $0x170] sm:$0xff] %vm336_vm6, %v4591_v12  ;;  %v1523_v24 = vor.u32 %v1522_v14, %v1519_v13  ;;  %v4661_v31 = vld [vmem:[%s5589_s24 + $0x48] sm:$0xf]  ;;  %v1533_v35 = vor.u32 %v1532_v20, %v1528_v19  ;;  %v1075_v56 = vrot.slane %v933_v27, 5  ;;  %v4662_v37 = vld [vmem:[%s5589_s24 + $0x4c] sm:$0xf] }
  0xeb   : > { %v2843_v38 = vpop.permute.xlu1 %2842  ;;  %v6481_v63 = vpop.permute.xlu0 %1328  ;;  %3689 = vmatmul.mubr.bf16.gmra.mrb[28].mxu0 %v3219_v51  ;;  %1871 = vst.msk [vmem:[#allocation2 + $0x88] sm:$0xff] %vm336_vm6, %v4697_v11  ;;  %v4663_v40 = vld [vmem:[%s5589_s24 + $0x50] sm:$0x1]  ;;  %v1073_v45 = vsel %vm5698_vm5, %v4576_v23, %v1072_v17  ;;  %v1074_v46 = vrot.slane %v1072_v17, 4  ;;  %v1541_v47 = vshrl.u32 %v4661_v31, 16  ;;  %v1550_v48 = vshll.u32 %v4662_v37, 16 }
  0xec   : > { %2885 = vst.msk [vmem:[#allocation2 + $0xe0] sm:$0xff] %vm884_vm7, %v2843_v38  ;;  %2191 = vst.msk [vmem:[#allocation2 + $0x88] sm:$0xff] %vm884_vm7, %v6413_v32  ;;  %v1524_v42 = vrot.slane %v1523_v24, 4  ;;  %v1534_v32 = vrot.slane %v1533_v35, 4  ;;  %v1554_v49 = vshrl.u32 %v4662_v37, 16  ;;  %v1560_v51 = vshll.u32 %v4663_v40, 16 }
  0xed   : > { %1365 = vst.msk [vmem:[#allocation2 + $0x170] sm:$0xff] %vm884_vm7, %v6432_v29  ;;  %v3225_v44 = vld [vmem:[#allocation2 + $0x148] sm:$0xff]  ;;  %v3196_v41 = vld [vmem:[#allocation2 + $0x60] sm:$0xff]  ;;  %v1544_v29 = vshll.u32 %v4661_v31, 16  ;;  %v1076_v50 = vsel %vm5698_vm5, %v1074_v46, %v1075_v56  ;;  %v1543_v53 = vrot.slane %v1541_v47, 4  ;;  %v1552_v25 = vrot.slane %v1550_v48, 5 }
  0xee   : > { %3696 = vmatprep.mubr.bf16.mxu0 %v3225_v44  ;;  %v1529_v43 = vsel %vm5606_vm2, %v1524_v42, %v1528_v19  ;;  %v1539_v54 = vsel %vm5606_vm2, %v1534_v32, %v1538_v26  ;;  %v4592_v57 = vcombine.low %v1073_v45, %v1076_v50  ;;  %v934_v59 = vld [vmem:[%s5589_s24 + $0x84] sm:$0xe]  ;;  %v1556_v60 = vrot.slane %v1554_v49, 4  ;;  %v935_v61 = vld [vmem:[%s5589_s24 + $0x88] sm:$0xf]  ;;  %2344 = vst.msk [vmem:[#allocation2 + $0x158] sm:$0xff] %vm336_vm6, %v5502_v8 }
  0xef   : > { %v6490_v18 = vpop.permute.xlu1 %2150  ;;  %v1546_v58 = vrot.slane %v1544_v29, 5  ;;  %v4698_v38 = vcombine.low %v1529_v43, %v1539_v54  ;;  %v936_v62 = vld [vmem:[%s5589_s24 + $0x8c] sm:$0x1]  ;;  %v4577_v5 = vrot.slane %v934_v59, 9  ;;  %v1079_v0 = vrot.slane %v935_v61, 5  ;;  %v5503_v3 = vld [vmem:[%s5589_s24 + $0x84] sm:$0xff]  }
  0xf0   : > { %3810 = vmatmul.mubr.bf16.gmra.mrb[24].mxu1 %v3196_v41  ;;  %1186 = vst.msk [vmem:[#allocation2 + $0x198] sm:$0xff] %vm336_vm6, %v4592_v57  ;;  %v1082_v2 = vrot.slane %v936_v62, 5  ;;  %v4664_v21 = vld [vmem:[%s5589_s24 + $0x54] sm:$0xf]  ;;  %v1557_v4 = vor.u32 %v1556_v60, %v1552_v25  ;;  %v1562_v6 = vrot.slane %v1560_v51, 5  ;;  %v3207_v12 = vld [vmem:[#allocation2 + $0xb8] sm:$0xff] }
  0xf1   : > { %v857_v39 = vpop.permute.xlu0 %856  ;;  %3817 = vmatprep.mubr.bf16.mxu1 %v3202_v33  ;;  %v1547_v34 = vor.u32 %v1546_v58, %v1543_v53  ;;  %1872 = vst.msk [vmem:[#allocation2 + $0xb0] sm:$0xff] %vm336_vm6, %v4698_v38  ;;  %v4665_v9 = vld [vmem:[%s5589_s24 + $0x58] sm:$0xf]  ;;  %v1565_v1 = vshrl.u32 %v4664_v21, 16  ;;  %v1568_v10 = vshll.u32 %v4664_v21, 16  ;;  %v3229_v14 = vld [vmem:[#allocation2 + $0x168] sm:$0xff]  ;;  %v1080_v15 = vsel %vm5698_vm5, %v4577_v5, %v1079_v0 }
  0xf2   : > { %895 = vst.msk [vmem:[#allocation2 + $0x190] sm:$0xff] %vm884_vm7, %v857_v39  ;;  %1366 = vst.msk [vmem:[#allocation2 + $0x198] sm:$0xff] %vm884_vm7, %v6481_v63  ;;  %v1081_v19 = vrot.slane %v1079_v0, 4  ;;  %v4666_v20 = vld [vmem:[%s5589_s24 + $0x5c] sm:$0x1]  ;;  %v1574_v63 = vshll.u32 %v4665_v9, 16 }
  0xf3   : > { %3697 = vmatmul.mubr.bf16.gmra.mrb[32].mxu0 %v3224_v36  ;;  %2192 = vst.msk [vmem:[#allocation2 + $0xb0] sm:$0xff] %vm884_vm7, %v6449_v28  ;;  %v3201_v11 = vld [vmem:[#allocation2 + $0x88] sm:$0xff]  ;;  %v1548_v13 = vrot.slane %v1547_v34, 4  ;;  %v1558_v23 = vrot.slane %v1557_v4, 4  ;;  %v1567_v24 = vrot.slane %v1565_v1, 4  ;;  %v1570_v26 = vrot.slane %v1568_v10, 5 }
  0xf4   : > { %v3230_v7 = vld [vmem:[#allocation2 + $0x170] sm:$0xff]  ;;  %2345 = vst.msk [vmem:[#allocation2 + $0x180] sm:$0xff] %vm336_vm6, %v5503_v3  ;;  %v1578_v28 = vshrl.u32 %v4665_v9, 16  ;;  %v1083_v17 = vsel %vm5698_vm5, %v1081_v19, %v1082_v2  ;;  %v1576_v31 = vrot.slane %v1574_v63, 5  ;;  %v1584_v33 = vshll.u32 %v4666_v20, 16  ;;  %v5506_v59 = vld [vmem:[%s5589_s24 + $0xa8] sm:$0xff]  }
  0xf5   : > { %v2845_v52 = vpop.permute.xlu1 %2844  ;;  %v6516_v55 = vpop.permute.xlu0 %1330  ;;  %3704 = vmatprep.mubr.bf16.mxu0 %v3230_v7  ;;  %v1553_v27 = vsel %vm5606_vm2, %v1548_v13, %v1552_v25  ;;  %v1563_v44 = vsel %vm5606_vm2, %v1558_v23, %v1562_v6  ;;  %v4593_v36 = vcombine.low %v1080_v15, %v1083_v17  ;;  %v1571_v56 = vor.u32 %v1570_v26, %v1567_v24  ;;  %v4667_v41 = vld [vmem:[%s5589_s24 + $0x60] sm:$0xf]  ;;  %v5504_v42 = vld [vmem:[%s5589_s24 + $0x90] sm:$0xff]   ;;  %v4668_v47 = vld [vmem:[%s5589_s24 + $0x64] sm:$0xf] }
  0xf6   : > { %2886 = vst.msk [vmem:[#allocation2 + $0x108] sm:$0xff] %vm884_vm7, %v2845_v52  ;;  %v1580_v37 = vrot.slane %v1578_v28, 4  ;;  %v4699_v40 = vcombine.low %v1553_v27, %v1563_v44  ;;  %v1586_v39 = vrot.slane %v1584_v33, 5  ;;  %v4669_v32 = vld [vmem:[%s5589_s24 + $0x68] sm:$0x1]  ;;  %v1589_v29 = vshrl.u32 %v4667_v41, 16 }
  0xf7   : > { %1187 = vst.msk [vmem:[#allocation2 + $0x1c0] sm:$0xff] %vm336_vm6, %v4593_v36  ;;  %v1572_v45 = vrot.slane %v1571_v56, 4  ;;  %v1592_v43 = vshll.u32 %v4667_v41, 16  ;;  %v1598_v50 = vshll.u32 %v4668_v47, 16  ;;  %v1602_v53 = vshrl.u32 %v4668_v47, 16  ;;  %2346 = vst.msk [vmem:[#allocation2 + $0x1a8] sm:$0xff] %vm336_vm6, %v5504_v42 }
  0xf8   : > { %3818 = vmatmul.mubr.bf16.gmra.mrb[28].mxu1 %v3201_v11  ;;  %v1581_v46 = vor.u32 %v1580_v37, %v1576_v31  ;;  %1873 = vst.msk [vmem:[#allocation2 + $0xd8] sm:$0xff] %vm336_vm6, %v4699_v40  ;;  %v1608_v51 = vshll.u32 %v4669_v32, 16  ;;  %v5505_v52 = vld [vmem:[%s5589_s24 + $0x9c] sm:$0xff]   ;;  %v1591_v25 = vrot.slane %v1589_v29, 4  ;;  %v4670_v62 = vld [vmem:[%s5589_s24 + $0x6c] sm:$0xf] }
  0xf9   : > { %v6534_v22 = vpop.permute.xlu1 %2152  ;;  %3825 = vmatprep.mubr.bf16.mxu1 %v3207_v12  ;;  %1367 = vst.msk [vmem:[#allocation2 + $0x1c0] sm:$0xff] %vm884_vm7, %v6516_v55  ;;  %v3235_v49 = vld [vmem:[#allocation2 + $0x198] sm:$0xff]  ;;  %2193 = vst.msk [vmem:[#allocation2 + $0xd8] sm:$0xff] %vm884_vm7, %v6490_v18  ;;  %v1577_v57 = vsel %vm5606_vm2, %v1572_v45, %v1576_v31  ;;  %v3212_v55 = vld [vmem:[#allocation2 + $0xe0] sm:$0xff]  ;;  %v1594_v8 = vrot.slane %v1592_v43, 5  ;;  %v1600_v38 = vrot.slane %v1598_v50, 5 }
  0xfa   : > { %v3206_v54 = vld [vmem:[#allocation2 + $0xb0] sm:$0xff]  ;;  %v1582_v58 = vrot.slane %v1581_v46, 4  ;;  %v1604_v60 = vrot.slane %v1602_v53, 4  ;;  %v1610_v61 = vrot.slane %v1608_v51, 5  ;;  %2347 = vst.msk [vmem:[#allocation2 + $0x1d0] sm:$0xff] %vm336_vm6, %v5505_v52  ;;  %2348 = vst.msk [vmem:[#allocation2 + $0x1f8] sm:$0xff] %vm336_vm6, %v5506_v59 }
  0xfb   : > { %3705 = vmatmul.mubr.bf16.gmra.mrb[36].mxu0 %v3229_v14  ;;  %v4671_v34 = vld [vmem:[%s5589_s24 + $0x70] sm:$0xf]  ;;  %v4672_v5 = vld [vmem:[%s5589_s24 + $0x74] sm:$0x1]  ;;  %v1595_v21 = vor.u32 %v1594_v8, %v1591_v25  ;;  %v1613_v4 = vshrl.u32 %v4670_v62, 16  ;;  %v1616_v9 = vshll.u32 %v4670_v62, 16 }
  0xfc   : > { %v859_v35 = vpop.permute.xlu0 %858  ;;  %3712 = vmatprep.mubr.bf16.mxu0 %v3235_v49  ;;  %v1587_v18 = vsel %vm5606_vm2, %v1582_v58, %v1586_v39  ;;  %v3234_v2 = vld [vmem:[#allocation2 + $0x190] sm:$0xff]  ;;  %v1605_v3 = vor.u32 %v1604_v60, %v1600_v38  ;;  %v4902_v6 = vld [vmem:[%s5589_s24 + $0x18] sm:$0xe]  ;;  %v4903_v7 = vld [vmem:[%s5589_s24 + $0x1c] sm:$0xf]  ;;  %v1622_v1 = vshll.u32 %v4671_v34, 16 }
  0xfd   : > { %896 = vst.msk [vmem:[#allocation2 + $0x1b8] sm:$0xff] %vm884_vm7, %v859_v35  ;;  %v4700_v0 = vcombine.low %v1577_v57, %v1587_v18  ;;  %v1626_v10 = vshrl.u32 %v4671_v34, 16  ;;  %v1632_v11 = vshll.u32 %v4672_v5, 16  ;;  %v4904_v12 = vld [vmem:[%s5589_s24 + $0x20] sm:$0x1]  ;;  %v1596_v13 = vrot.slane %v1595_v21, 4 }
  0xfe   : > { %v1606_v14 = vrot.slane %v1605_v3, 4  ;;  %v1615_v15 = vrot.slane %v1613_v4, 4  ;;  %v4950_v19 = vrot.slane %v4902_v6, 9  ;;  %v4905_v20 = vld [vmem:[%s5589_s24 + $0x24] sm:$0xe]  ;;  %v1618_v24 = vrot.slane %v1616_v9, 5 }
  0xff   : > { %v2847_v48 = vpop.permute.xlu1 %2846  ;;  %1874 = vst.msk [vmem:[#allocation2 + $0x100] sm:$0xff] %vm336_vm6, %v4700_v0  ;;  %v1624_v26 = vrot.slane %v1622_v1, 5  ;;  %v1628_v28 = vrot.slane %v1626_v10, 4  ;;  %v1634_v27 = vrot.slane %v1632_v11, 5  ;;  %v5507_v17 = vld [vmem:[%s5589_s24 + $0xb4] sm:$0xff]   ;;  %v1601_v31 = vsel %vm5606_vm2, %v1596_v13, %v1600_v38  ;;  %v5508_v45 = vld [vmem:[%s5589_s24 + $0xc0] sm:$0xff]  }
 0x100   : > { %2887 = vst.msk [vmem:[#allocation2 + $0x130] sm:$0xff] %vm884_vm7, %v2847_v48  ;;  %3826 = vmatmul.mubr.bf16.gmra.mrb[32].mxu1 %v3206_v54  ;;  %2194 = vst.msk [vmem:[#allocation2 + $0x100] sm:$0xff] %vm884_vm7, %v6534_v22  ;;  %v3240_v63 = vld [vmem:[#allocation2 + $0x1c0] sm:$0xff]  ;;  %v1611_v33 = vsel %vm5606_vm2, %v1606_v14, %v1610_v61  ;;  %v2994_v22 = vrot.slane %v4903_v7, 5  ;;  %v2997_v35 = vrot.slane %v4904_v12, 5  ;;  %v3211_v36 = vld [vmem:[#allocation2 + $0xd8] sm:$0xff]  ;;  %v1619_v40 = vor.u32 %v1618_v24, %v1615_v15 }
 0x101   : > { %3833 = vmatprep.mubr.bf16.mxu1 %v3212_v55  ;;  %v4906_v44 = vld [vmem:[%s5589_s24 + $0x28] sm:$0xf]  ;;  %v4701_v56 = vcombine.low %v1601_v31, %v1611_v33  ;;  %v1629_v39 = vor.u32 %v1628_v28, %v1624_v26  ;;  %v4907_v41 = vld [vmem:[%s5589_s24 + $0x2c] sm:$0x1]  ;;  %v4951_v42 = vrot.slane %v4905_v20, 9  ;;  %2349 = vst.msk [vmem:[#allocation2 + $0x220] sm:$0xff] %vm336_vm6, %v5507_v17 }
 0x102   : > { %v3217_v46 = vld [vmem:[#allocation2 + $0x108] sm:$0xff]  ;;  %v2995_v32 = vsel %vm5698_vm5, %v4950_v19, %v2994_v22  ;;  %v2996_v29 = vrot.slane %v2994_v22, 4  ;;  %v3001_v48 = vrot.slane %v4906_v44, 5  ;;  %v3004_v49 = vrot.slane %v4907_v41, 5  ;;  %v4673_v51 = vld [vmem:[%s5589_s24 + $0x78] sm:$0xf] }
 0x103   : > { %3713 = vmatmul.mubr.bf16.gmra.mrb[40].mxu0 %v3234_v2  ;;  %v2155_v37 = vpop.permute.xlu1 %2154  ;;  %v5509_v43 = vld [vmem:[%s5589_s24 + $0xcc] sm:$0xff]   ;;  %1875 = vst.msk [vmem:[#allocation2 + $0x128] sm:$0xff] %vm336_vm6, %v4701_v56  ;;  %v1620_v50 = vrot.slane %v1619_v40, 4  ;;  %v1630_v53 = vrot.slane %v1629_v39, 4  ;;  %v4674_v52 = vld [vmem:[%s5589_s24 + $0x7c] sm:$0xf] }
 0x104   : > { %3720 = vmatprep.mubr.bf16.mxu0 %v3240_v63  ;;  %v3239_v47 = vld [vmem:[#allocation2 + $0x1b8] sm:$0xff]  ;;  %2350 = vst.msk [vmem:[#allocation2 + $0x248] sm:$0xff] %vm336_vm6, %v5508_v45  ;;  %v2998_v54 = vsel %vm5698_vm5, %v2996_v29, %v2997_v35  ;;  %v3002_v57 = vsel %vm5698_vm5, %v4951_v42, %v3001_v48  ;;  %v3003_v58 = vrot.slane %v3001_v48, 4  ;;  %v4675_v59 = vld [vmem:[%s5589_s24 + $0x80] sm:$0x1]  ;;  %v1637_v55 = vshrl.u32 %v4673_v51, 16 }
 0x105   : > { %2195 = vst.msk [vmem:[#allocation2 + $0x128] sm:$0xff] %vm884_vm7, %v2155_v37  ;;  %v4908_v8 = vld [vmem:[%s5589_s24 + $0x30] sm:$0xe]  ;;  %v1625_v38 = vsel %vm5606_vm2, %v1620_v50, %v1624_v26  ;;  %v1635_v60 = vsel %vm5606_vm2, %v1630_v53, %v1634_v27  ;;  %v4966_v61 = vcombine.low %v2995_v32, %v2998_v54  ;;  %v1640_v18 = vshll.u32 %v4673_v51, 16  ;;  %v4909_v62 = vld [vmem:[%s5589_s24 + $0x34] sm:$0xf] }
 0x106   : > { %v2849_v23 = vpop.permute.xlu0 %2848  ;;  %2351 = vst.msk [vmem:[#allocation2 + $0x270] sm:$0xff] %vm336_vm6, %v5509_v43  ;;  %v4910_v34 = vld [vmem:[%s5589_s24 + $0x38] sm:$0x1]  ;;  %v4702_v5 = vcombine.low %v1625_v38, %v1635_v60  ;;  %v3005_v2 = vsel %vm5698_vm5, %v3003_v58, %v3004_v49  ;;  %v1639_v21 = vrot.slane %v1637_v55, 4  ;;  %v1646_v3 = vshll.u32 %v4674_v52, 16 }
 0x107   : > { %2888 = vst.msk [vmem:[#allocation2 + $0x158] sm:$0xff] %vm884_vm7, %v2849_v23  ;;  %v2157_v0 = vpop.permute.xlu1 %2156  ;;  %v4911_v4 = vld [vmem:[%s5589_s24 + $0x3c] sm:$0xe]  ;;  %v4967_v6 = vcombine.low %v3002_v57, %v3005_v2  ;;  %v1642_v7 = vrot.slane %v1640_v18, 5  ;;  %v1650_v9 = vshrl.u32 %v4674_v52, 16  ;;  %v1656_v1 = vshll.u32 %v4675_v59, 16 }
 0x108   : > { %3834 = vmatmul.mubr.bf16.gmra.mrb[36].mxu1 %v3211_v36  ;;  %3168 = vst.msk [vmem:[#allocation2 + $0x20] sm:$0xff] %vm336_vm6, %v4966_v61  ;;  %v4912_v10 = vld [vmem:[%s5589_s24 + $0x40] sm:$0xf]  ;;  %1876 = vst.msk [vmem:[#allocation2 + $0x150] sm:$0xff] %vm336_vm6, %v4702_v5  ;;  %v1648_v11 = vrot.slane %v1646_v3, 5  ;;  %v4952_v12 = vrot.slane %v4908_v8, 9 }
 0x109   : > { %3841 = vmatprep.mubr.bf16.mxu1 %v3217_v46  ;;  %v3008_v13 = vrot.slane %v4909_v62, 5  ;;  %v3011_v14 = vrot.slane %v4910_v34, 5  ;;  %v4913_v15 = vld [vmem:[%s5589_s24 + $0x44] sm:$0x1]  ;;  %2196 = vst.msk [vmem:[#allocation2 + $0x150] sm:$0xff] %vm884_vm7, %v2157_v0  ;;  %v1643_v19 = vor.u32 %v1642_v7, %v1639_v21  ;;  %v1652_v20 = vrot.slane %v1650_v9, 4 }
 0x10a   : > { %3169 = vst.msk [vmem:[#allocation2 + $0x48] sm:$0xff] %vm336_vm6, %v4967_v6  ;;  %v4953_v63 = vrot.slane %v4911_v4, 9  ;;  %v3216_v23 = vld [vmem:[#allocation2 + $0x100] sm:$0xff]  ;;  %v3015_v28 = vrot.slane %v4912_v10, 5  ;;  %v3018_v27 = vrot.slane %v4913_v15, 5  ;;  %v1658_v33 = vrot.slane %v1656_v1, 5 }
 0x10b   : > { %v2851_v25 = vpop.permute.xlu0 %2850  ;;  %3721 = vmatmul.mubr.bf16.gmra.mrb[44].mxu0 %v3239_v47  ;;  %v3009_v24 = vsel %vm5698_vm5, %v4952_v12, %v3008_v13  ;;  %v3010_v26 = vrot.slane %v3008_v13, 4  ;;  %v1644_v17 = vrot.slane %v1643_v19, 4  ;;  %v1653_v31 = vor.u32 %v1652_v20, %v1648_v11  ;;  %v4676_v22 = vld [vmem:[%s5589_s24 + $0x84] sm:$0xf]  ;;  %v4677_v35 = vld [vmem:[%s5589_s24 + $0x88] sm:$0xf]  ;;  %v2159_v38 = vpop.permute.xlu1 %2158 }
 0x10c   : > { %2889 = vst.msk [vmem:[#allocation2 + $0x180] sm:$0xff] %vm884_vm7, %v2851_v25  ;;  %v3222_v44 = vld [vmem:[#allocation2 + $0x130] sm:$0xff]  ;;  %v3016_v56 = vsel %vm5698_vm5, %v4953_v63, %v3015_v28  ;;  %v3017_v37 = vrot.slane %v3015_v28, 4  ;;  %v4678_v40 = vld [vmem:[%s5589_s24 + $0x8c] sm:$0x1]  ;;  %v1661_v39 = vshrl.u32 %v4676_v22, 16 }
 0x10d   : > { %v3012_v36 = vsel %vm5698_vm5, %v3010_v26, %v3011_v14  ;;  %v1649_v41 = vsel %vm5606_vm2, %v1644_v17, %v1648_v11  ;;  %v1654_v42 = vrot.slane %v1653_v31, 4  ;;  %v1664_v46 = vshll.u32 %v4676_v22, 16  ;;  %v4914_v47 = vld [vmem:[%s5589_s24 + $0x48] sm:$0xe]  ;;  %v4915_v32 = vld [vmem:[%s5589_s24 + $0x4c] sm:$0xf] }
 0x10e   : > { %v4968_v45 = vcombine.low %v3009_v24, %v3012_v36  ;;  %v3019_v48 = vsel %vm5698_vm5, %v3017_v37, %v3018_v27  ;;  %v1663_v43 = vrot.slane %v1661_v39, 4  ;;  %v1670_v50 = vshll.u32 %v4677_v35, 16  ;;  %v4916_v51 = vld [vmem:[%s5589_s24 + $0x50] sm:$0x1]  ;;  %v4917_v25 = vld [vmem:[%s5589_s24 + $0x54] sm:$0xe] }
 0x10f   : > { %v3188_v29 = vld [vmem:[#allocation2 + $0x20] sm:$0xff]  ;;  %v1674_v53 = vshrl.u32 %v4677_v35, 16  ;;  %v1659_v52 = vsel %vm5606_vm2, %v1654_v42, %v1658_v33  ;;  %v4969_v54 = vcombine.low %v3016_v56, %v3019_v48  ;;  %v1666_v57 = vrot.slane %v1664_v46, 5  ;;  %v4918_v59 = vld [vmem:[%s5589_s24 + $0x58] sm:$0xf]  ;;  %v3221_v21 = vld [vmem:[#allocation2 + $0x128] sm:$0xff] }
 0x110   : > { %3842 = vmatmul.mubr.bf16.gmra.mrb[40].mxu1 %v3216_v23  ;;  %5352 = vmatprep.mubr.msk.bf16.mxu0 %vm336_vm6, %v3188_v29  ;;  %3170 = vst.msk [vmem:[#allocation2 + $0x70] sm:$0xff] %vm336_vm6, %v4968_v45  ;;  %v1680_v58 = vshll.u32 %v4678_v40, 16  ;;  %v4703_v8 = vcombine.low %v1649_v41, %v1659_v52  ;;  %v1672_v60 = vrot.slane %v1670_v50, 5  ;;  %v4954_v18 = vrot.slane %v4914_v47, 9  ;;  %v4919_v2 = vld [vmem:[%s5589_s24 + $0x5c] sm:$0x1] }
 0x111   : > { %3849 = vmatprep.mubr.bf16.mxu1 %v3222_v44  ;;  %v3193_v55 = vld [vmem:[#allocation2 + $0x48] sm:$0xff]  ;;  %v1676_v61 = vrot.slane %v1674_v53, 4  ;;  %3171 = vst.msk [vmem:[#allocation2 + $0x98] sm:$0xff] %vm336_vm6, %v4969_v54  ;;  %v1667_v62 = vor.u32 %v1666_v57, %v1663_v43  ;;  %v3022_v5 = vrot.slane %v4915_v32, 5  ;;  %v3025_v0 = vrot.slane %v4916_v51, 5  ;;  %v3227_v12 = vld [vmem:[#allocation2 + $0x158] sm:$0xff] }
 0x112   : > { %v1682_v34 = vrot.slane %v1680_v58, 5  ;;  %1877 = vst.msk [vmem:[#allocation2 + $0x178] sm:$0xff] %vm336_vm6, %v4703_v8  ;;  %v4955_v4 = vrot.slane %v4917_v25, 9  ;;  %v3029_v6 = vrot.slane %v4918_v59, 5  ;;  %v3032_v7 = vrot.slane %v4919_v2, 5  ;;  %v3226_v52 = vld [vmem:[#allocation2 + $0x150] sm:$0xff] }
 0x113   : > { %5353 = vmatmul.mubr.msk.bf16.vlgmr.msra.gmra.mrb[48].mxu0 %vm336_vm6, %v3193_v55  ;;  %v1677_v3 = vor.u32 %v1676_v61, %v1672_v60  ;;  %2197 = vst.msk [vmem:[#allocation2 + $0x178] sm:$0xff] %vm884_vm7, %v2159_v38  ;;  %v1668_v9 = vrot.slane %v1667_v62, 4  ;;  %v3023_v1 = vsel %vm5698_vm5, %v4954_v18, %v3022_v5  ;;  %v3024_v10 = vrot.slane %v3022_v5, 4  ;;  %v4679_v11 = vld [vmem:[%s5589_s24 + $0x90] sm:$0xf]  ;;  %v3232_v54 = vld [vmem:[#allocation2 + $0x180] sm:$0xff] }
 0x114   : > { %v3030_v14 = vsel %vm5698_vm5, %v4955_v4, %v3029_v6  ;;  %v3031_v15 = vrot.slane %v3029_v6, 4  ;;  %v4680_v19 = vld [vmem:[%s5589_s24 + $0x94] sm:$0xf]  ;;  %v4681_v23 = vld [vmem:[%s5589_s24 + $0x98] sm:$0x1]  ;;  %v1685_v24 = vshrl.u32 %v4679_v11, 16  ;;  %v2161_v56 = vpop.permute.xlu1 %2160 }
 0x115   : > { %v2853_v49 = vpop.permute.xlu0 %2852  ;;  %v1678_v13 = vrot.slane %v1677_v3, 4  ;;  %v1673_v20 = vsel %vm5606_vm2, %v1668_v9, %v1672_v60  ;;  %v3026_v63 = vsel %vm5698_vm5, %v3024_v10, %v3025_v0  ;;  %v1688_v26 = vshll.u32 %v4679_v11, 16  ;;  %v4920_v28 = vld [vmem:[%s5589_s24 + $0x60] sm:$0xe]  ;;  %v4921_v35 = vld [vmem:[%s5589_s24 + $0x64] sm:$0xf] }
 0x116   : > { %2890 = vst.msk [vmem:[#allocation2 + $0x1a8] sm:$0xff] %vm884_vm7, %v2853_v49  ;;  %v4970_v31 = vcombine.low %v3023_v1, %v3026_v63  ;;  %v3033_v33 = vsel %vm5698_vm5, %v3031_v15, %v3032_v7  ;;  %v1694_v22 = vshll.u32 %v4680_v19, 16  ;;  %v4922_v44 = vld [vmem:[%s5589_s24 + $0x68] sm:$0x1]  ;;  %v1687_v40 = vrot.slane %v1685_v24, 4 }
 0x117   : > { %v3198_v27 = vld [vmem:[#allocation2 + $0x70] sm:$0xff]  ;;  %v1683_v17 = vsel %vm5606_vm2, %v1678_v13, %v1682_v34  ;;  %v4971_v37 = vcombine.low %v3030_v14, %v3033_v33  ;;  %v1690_v39 = vrot.slane %v1688_v26, 5  ;;  %v4923_v41 = vld [vmem:[%s5589_s24 + $0x6c] sm:$0xe]  ;;  %v1698_v32 = vshrl.u32 %v4680_v19, 16 }
 0x118   : > { %3850 = vmatmul.mubr.bf16.gmra.mrb[44].mxu1 %v3221_v21  ;;  %5356 = vmatprep.mubr.msk.bf16.mxu0 %vm336_vm6, %v3198_v27  ;;  %v4704_v36 = vcombine.low %v1673_v20, %v1683_v17  ;;  %v4924_v42 = vld [vmem:[%s5589_s24 + $0x70] sm:$0xf]  ;;  %v3203_v45 = vld [vmem:[#allocation2 + $0x98] sm:$0xff]  ;;  %3172 = vst.msk [vmem:[#allocation2 + $0xc0] sm:$0xff] %vm336_vm6, %v4970_v31  ;;  %v1696_v47 = vrot.slane %v1694_v22, 5  ;;  %v1704_v29 = vshll.u32 %v4681_v23, 16 }
 0x119   : > { %3857 = vmatprep.mubr.bf16.mxu1 %v3227_v12  ;;  %v4956_v48 = vrot.slane %v4920_v28, 9  ;;  %3173 = vst.msk [vmem:[#allocation2 + $0xe8] sm:$0xff] %vm336_vm6, %v4971_v37  ;;  %v1691_v49 = vor.u32 %v1690_v39, %v1687_v40  ;;  %v3036_v43 = vrot.slane %v4921_v35, 5  ;;  %v3039_v50 = vrot.slane %v4922_v44, 5  ;;  %v4925_v53 = vld [vmem:[%s5589_s24 + $0x74] sm:$0x1] }
 0x11a   : > { %1878 = vst.msk [vmem:[#allocation2 + $0x1a0] sm:$0xff] %vm336_vm6, %v4704_v36  ;;  %v4957_v51 = vrot.slane %v4923_v41, 9  ;;  %v1700_v57 = vrot.slane %v1698_v32, 4  ;;  %v3043_v58 = vrot.slane %v4924_v42, 5  ;;  %v3046_v25 = vrot.slane %v4925_v53, 5  ;;  %v3231_v27 = vld [vmem:[#allocation2 + $0x178] sm:$0xff] }
 0x11b   : > { %5357 = vmatmul.mubr.msk.bf16.gmra.mrb[52].mxu0 %vm336_vm6, %v3203_v45  ;;  %2198 = vst.msk [vmem:[#allocation2 + $0x1a0] sm:$0xff] %vm884_vm7, %v2161_v56  ;;  %v1692_v59 = vrot.slane %v1691_v49, 4  ;;  %v3037_v55 = vsel %vm5698_vm5, %v4956_v48, %v3036_v43  ;;  %v3038_v8 = vrot.slane %v3036_v43, 4  ;;  %v1706_v60 = vrot.slane %v1704_v29, 5  ;;  %v4682_v62 = vld [vmem:[%s5589_s24 + $0x9c] sm:$0xf] }
 0x11c   : > { %v1701_v38 = vor.u32 %v1700_v57, %v1696_v47  ;;  %v3044_v61 = vsel %vm5698_vm5, %v4957_v51, %v3043_v58  ;;  %v3045_v18 = vrot.slane %v3043_v58, 4  ;;  %v4683_v34 = vld [vmem:[%s5589_s24 + $0xa0] sm:$0xf]  ;;  %v4684_v2 = vld [vmem:[%s5589_s24 + $0xa4] sm:$0x1]  ;;  %v1709_v21 = vshrl.u32 %v4682_v62, 16  ;;  %v2163_v31 = vpop.permute.xlu1 %2162 }
 0x11d   : > { %v1697_v5 = vsel %vm5606_vm2, %v1692_v59, %v1696_v47  ;;  %v3040_v0 = vsel %vm5698_vm5, %v3038_v8, %v3039_v50  ;;  %v1712_v3 = vshll.u32 %v4682_v62, 16  ;;  %v4926_v4 = vld [vmem:[%s5589_s24 + $0x78] sm:$0xe]  ;;  %v1718_v1 = vshll.u32 %v4683_v34, 16  ;;  %v4927_v10 = vld [vmem:[%s5589_s24 + $0x7c] sm:$0xf] }
 0x11e   : > { %v1702_v6 = vrot.slane %v1701_v38, 4  ;;  %v4972_v7 = vcombine.low %v3037_v55, %v3040_v0  ;;  %v3047_v9 = vsel %vm5698_vm5, %v3045_v18, %v3046_v25  ;;  %v4928_v11 = vld [vmem:[%s5589_s24 + $0x80] sm:$0x1]  ;;  %v1711_v14 = vrot.slane %v1709_v21, 4  ;;  %v4929_v20 = vld [vmem:[%s5589_s24 + $0x84] sm:$0xe] }
 0x11f   : > { %v3208_v12 = vld [vmem:[#allocation2 + $0xc0] sm:$0xff]  ;;  %v4973_v13 = vcombine.low %v3044_v61, %v3047_v9  ;;  %v1714_v15 = vrot.slane %v1712_v3, 5  ;;  %v1722_v19 = vshrl.u32 %v4683_v34, 16  ;;  %v1720_v24 = vrot.slane %v1718_v1, 5  ;;  %v4930_v44 = vld [vmem:[%s5589_s24 + $0x88] sm:$0xf] }
 0x120   : > { %3858 = vmatmul.mubr.bf16.gmra.mrb[48].mxu1 %v3226_v52  ;;  %5360 = vmatprep.mubr.msk.bf16.mxu0 %vm336_vm6, %v3208_v12  ;;  %v3213_v63 = vld [vmem:[#allocation2 + $0xe8] sm:$0xff]  ;;  %v1707_v23 = vsel %vm5606_vm2, %v1702_v6, %v1706_v60  ;;  %3174 = vst.msk [vmem:[#allocation2 + $0x110] sm:$0xff] %vm336_vm6, %v4972_v7  ;;  %v1728_v26 = vshll.u32 %v4684_v2, 16  ;;  %v4958_v28 = vrot.slane %v4926_v4, 9  ;;  %v3050_v35 = vrot.slane %v4927_v10, 5 }
 0x121   : > { %v2855_v46 = vpop.permute.xlu0 %2854  ;;  %3865 = vmatprep.mubr.bf16.mxu1 %v3232_v54  ;;  %v4705_v17 = vcombine.low %v1697_v5, %v1707_v23  ;;  %3175 = vst.msk [vmem:[#allocation2 + $0x138] sm:$0xff] %vm336_vm6, %v4973_v13  ;;  %v1715_v33 = vor.u32 %v1714_v15, %v1711_v14  ;;  %v1724_v22 = vrot.slane %v1722_v19, 4  ;;  %v3237_v36 = vld [vmem:[#allocation2 + $0x1a8] sm:$0xff]  ;;  %v3053_v37 = vrot.slane %v4928_v11, 5  ;;  %v4687_v54 = vld [vmem:[%s5589_s24 + $0xb0] sm:$0x1] }
 0x122   : > { %2891 = vst.msk [vmem:[#allocation2 + $0x1d0] sm:$0xff] %vm884_vm7, %v2855_v46  ;;  %v1730_v56 = vrot.slane %v1728_v26, 5  ;;  %v4931_v40 = vld [vmem:[%s5589_s24 + $0x8c] sm:$0x1]  ;;  %v4959_v39 = vrot.slane %v4929_v20, 9  ;;  %v3057_v41 = vrot.slane %v4930_v44, 5  ;;  %v3051_v47 = vsel %vm5698_vm5, %v4958_v28, %v3050_v35 }
 0x123   : > { %5361 = vmatmul.mubr.msk.bf16.gmra.mrb[56].mxu0 %vm336_vm6, %v3213_v63  ;;  %1879 = vst.msk [vmem:[#allocation2 + $0x1c8] sm:$0xff] %vm336_vm6, %v4705_v17  ;;  %v1716_v45 = vrot.slane %v1715_v33, 4  ;;  %v1725_v46 = vor.u32 %v1724_v22, %v1720_v24  ;;  %v3052_v32 = vrot.slane %v3050_v35, 4  ;;  %v3060_v49 = vrot.slane %v4931_v40, 5  ;;  %v4685_v43 = vld [vmem:[%s5589_s24 + $0xa8] sm:$0xf] }
 0x124   : > { %2199 = vst.msk [vmem:[#allocation2 + $0x1c8] sm:$0xff] %vm884_vm7, %v2163_v31  ;;  %v3058_v29 = vsel %vm5698_vm5, %v4959_v39, %v3057_v41  ;;  %v3059_v48 = vrot.slane %v3057_v41, 4  ;;  %v4686_v50 = vld [vmem:[%s5589_s24 + $0xac] sm:$0xf]  ;;  %v1733_v57 = vshrl.u32 %v4685_v43, 16  ;;  %v1736_v55 = vshll.u32 %v4685_v43, 16 }
 0x125   : > { %v1721_v53 = vsel %vm5606_vm2, %v1716_v45, %v1720_v24  ;;  %v1726_v51 = vrot.slane %v1725_v46, 4  ;;  %v3054_v52 = vsel %vm5698_vm5, %v3052_v32, %v3053_v37  ;;  %v4932_v58 = vld [vmem:[%s5589_s24 + $0x90] sm:$0xe]  ;;  %v1742_v8 = vshll.u32 %v4686_v50, 16  ;;  %v4933_v38 = vld [vmem:[%s5589_s24 + $0x94] sm:$0xf] }
 0x126   : > { %v4974_v25 = vcombine.low %v3051_v47, %v3054_v52  ;;  %v3061_v59 = vsel %vm5698_vm5, %v3059_v48, %v3060_v49  ;;  %v4934_v60 = vld [vmem:[%s5589_s24 + $0x98] sm:$0x1]  ;;  %v1735_v34 = vrot.slane %v1733_v57, 4  ;;  %v1746_v5 = vshrl.u32 %v4686_v50, 16  ;;  %v4935_v0 = vld [vmem:[%s5589_s24 + $0x9c] sm:$0xe] }
 0x127   : > { %v3218_v61 = vld [vmem:[#allocation2 + $0x110] sm:$0xff]  ;;  %v1731_v18 = vsel %vm5606_vm2, %v1726_v51, %v1730_v56  ;;  %v4975_v62 = vcombine.low %v3058_v29, %v3061_v59  ;;  %v1738_v4 = vrot.slane %v1736_v55, 5  ;;  %v1744_v6 = vrot.slane %v1742_v8, 5  ;;  %v4936_v9 = vld [vmem:[%s5589_s24 + $0xa0] sm:$0xf] }
 0x128   : > { %3866 = vmatmul.mubr.bf16.gmra.mrb[52].mxu1 %v3231_v27  ;;  %5364 = vmatprep.mubr.msk.bf16.mxu0 %vm336_vm6, %v3218_v61  ;;  %v3223_v2 = vld [vmem:[#allocation2 + $0x138] sm:$0xff]  ;;  %v4706_v21 = vcombine.low %v1721_v53, %v1731_v18  ;;  %v2165_v3 = vpop.permute.xlu1 %2164  ;;  %3176 = vst.msk [vmem:[#allocation2 + $0x160] sm:$0xff] %vm336_vm6, %v4974_v25  ;;  %v1752_v7 = vshll.u32 %v4687_v54, 16  ;;  %v1748_v1 = vrot.slane %v1746_v5, 4  ;;  %v4960_v10 = vrot.slane %v4932_v58, 9  ;;  %v3236_v63 = vld [vmem:[#allocation2 + $0x1a0] sm:$0xff] }
 0x129   : > { %3873 = vmatprep.mubr.bf16.mxu1 %v3237_v36  ;;  %3177 = vst.msk [vmem:[#allocation2 + $0x188] sm:$0xff] %vm336_vm6, %v4975_v62  ;;  %v3064_v11 = vrot.slane %v4933_v38, 5  ;;  %v3067_v12 = vrot.slane %v4934_v60, 5  ;;  %v4937_v13 = vld [vmem:[%s5589_s24 + $0xa4] sm:$0x1]  ;;  %v1739_v14 = vor.u32 %v1738_v4, %v1735_v34  ;;  %v4961_v19 = vrot.slane %v4935_v0, 9 }
 0x12a   : > { %1880 = vst.msk [vmem:[#allocation2 + $0x1f0] sm:$0xff] %vm336_vm6, %v4706_v21  ;;  %v1754_v15 = vrot.slane %v1752_v7, 5  ;;  %v3071_v20 = vrot.slane %v4936_v9, 5  ;;  %v3242_v23 = vld [vmem:[#allocation2 + $0x1d0] sm:$0xff]  ;;  %v1749_v26 = vor.u32 %v1748_v1, %v1744_v6  ;;  %v3074_v17 = vrot.slane %v4937_v13, 5 }
 0x12b   : > { %v2857_v42 = vpop.permute.xlu0 %2856  ;;  %5365 = vmatmul.mubr.msk.bf16.gmra.mrb[60].mxu0 %vm336_vm6, %v3223_v2  ;;  %2200 = vst.msk [vmem:[#allocation2 + $0x1f0] sm:$0xff] %vm884_vm7, %v2165_v3  ;;  %v3065_v28 = vsel %vm5698_vm5, %v4960_v10, %v3064_v11  ;;  %v3066_v27 = vrot.slane %v3064_v11, 4  ;;  %v1740_v31 = vrot.slane %v1739_v14, 4  ;;  %v4688_v35 = vld [vmem:[%s5589_s24 + $0xb4] sm:$0xf]  ;;  %v3241_v18 = vld [vmem:[#allocation2 + $0x1c8] sm:$0xff] }
 0x12c   : > { %2892 = vst.msk [vmem:[#allocation2 + $0x1f8] sm:$0xff] %vm884_vm7, %v2857_v42  ;;  %v3072_v33 = vsel %vm5698_vm5, %v4961_v19, %v3071_v20  ;;  %v3073_v22 = vrot.slane %v3071_v20, 4  ;;  %v4689_v44 = vld [vmem:[%s5589_s24 + $0xb8] sm:$0xf]  ;;  %v1750_v36 = vrot.slane %v1749_v26, 4  ;;  %v1757_v40 = vshrl.u32 %v4688_v35, 16 }
 0x12d   : > { %v3068_v56 = vsel %vm5698_vm5, %v3066_v27, %v3067_v12  ;;  %v4690_v37 = vld [vmem:[%s5589_s24 + $0xbc] sm:$0x1]  ;;  %v1760_v39 = vshll.u32 %v4688_v35, 16  ;;  %v1745_v41 = vsel %vm5606_vm2, %v1740_v31, %v1744_v6  ;;  %v1766_v46 = vshll.u32 %v4689_v44, 16  ;;  %v4938_v47 = vld [vmem:[%s5589_s24 + $0xa8] sm:$0xe] }
 0x12e   : > { %v4976_v42 = vcombine.low %v3065_v28, %v3068_v56  ;;  %v3075_v45 = vsel %vm5698_vm5, %v3073_v22, %v3074_v17  ;;  %v4939_v32 = vld [vmem:[%s5589_s24 + $0xac] sm:$0xf]  ;;  %v1755_v48 = vsel %vm5606_vm2, %v1750_v36, %v1754_v15  ;;  %v1759_v43 = vrot.slane %v1757_v40, 4  ;;  %v4940_v53 = vld [vmem:[%s5589_s24 + $0xb0] sm:$0x1] }
 0x12f   : > { %v3228_v29 = vld [vmem:[#allocation2 + $0x160] sm:$0xff]  ;;  %v4977_v49 = vcombine.low %v3072_v33, %v3075_v45  ;;  %v1762_v50 = vrot.slane %v1760_v39, 5  ;;  %v4707_v52 = vcombine.low %v1745_v41, %v1755_v48  ;;  %v1768_v57 = vrot.slane %v1766_v46, 5  ;;  %v4941_v59 = vld [vmem:[%s5589_s24 + $0xb4] sm:$0xe] }
 0x130   : > { %3874 = vmatmul.mubr.bf16.gmra.mrb[56].mxu1 %v3236_v63  ;;  %5368 = vmatprep.mubr.msk.bf16.mxu0 %vm336_vm6, %v3228_v29  ;;  %v3233_v51 = vld [vmem:[#allocation2 + $0x188] sm:$0xff]  ;;  %3178 = vst.msk [vmem:[#allocation2 + $0x1b0] sm:$0xff] %vm336_vm6, %v4976_v42  ;;  %v1770_v58 = vshrl.u32 %v4689_v44, 16  ;;  %v1776_v25 = vshll.u32 %v4690_v37, 16  ;;  %v4962_v8 = vrot.slane %v4938_v47, 9  ;;  %v3078_v38 = vrot.slane %v4939_v32, 5 }
 0x131   : > { %3881 = vmatprep.mubr.bf16.mxu1 %v3242_v23  ;;  %3179 = vst.msk [vmem:[#allocation2 + $0x1d8] sm:$0xff] %vm336_vm6, %v4977_v49  ;;  %v1763_v55 = vor.u32 %v1762_v50, %v1759_v43  ;;  %v3081_v60 = vrot.slane %v4940_v53, 5  ;;  %v4942_v61 = vld [vmem:[%s5589_s24 + $0xb8] sm:$0xf]  ;;  %1881 = vst.msk [vmem:[#allocation2 + $0x218] sm:$0xff] %vm336_vm6, %v4707_v52  ;;  %v4963_v5 = vrot.slane %v4941_v59, 9 }
 0x132   : > { %v2167_v54 = vpop.permute.xlu1 %2166  ;;  %v1772_v62 = vrot.slane %v1770_v58, 4  ;;  %v4943_v34 = vld [vmem:[%s5589_s24 + $0xbc] sm:$0x1]  ;;  %v3079_v21 = vsel %vm5698_vm5, %v4962_v8, %v3078_v38  ;;  %v3080_v3 = vrot.slane %v3078_v38, 4  ;;  %v3085_v4 = vrot.slane %v4942_v61, 5  ;;  %v3246_v43 = vld [vmem:[#allocation2 + $0x1f0] sm:$0xff] }
 0x133   : > { %5369 = vmatmul.mubr.msk.bf16.gmra.mrb[64].mxu0 %vm336_vm6, %v3233_v51  ;;  %2201 = vst.msk [vmem:[#allocation2 + $0x218] sm:$0xff] %vm884_vm7, %v2167_v54  ;;  %v3247_v0 = vld [vmem:[#allocation2 + $0x1f8] sm:$0xff]  ;;  %v1764_v2 = vrot.slane %v1763_v55, 4  ;;  %v1778_v7 = vrot.slane %v1776_v25, 5  ;;  %v3088_v9 = vrot.slane %v4943_v34, 5 }
 0x134   : > { %v2859_v24 = vpop.permute.xlu0 %2858  ;;  %v1773_v6 = vor.u32 %v1772_v62, %v1768_v57  ;;  %v4691_v1 = vld [vmem:[%s5589_s24 + $0xc0] sm:$0xf]  ;;  %v3082_v11 = vsel %vm5698_vm5, %v3080_v3, %v3081_v60  ;;  %v3086_v12 = vsel %vm5698_vm5, %v4963_v5, %v3085_v4  ;;  %v3087_v13 = vrot.slane %v3085_v4, 4  ;;  %v4692_v14 = vld [vmem:[%s5589_s24 + $0xc4] sm:$0xf] }
 0x135   : > { %2893 = vst.msk [vmem:[#allocation2 + $0x220] sm:$0xff] %vm884_vm7, %v2859_v24  ;;  %v1769_v10 = vsel %vm5606_vm2, %v1764_v2, %v1768_v57  ;;  %v4693_v15 = vld [vmem:[%s5589_s24 + $0xc8] sm:$0x1]  ;;  %v4978_v20 = vcombine.low %v3079_v21, %v3082_v11  ;;  %v1781_v63 = vshrl.u32 %v4691_v1, 16  ;;  %v1784_v23 = vshll.u32 %v4691_v1, 16 }
 0x136   : > { %v1774_v19 = vrot.slane %v1773_v6, 4  ;;  %v4944_v24 = vld [vmem:[%s5589_s24 + $0xc0] sm:$0xe]  ;;  %v3089_v27 = vsel %vm5698_vm5, %v3087_v13, %v3088_v9  ;;  %v1790_v17 = vshll.u32 %v4692_v14, 16  ;;  %v1794_v31 = vshrl.u32 %v4692_v14, 16 }
 0x137   : > { %v3238_v26 = vld [vmem:[#allocation2 + $0x1b0] sm:$0xff]  ;;  %v1800_v33 = vshll.u32 %v4693_v15, 16  ;;  %v4945_v22 = vld [vmem:[%s5589_s24 + $0xc4] sm:$0xf]  ;;  %3180 = vst.msk [vmem:[#allocation2 + $0x200] sm:$0xff] %vm336_vm6, %v4978_v20  ;;  %v4979_v36 = vcombine.low %v3086_v12, %v3089_v27  ;;  %v1783_v56 = vrot.slane %v1781_v63, 4 }
 0x138   : > { %3882 = vmatmul.mubr.bf16.gmra.mrb[60].mxu1 %v3241_v18  ;;  %5372 = vmatprep.mubr.msk.bf16.mxu0 %vm336_vm6, %v3238_v26  ;;  %v3243_v35 = vld [vmem:[#allocation2 + $0x1d8] sm:$0xff]  ;;  %v1779_v44 = vsel %vm5606_vm2, %v1774_v19, %v1778_v7  ;;  %v1786_v37 = vrot.slane %v1784_v23, 5  ;;  %v4946_v40 = vld [vmem:[%s5589_s24 + $0xc8] sm:$0x1]  ;;  %v1792_v42 = vrot.slane %v1790_v17, 5  ;;  %v1796_v45 = vrot.slane %v1794_v31, 4 }
 0x139   : > { %3889 = vmatprep.mubr.bf16.mxu1 %v3247_v0  ;;  %v4708_v39 = vcombine.low %v1769_v10, %v1779_v44  ;;  %v4947_v46 = vld [vmem:[%s5589_s24 + $0xcc] sm:$0xe]  ;;  %3181 = vst.msk [vmem:[#allocation2 + $0x228] sm:$0xff] %vm336_vm6, %v4979_v36  ;;  %v4964_v32 = vrot.slane %v4944_v24, 9  ;;  %v3092_v29 = vrot.slane %v4945_v22, 5  ;;  %v3095_v48 = vrot.slane %v4946_v40, 5 }
 0x13a   : > { %v1787_v47 = vor.u32 %v1786_v37, %v1783_v56  ;;  %v4948_v49 = vld [vmem:[%s5589_s24 + $0xd0] sm:$0xf]  ;;  %v1797_v50 = vor.u32 %v1796_v45, %v1792_v42  ;;  %v1802_v53 = vrot.slane %v1800_v33, 5  ;;  %v4949_v51 = vld [vmem:[%s5589_s24 + $0xd4] sm:$0x1]  ;;  %v4965_v52 = vrot.slane %v4947_v46, 9 }
 0x13b   : > { %5373 = vmatmul.mubr.msk.bf16.gmra.mrb[68].mxu0 %vm336_vm6, %v3243_v35  ;;  %v2169_v41 = vpop.permute.xlu1 %2168  ;;  %1882 = vst.msk [vmem:[#allocation2 + $0x240] sm:$0xff] %vm336_vm6, %v4708_v39  ;;  %v3099_v54 = vrot.slane %v4948_v49, 5  ;;  %v3093_v25 = vsel %vm5698_vm5, %v4964_v32, %v3092_v29  ;;  %v3094_v59 = vrot.slane %v3092_v29, 4  ;;  %v3102_v55 = vrot.slane %v4949_v51, 5  ;;  %v3251_v4 = vld [vmem:[#allocation2 + $0x218] sm:$0xff]  ;;  %s4532_s24 = sshll.u32 %s5524_s12, 5 }
 0x13c   : > { %2202 = vst.msk [vmem:[#allocation2 + $0x240] sm:$0xff] %vm884_vm7, %v2169_v41  ;;  %v3252_v57 = vld [vmem:[#allocation2 + $0x220] sm:$0xff]  ;;  %v1788_v58 = vrot.slane %v1787_v47, 4  ;;  %v1798_v8 = vrot.slane %v1797_v50, 4  ;;  %p192_p5 = scmp.lt.s32.totalorder %s4532_s24, 63 }
 0x13d   : > { %v2861_v28 = vpop.permute.xlu0 %2860  ;;  %v3100_v38 = vsel %vm5698_vm5, %v4965_v52, %v3099_v54  ;;  %v3101_v60 = vrot.slane %v3099_v54, 4  ;;  %v3096_v18 = vsel %vm5698_vm5, %v3094_v59, %v3095_v48 }
 0x13e   : > { %2894 = vst.msk [vmem:[#allocation2 + $0x248] sm:$0xff] %vm884_vm7, %v2861_v28  ;;  %v1793_v61 = vsel %vm5606_vm2, %v1788_v58, %v1792_v42  ;;  %v3248_v62 = vld [vmem:[#allocation2 + $0x200] sm:$0xff]  ;;  %v1803_v34 = vsel %vm5606_vm2, %v1798_v8, %v1802_v53  ;;  %v4980_v5 = vcombine.low %v3093_v25, %v3096_v18  ;;  %s7112_s24 = smov (!%p192_p5, %s4532_s24), 63 }
 0x13f   : > { %v3103_v0 = vsel %vm5698_vm5, %v3101_v60, %v3102_v55  ;;  %5376 = vmatprep.mubr.msk.bf16.mxu0 %vm336_vm6, %v3248_v62  ;;  %v4709_v2 = vcombine.low %v1793_v61, %v1803_v34  ;;  %s4533_s12 = sshll.u32 %s7112_s24, 2 }
 0x140   : > { %3890 = vmatmul.mubr.bf16.gmra.mrb[64].mxu1 %v3246_v43  ;;  %v4981_v21 = vcombine.low %v3100_v38, %v3103_v0  ;;  %v3253_v3 = vld [vmem:[#allocation2 + $0x228] sm:$0xff]  ;;  %3182 = vst.msk [vmem:[#allocation2 + $0x250] sm:$0xff] %vm336_vm6, %v4980_v5  ;;  %s6908_s9 = scalar_lea.vmem %s7101_s2, %s4533_s12 }
 0x141   : > { %3897 = vmatprep.mubr.bf16.mxu1 %v3252_v57  ;;  %1883 = vst.msk [vmem:[#allocation2 + $0x268] sm:$0xff] %vm336_vm6, %v4709_v2 }
 0x142   : > { %3183 = vst.msk [vmem:[#allocation2 + $0x278] sm:$0xff] %vm336_vm6, %v4981_v21 }
 0x143   : > { %5377 = vmatmul.mubr.msk.bf16.gmra.mrb[72].mxu0 %vm336_vm6, %v3253_v3  ;;  %v3256_v1 = vld [vmem:[#allocation2 + $0x240] sm:$0xff] }
 0x145   : > { %v3257_v30 = vld [vmem:[#allocation2 + $0x248] sm:$0xff] }
 0x147   : > { %v3258_v16 = vld [vmem:[#allocation2 + $0x250] sm:$0xff] }
 0x148   : > { %v2171_v6 = vpop.permute.xlu1 %2170  ;;  %3898 = vmatmul.mubr.bf16.gmra.mrb[68].mxu1 %v3251_v4  ;;  %5380 = vmatprep.mubr.msk.bf16.mxu0 %vm336_vm6, %v3258_v16 }
 0x149   : > { %v2863_v7 = vpop.permute.xlu0 %2862  ;;  %2203 = vst.msk [vmem:[#allocation2 + $0x268] sm:$0xff] %vm884_vm7, %v2171_v6  ;;  %3905 = vmatprep.mubr.bf16.mxu1 %v3257_v30  ;;  %v3263_v9 = vld [vmem:[#allocation2 + $0x278] sm:$0xff] }
 0x14a   : > { %2895 = vst.msk [vmem:[#allocation2 + $0x270] sm:$0xff] %vm884_vm7, %v2863_v7 }
 0x14b   : > { %5381 = vmatmul.mubr.msk.bf16.gmra.mrb[76].mxu0 %vm336_vm6, %v3263_v9 }
 0x150   : > { %3906 = vmatmul.mubr.bf16.gmra.mrb[72].mxu1 %v3256_v1  ;;  %v3261_v11 = vld [vmem:[#allocation2 + $0x268] sm:$0xff] }
 0x151   : > { %v3262_v10 = vld [vmem:[#allocation2 + $0x270] sm:$0xff] }
 0x152   : > { %3913 = vmatprep.mubr.bf16.mxu1 %v3262_v10 }
 0x158   : > { %3914 = vmatmul.mubr.bf16.gmra.mrb[76].mxu1 %v3261_v11 }
 0x17a   : > { %v5116_v12 = vpop.f32.mrb[0].mxu0 }
 0x17b   : > { %v5117_v13 = vpop.f32.mrb[1].mxu0 }
 0x17c   : > { %v5188_v14 = vpop.f32.mrb[0].mxu1  ;;  %v6803_v15 = vadd.f32 %v5117_v13, %v5116_v12  ;;  %v5119_v19 = vpop.f32.mrb[2].mxu0 }
 0x17d   : > { %v5189_v20 = vpop.f32.mrb[1].mxu1  ;;  %v5120_v63 = vpop.f32.mrb[3].mxu0 }
 0x17e   : > { %v6805_v23 = vadd.f32 %v5189_v20, %v5188_v14  ;;  %v5191_v24 = vpop.f32.mrb[2].mxu1  ;;  %v5121_v26 = vadd.f32 %v5120_v63, %v5119_v19 }
 0x17f   : > { %v5192_v28 = vpop.f32.mrb[3].mxu1 }
 0x180   : > { %v6807_v27 = vadd.f32 %v5192_v28, %v5191_v24 }
 0x183   : > { %v5122_v17 = vpop.f32.mrb[4].mxu0 }
 0x184   : > { %v5123_v31 = vpop.f32.mrb[5].mxu0  ;;  %v5194_v44 = vpop.f32.mrb[4].mxu1 }
 0x185   : > { %v6809_v33 = vadd.f32 %v5123_v31, %v5122_v17  ;;  %v5125_v22 = vpop.f32.mrb[6].mxu0  ;;  %v5195_v56 = vpop.f32.mrb[5].mxu1 }
 0x186   : > { %v5126_v35 = vpop.f32.mrb[7].mxu0  ;;  %v6813_v37 = vadd.f32 %v5195_v56, %v5194_v44  ;;  %v5197_v40 = vpop.f32.mrb[6].mxu1 }
 0x187   : > { %v6811_v36 = vadd.f32 %v5126_v35, %v5125_v22  ;;  %v5198_v39 = vpop.f32.mrb[7].mxu1 }
 0x188   : > { %v6815_v41 = vadd.f32 %v5198_v39, %v5197_v40 }
 0x18d   : > { %v5128_v42 = vpop.f32.mrb[8].mxu0  ;;  %v5200_v46 = vpop.f32.mrb[8].mxu1 }
 0x18e   : > { %v5129_v45 = vpop.f32.mrb[9].mxu0  ;;  %v5201_v29 = vpop.f32.mrb[9].mxu1 }
 0x18f   : > { %v6817_v47 = vadd.f32 %v5129_v45, %v5128_v42  ;;  %v5131_v32 = vpop.f32.mrb[10].mxu0  ;;  %v6819_v49 = vadd.f32 %v5201_v29, %v5200_v46  ;;  %v5203_v43 = vpop.f32.mrb[10].mxu1 }
 0x190   : > { %v5132_v48 = vpop.f32.mrb[11].mxu0  ;;  %v5204_v53 = vpop.f32.mrb[11].mxu1 }
 0x191   : > { %v6821_v50 = vadd.f32 %v5132_v48, %v5131_v32  ;;  %v6823_v51 = vadd.f32 %v5204_v53, %v5203_v43 }
 0x195   : > { %v5134_v52 = vpop.f32.mrb[12].mxu0 }
 0x196   : > { %v5135_v54 = vpop.f32.mrb[13].mxu0 }
 0x197   : > { %v6825_v57 = vadd.f32 %v5135_v54, %v5134_v52  ;;  %v5137_v58 = vpop.f32.mrb[14].mxu0  ;;  %v5206_v59 = vpop.f32.mrb[12].mxu1 }
 0x198   : > { %v5138_v25 = vpop.f32.mrb[15].mxu0  ;;  %v5207_v8 = vpop.f32.mrb[13].mxu1 }
 0x199   : > { %v6827_v55 = vadd.f32 %v5138_v25, %v5137_v58  ;;  %v6829_v38 = vadd.f32 %v5207_v8, %v5206_v59  ;;  %v5209_v60 = vpop.f32.mrb[14].mxu1 }
 0x19a   : > { %v5210_v61 = vpop.f32.mrb[15].mxu1 }
 0x19b   : > { %v6831_v18 = vadd.f32 %v5210_v61, %v5209_v60 }
 0x19f   : > { %v5140_v62 = vpop.f32.mrb[16].mxu0 }
 0x1a0   : > { %v5141_v34 = vpop.f32.mrb[17].mxu0 }
 0x1a1   : > { %v6833_v5 = vadd.f32 %v5141_v34, %v5140_v62  ;;  %v5143_v0 = vpop.f32.mrb[18].mxu0 }
 0x1a2   : > { %v5144_v2 = vpop.f32.mrb[19].mxu0 }
 0x1a3   : > { %v6835_v21 = vadd.f32 %v5144_v2, %v5143_v0 }
 0x1a9   : > { %v5146_v3 = vpop.f32.mrb[20].mxu0 }
 0x1aa   : > { %v5147_v4 = vpop.f32.mrb[21].mxu0 }
 0x1ab   : > { %v6837_v30 = vadd.f32 %v5147_v4, %v5146_v3  ;;  %v5149_v6 = vpop.f32.mrb[22].mxu0 }
 0x1ac   : > { %v5150_v7 = vpop.f32.mrb[23].mxu0 }
 0x1ad   : > { %v6839_v16 = vadd.f32 %v5150_v7, %v5149_v6 }
 0x1af   : > { %v5228_v9 = vpop.f32.mrb[16].mxu1 }
 0x1b0   : > { %v5229_v1 = vpop.f32.mrb[17].mxu1 }
 0x1b1   : > { %v5230_v10 = vadd.f32 %v5229_v1, %v5228_v9  ;;  %v5231_v11 = vpop.f32.mrb[18].mxu1 }
 0x1b2   : > { %v5232_v12 = vpop.f32.mrb[19].mxu1 }
 0x1b3   : > { %v5233_v13 = vadd.f32 %v5232_v12, %v5231_v11  ;;  %v6842_v14 = vadd.f32 %v5230_v10, %v6803_v15 }
 0x1b5   : > { %v6844_v19 = vadd.f32 %v5233_v13, %v5121_v26 }
 0x1b6   : > { %v5152_v20 = vpop.f32.mrb[24].mxu0 }
 0x1b7   : > { %v5153_v63 = vpop.f32.mrb[25].mxu0 }
 0x1b8   : > { %v6846_v24 = vadd.f32 %v5153_v63, %v5152_v20  ;;  %v5155_v28 = vpop.f32.mrb[26].mxu0 }
 0x1b9   : > { %v5156_v17 = vpop.f32.mrb[27].mxu0 }
 0x1ba   : > { %v6848_v31 = vadd.f32 %v5156_v17, %v5155_v28 }
 0x1bb   : > { %v5234_v22 = vpop.f32.mrb[20].mxu1 }
 0x1bc   : > { %v5235_v35 = vpop.f32.mrb[21].mxu1 }
 0x1bd   : > { %v5236_v56 = vadd.f32 %v5235_v35, %v5234_v22  ;;  %v5237_v40 = vpop.f32.mrb[22].mxu1 }
 0x1be   : > { %v5158_v44 = vpop.f32.mrb[28].mxu0  ;;  %v5238_v42 = vpop.f32.mrb[23].mxu1 }
 0x1bf   : > { %v5159_v39 = vpop.f32.mrb[29].mxu0  ;;  %v5239_v26 = vadd.f32 %v5238_v42, %v5237_v40  ;;  %v6853_v32 = vadd.f32 %v5236_v56, %v6809_v33 }
 0x1c0   : > { %v6850_v45 = vadd.f32 %v5159_v39, %v5158_v44  ;;  %v5161_v15 = vpop.f32.mrb[30].mxu0 }
 0x1c1   : > { %v5162_v46 = vpop.f32.mrb[31].mxu0  ;;  %v6858_v48 = vadd.f32 %v5239_v26, %v6811_v36 }
 0x1c2   : > { %v6855_v29 = vadd.f32 %v5162_v46, %v5161_v15 }
 0x1c3   : > { %v5240_v43 = vpop.f32.mrb[24].mxu1 }
 0x1c4   : > { %v5241_v53 = vpop.f32.mrb[25].mxu1 }
 0x1c5   : > { %v5242_v54 = vadd.f32 %v5241_v53, %v5240_v43  ;;  %v5243_v58 = vpop.f32.mrb[26].mxu1 }
 0x1c6   : > { %v5164_v52 = vpop.f32.mrb[32].mxu0  ;;  %v5244_v59 = vpop.f32.mrb[27].mxu1 }
 0x1c7   : > { %v5165_v25 = vpop.f32.mrb[33].mxu0  ;;  %v5245_v61 = vadd.f32 %v5244_v59, %v5243_v58  ;;  %v6863_v33 = vadd.f32 %v5242_v54, %v6817_v47 }
 0x1c8   : > { %v6860_v8 = vadd.f32 %v5165_v25, %v5164_v52  ;;  %v5167_v60 = vpop.f32.mrb[34].mxu0 }
 0x1c9   : > { %v5168_v62 = vpop.f32.mrb[35].mxu0  ;;  %v6868_v36 = vadd.f32 %v5245_v61, %v6821_v50 }
 0x1ca   : > { %v6865_v34 = vadd.f32 %v5168_v62, %v5167_v60 }
 0x1cb   : > { %v5246_v0 = vpop.f32.mrb[28].mxu1 }
 0x1cc   : > { %v5247_v2 = vpop.f32.mrb[29].mxu1 }
 0x1cd   : > { %v5248_v4 = vadd.f32 %v5247_v2, %v5246_v0  ;;  %v5249_v6 = vpop.f32.mrb[30].mxu1 }
 0x1ce   : > { %v5170_v3 = vpop.f32.mrb[36].mxu0  ;;  %v5250_v9 = vpop.f32.mrb[31].mxu1 }
 0x1cf   : > { %v5171_v7 = vpop.f32.mrb[37].mxu0  ;;  %v5251_v11 = vadd.f32 %v5250_v9, %v5249_v6  ;;  %v6873_v47 = vadd.f32 %v5248_v4, %v6825_v57 }
 0x1d0   : > { %v6870_v1 = vadd.f32 %v5171_v7, %v5170_v3  ;;  %v5173_v10 = vpop.f32.mrb[38].mxu0 }
 0x1d1   : > { %v5174_v12 = vpop.f32.mrb[39].mxu0  ;;  %v6878_v50 = vadd.f32 %v5251_v11, %v6827_v55 }
 0x1d2   : > { %v6875_v13 = vadd.f32 %v5174_v12, %v5173_v10 }
 0x1d3   : > { %v5252_v20 = vpop.f32.mrb[32].mxu1 }
 0x1d4   : > { %v5253_v63 = vpop.f32.mrb[33].mxu1 }
 0x1d5   : > { %v5254_v17 = vadd.f32 %v5253_v63, %v5252_v20  ;;  %v5255_v22 = vpop.f32.mrb[34].mxu1 }
 0x1d6   : > { %v5176_v28 = vpop.f32.mrb[40].mxu0  ;;  %v5256_v44 = vpop.f32.mrb[35].mxu1 }
 0x1d7   : > { %v5177_v35 = vpop.f32.mrb[41].mxu0  ;;  %v5257_v39 = vadd.f32 %v5256_v44, %v5255_v22  ;;  %v6883_v57 = vadd.f32 %v5254_v17, %v6833_v5 }
 0x1d8   : > { %v6880_v56 = vadd.f32 %v5177_v35, %v5176_v28  ;;  %v5179_v40 = vpop.f32.mrb[42].mxu0 }
 0x1d9   : > { %v5180_v42 = vpop.f32.mrb[43].mxu0  ;;  %v6888_v55 = vadd.f32 %v5257_v39, %v6835_v21 }
 0x1da   : > { %v6885_v15 = vadd.f32 %v5180_v42, %v5179_v40 }
 0x1db   : > { %v5258_v26 = vpop.f32.mrb[36].mxu1 }
 0x1dc   : > { %v5259_v46 = vpop.f32.mrb[37].mxu1 }
 0x1dd   : > { %v5260_v53 = vadd.f32 %v5259_v46, %v5258_v26  ;;  %v5261_v52 = vpop.f32.mrb[38].mxu1 }
 0x1de   : > { %v5182_v43 = vpop.f32.mrb[44].mxu0  ;;  %v5262_v58 = vpop.f32.mrb[39].mxu1 }
 0x1df   : > { %v5183_v54 = vpop.f32.mrb[45].mxu0  ;;  %v5263_v60 = vadd.f32 %v5262_v58, %v5261_v52  ;;  %v6894_v61 = vadd.f32 %v5260_v53, %v6837_v30 }
 0x1e0   : > { %v6891_v25 = vadd.f32 %v5183_v54, %v5182_v43  ;;  %v5185_v59 = vpop.f32.mrb[46].mxu0 }
 0x1e1   : > { %v5186_v5 = vpop.f32.mrb[47].mxu0  ;;  %v6899_v21 = vadd.f32 %v5263_v60, %v6839_v16 }
 0x1e2   : > { %v6896_v62 = vadd.f32 %v5186_v5, %v5185_v59 }
 0x1e3   : > { %v5264_v0 = vpop.f32.mrb[40].mxu1 }
 0x1e4   : > { %v5265_v2 = vpop.f32.mrb[41].mxu1 }
 0x1e5   : > { %v5266_v3 = vadd.f32 %v5265_v2, %v5264_v0  ;;  %v5267_v4 = vpop.f32.mrb[42].mxu1 }
 0x1e6   : > { %v5268_v6 = vpop.f32.mrb[43].mxu1  ;;  %v5354_v7 = vpop.f32.mrb[48].mxu0 }
 0x1e7   : > { %v5269_v9 = vadd.f32 %v5268_v6, %v5267_v4  ;;  %v3965_v10 = vadd.f32 %v5354_v7, %v6853_v32  ;;  %v3956_v11 = vpop.f32.mrb[49].mxu0  ;;  %v6903_v30 = vadd.f32 %v5266_v3, %v6846_v24 }
 0x1e8   : > { %v3957_v16 = vadd.f32 %v3956_v11, %v6842_v14  ;;  %v5355_v12 = vpop.f32.mrb[50].mxu0 }
 0x1e9   : > { %v5070_v20 = vpack.c.bf16 %v3965_v10, %v3965_v10  ;;  %v3968_v63 = vadd.f32 %v5355_v12, %v6858_v48  ;;  %v3959_v28 = vpop.f32.mrb[51].mxu0  ;;  %v4315_v35 = vmul.f32 %v3965_v10, %v3965_v10  ;;  %v6922_v53 = vadd.f32 %v5269_v9, %v6848_v31 }
 0x1ea   : > { %v5068_v32 = vpack.c.bf16 %v3957_v16, %v3957_v16  ;;  %v4313_v17 = vmul.f32 %v3957_v16, %v3957_v16  ;;  %v3960_v24 = vadd.f32 %v3959_v28, %v6844_v19  ;;  %v4244_v14 = vsel %vm336_vm6, %v3957_v16, 0.0 }
 0x1eb   : > { %v5270_v22 = vpop.f32.mrb[44].mxu1  ;;  %4214 = vst.msk [vmem:[%s6908_s9 + $0x8] sm:$0xf] %vm4211_vm8, %v5070_v20  ;;  %v5071_v44 = vpack.c.bf16 %v3968_v63, %v3968_v63  ;;  %v4316_v19 = vmul.f32 %v3968_v63, %v3968_v63  ;;  %v4247_v54 = vsel %vm336_vm6, %v3965_v10, 0.0  ;;  %v4348_v31 = vsel %vm336_vm6, %v4315_v35, 0.0 }
 0x1ec   : > { %v5271_v40 = vpop.f32.mrb[45].mxu1  ;;  %4212 = vst.msk [vmem:[%s6908_s9] sm:$0xf] %vm4211_vm8, %v5068_v32  ;;  %v5069_v39 = vpack.c.bf16 %v3960_v24, %v3960_v24  ;;  %v4245_v48 = vsel %vm336_vm6, %v3960_v24, 0.0  ;;  %v4314_v42 = vmul.f32 %v3960_v24, %v3960_v24  ;;  %v4345_v58 = vsel %vm336_vm6, %v4313_v17, 0.0 }
 0x1ed   : > { %v5272_v26 = vadd.f32 %v5271_v40, %v5270_v22  ;;  %v5273_v46 = vpop.f32.mrb[46].mxu1  ;;  %4215 = vst.msk [vmem:[%s6908_s9 + $0xc] sm:$0xf] %vm4211_vm8, %v5071_v44  ;;  %v4246_v43 = vadd.f32 %v4245_v48, %v4244_v14  ;;  %v4249_v10 = vsel %vm336_vm6, %v3968_v63, 0.0  ;;  %v4350_v11 = vsel %vm336_vm6, %v4316_v19, 0.0 }
 0x1ee   : > { %v5274_v52 = vpop.f32.mrb[47].mxu1  ;;  %4213 = vst.msk [vmem:[%s6908_s9 + $0x4] sm:$0xf] %vm4211_vm8, %v5069_v39  ;;  %v4346_v59 = vsel %vm336_vm6, %v4314_v42, 0.0  ;;  %v5358_v60 = vpop.f32.mrb[52].mxu0 }
 0x1ef   : > { %v5275_v5 = vadd.f32 %v5274_v52, %v5273_v46  ;;  %v4248_v0 = vadd.f32 %v4247_v54, %v4246_v43  ;;  %v4347_v2 = vadd.f32 %v4346_v59, %v4345_v58  ;;  %v3981_v3 = vadd.f32 %v5358_v60, %v6873_v47  ;;  %v3972_v4 = vpop.f32.mrb[53].mxu0 }
 0x1f0   : > { %v3973_v6 = vadd.f32 %v3972_v4, %v6863_v33  ;;  %v5359_v7 = vpop.f32.mrb[54].mxu0  ;;  %v6933_v9 = vadd.f32 %v5272_v26, %v6850_v45 }
 0x1f1   : > { %v4349_v16 = vadd.f32 %v4348_v31, %v4347_v2  ;;  %v5074_v12 = vpack.c.bf16 %v3981_v3, %v3981_v3  ;;  %v3975_v20 = vpop.f32.mrb[55].mxu0  ;;  %v4250_v47 = vadd.f32 %v4249_v10, %v4248_v0  ;;  %v3984_v45 = vadd.f32 %v5359_v7, %v6878_v50 }
 0x1f2   : > { %v5072_v28 = vpack.c.bf16 %v3973_v6, %v3973_v6  ;;  %v4251_v32 = vsel %vm336_vm6, %v3973_v6, 0.0  ;;  %v4317_v17 = vmul.f32 %v3973_v6, %v3973_v6  ;;  %v3976_v22 = vadd.f32 %v3975_v20, %v6868_v36 }
 0x1f3   : > { %v5276_v24 = vpop.f32.mrb[48].mxu1  ;;  %4218 = vst.msk [vmem:[%s6908_s9 + $0x18] sm:$0xf] %vm4211_vm8, %v5074_v12  ;;  %v4351_v33 = vadd.f32 %v4350_v11, %v4349_v16  ;;  %v4252_v63 = vadd.f32 %v4251_v32, %v4250_v47  ;;  %v6946_v40 = vadd.f32 %v5275_v5, %v6855_v29  ;;  %v4319_v48 = vmul.f32 %v3981_v3, %v3981_v3 }
 0x1f4   : > { %v5277_v35 = vpop.f32.mrb[49].mxu1  ;;  %4216 = vst.msk [vmem:[%s6908_s9 + $0x10] sm:$0xf] %vm4211_vm8, %v5072_v28  ;;  %v4352_v44 = vsel %vm336_vm6, %v4317_v17, 0.0  ;;  %v5075_v26 = vpack.c.bf16 %v3984_v45, %v3984_v45  ;;  %v5073_v50 = vpack.c.bf16 %v3976_v22, %v3976_v22  ;;  %v4253_v36 = vsel %vm336_vm6, %v3976_v22, 0.0 }
 0x1f5   : > { %v5278_v14 = vadd.f32 %v5277_v35, %v5276_v24  ;;  %v5279_v39 = vpop.f32.mrb[50].mxu1  ;;  %v4353_v42 = vadd.f32 %v4352_v44, %v4351_v33  ;;  %v4318_v19 = vmul.f32 %v3976_v22, %v3976_v22  ;;  %v4254_v54 = vadd.f32 %v4253_v36, %v4252_v63 }
 0x1f6   : > { %v5280_v46 = vpop.f32.mrb[51].mxu1  ;;  %v5362_v43 = vpop.f32.mrb[56].mxu0  ;;  %4219 = vst.msk [vmem:[%s6908_s9 + $0x1c] sm:$0xf] %vm4211_vm8, %v5075_v26  ;;  %v4255_v60 = vsel %vm336_vm6, %v3981_v3, 0.0  ;;  %v4320_v5 = vmul.f32 %v3984_v45, %v3984_v45  ;;  %v4356_v31 = vsel %vm336_vm6, %v4319_v48, 0.0 }
 0x1f7   : > { %v5281_v52 = vadd.f32 %v5280_v46, %v5279_v39  ;;  %v3997_v58 = vadd.f32 %v5362_v43, %v6894_v61  ;;  %v3988_v29 = vpop.f32.mrb[57].mxu0  ;;  %v6953_v59 = vadd.f32 %v5278_v14, %v6860_v8  ;;  %4217 = vst.msk [vmem:[%s6908_s9 + $0x14] sm:$0xf] %vm4211_vm8, %v5073_v50  ;;  %v4354_v0 = vsel %vm336_vm6, %v4318_v19, 0.0 }
 0x1f8   : > { %v3989_v2 = vadd.f32 %v3988_v29, %v6883_v57  ;;  %v5363_v4 = vpop.f32.mrb[58].mxu0  ;;  %v4256_v6 = vadd.f32 %v4255_v60, %v4254_v54  ;;  %v4355_v61 = vadd.f32 %v4354_v0, %v4353_v42  ;;  %v4257_v8 = vsel %vm336_vm6, %v3984_v45, 0.0 }
 0x1f9   : > { %v5078_v7 = vpack.c.bf16 %v3997_v58, %v3997_v58  ;;  %v3991_v10 = vpop.f32.mrb[59].mxu0  ;;  %v4000_v57 = vadd.f32 %v5363_v4, %v6899_v21  ;;  %v4358_v32 = vsel %vm336_vm6, %v4320_v5, 0.0  ;;  %v6972_v33 = vadd.f32 %v5281_v52, %v6865_v34 }
 0x1fa   : > { %v5076_v11 = vpack.c.bf16 %v3989_v2, %v3989_v2  ;;  %v4259_v3 = vsel %vm336_vm6, %v3989_v2, 0.0  ;;  %v4321_v16 = vmul.f32 %v3989_v2, %v3989_v2  ;;  %v4357_v12 = vadd.f32 %v4356_v31, %v4355_v61 }
 0x1fb   : > { %v5282_v20 = vpop.f32.mrb[52].mxu1  ;;  %4222 = vst.msk [vmem:[%s6908_s9 + $0x28] sm:$0xf] %vm4211_vm8, %v5078_v7  ;;  %v4258_v28 = vadd.f32 %v4257_v8, %v4256_v6  ;;  %v3992_v47 = vadd.f32 %v3991_v10, %v6888_v55  ;;  %v5079_v44 = vpack.c.bf16 %v4000_v57, %v4000_v57  ;;  %v4263_v55 = vsel %vm336_vm6, %v3997_v58, 0.0 }
 0x1fc   : > { %v5283_v17 = vpop.f32.mrb[53].mxu1  ;;  %4220 = vst.msk [vmem:[%s6908_s9 + $0x20] sm:$0xf] %vm4211_vm8, %v5076_v11  ;;  %v4360_v24 = vsel %vm336_vm6, %v4321_v16, 0.0  ;;  %v4359_v63 = vadd.f32 %v4358_v32, %v4357_v12  ;;  %v4323_v14 = vmul.f32 %v3997_v58, %v3997_v58  ;;  %v4324_v19 = vmul.f32 %v4000_v57, %v4000_v57 }
 0x1fd   : > { %v5284_v45 = vadd.f32 %v5283_v17, %v5282_v20  ;;  %v5285_v22 = vpop.f32.mrb[54].mxu1  ;;  %v4260_v35 = vadd.f32 %v4259_v3, %v4258_v28  ;;  %v5077_v39 = vpack.c.bf16 %v3992_v47, %v3992_v47  ;;  %v4261_v48 = vsel %vm336_vm6, %v3992_v47, 0.0  ;;  %4223 = vst.msk [vmem:[%s6908_s9 + $0x2c] sm:$0xf] %vm4211_vm8, %v5079_v44 }
 0x1fe   : > { %v5286_v21 = vpop.f32.mrb[55].mxu1  ;;  %v5366_v42 = vpop.f32.mrb[60].mxu0  ;;  %v4361_v46 = vadd.f32 %v4360_v24, %v4359_v63  ;;  %v4322_v50 = vmul.f32 %v3992_v47, %v3992_v47  ;;  %v4364_v4 = vsel %vm336_vm6, %v4323_v14, 0.0  ;;  %v4265_v31 = vsel %vm336_vm6, %v4000_v57, 0.0 }
 0x1ff   : > { %v5287_v26 = vadd.f32 %v5286_v21, %v5285_v22  ;;  %v4262_v34 = vadd.f32 %v4261_v48, %v4260_v35  ;;  %v4004_v36 = vpop.f32.mrb[61].mxu0  ;;  %4221 = vst.msk [vmem:[%s6908_s9 + $0x24] sm:$0xf] %vm4211_vm8, %v5077_v39  ;;  %v4013_v43 = vadd.f32 %v5366_v42, %v6933_v9  ;;  %v3868_v58 = vadd.f32 %v5284_v45, %v6870_v1 }
 0x200   : > { %v4005_v52 = vadd.f32 %v4004_v36, %v6903_v30  ;;  %v5367_v54 = vpop.f32.mrb[62].mxu0  ;;  %v4362_v60 = vsel %vm336_vm6, %v4322_v50, 0.0  ;;  %v4366_v8 = vsel %vm336_vm6, %v4324_v19, 0.0 }
 0x201   : > { %v4264_v29 = vadd.f32 %v4263_v55, %v4262_v34  ;;  %v4016_v5 = vadd.f32 %v5367_v54, %v6946_v40  ;;  %v4007_v0 = vpop.f32.mrb[63].mxu0  ;;  %v3871_v2 = vadd.f32 %v5287_v26, %v6875_v13  ;;  %v4363_v9 = vadd.f32 %v4362_v60, %v4361_v46 }
 0x202   : > { %v5082_v6 = vpack.c.bf16 %v4013_v43, %v4013_v43  ;;  %v5080_v61 = vpack.c.bf16 %v4005_v52, %v4005_v52  ;;  %v4267_v1 = vsel %vm336_vm6, %v4005_v52, 0.0  ;;  %v4325_v10 = vmul.f32 %v4005_v52, %v4005_v52 }
 0x203   : > { %v5288_v30 = vpop.f32.mrb[56].mxu1  ;;  %v4266_v7 = vadd.f32 %v4265_v31, %v4264_v29  ;;  %v4365_v40 = vadd.f32 %v4364_v4, %v4363_v9  ;;  %v5083_v13 = vpack.c.bf16 %v4016_v5, %v4016_v5  ;;  %v4327_v12 = vmul.f32 %v4013_v43, %v4013_v43 }
 0x204   : > { %v5289_v11 = vpop.f32.mrb[57].mxu1  ;;  %4226 = vst.msk [vmem:[%s6908_s9 + $0x38] sm:$0xf] %vm4211_vm8, %v5082_v6  ;;  %4224 = vst.msk [vmem:[%s6908_s9 + $0x30] sm:$0xf] %vm4211_vm8, %v5080_v61  ;;  %v4368_v28 = vsel %vm336_vm6, %v4325_v10, 0.0  ;;  %v4008_v32 = vadd.f32 %v4007_v0, %v6922_v53  ;;  %v4328_v42 = vmul.f32 %v4016_v5, %v4016_v5 }
 0x205   : > { %v5290_v3 = vadd.f32 %v5289_v11, %v5288_v30  ;;  %v5291_v16 = vpop.f32.mrb[58].mxu1  ;;  %v4268_v20 = vadd.f32 %v4267_v1, %v4266_v7  ;;  %v4367_v47 = vadd.f32 %v4366_v8, %v4365_v40  ;;  %4227 = vst.msk [vmem:[%s6908_s9 + $0x3c] sm:$0xf] %vm4211_vm8, %v5083_v13  ;;  %v4271_v45 = vsel %vm336_vm6, %v4013_v43, 0.0 }
 0x206   : > { %v5292_v57 = vpop.f32.mrb[59].mxu1  ;;  %v5370_v17 = vpop.f32.mrb[64].mxu0  ;;  %v5081_v21 = vpack.c.bf16 %v4008_v32, %v4008_v32  ;;  %v4269_v55 = vsel %vm336_vm6, %v4008_v32, 0.0  ;;  %v4326_v14 = vmul.f32 %v4008_v32, %v4008_v32  ;;  %v4372_v48 = vsel %vm336_vm6, %v4327_v12, 0.0 }
 0x207   : > { %v5293_v24 = vadd.f32 %v5292_v57, %v5291_v16  ;;  %v4029_v22 = vadd.f32 %v5370_v17, %v3868_v58  ;;  %v4020_v35 = vpop.f32.mrb[65].mxu0  ;;  %v3876_v63 = vadd.f32 %v5290_v3, %v6880_v56  ;;  %v4369_v44 = vadd.f32 %v4368_v28, %v4367_v47 }
 0x208   : > { %v5371_v39 = vpop.f32.mrb[66].mxu0  ;;  %v4270_v53 = vadd.f32 %v4269_v55, %v4268_v20  ;;  %4225 = vst.msk [vmem:[%s6908_s9 + $0x34] sm:$0xf] %vm4211_vm8, %v5081_v21  ;;  %v4370_v34 = vsel %vm336_vm6, %v4326_v14, 0.0  ;;  %v4021_v50 = vadd.f32 %v4020_v35, %v6953_v59  ;;  %v4273_v19 = vsel %vm336_vm6, %v4016_v5, 0.0 }
 0x209   : > { %v5086_v26 = vpack.c.bf16 %v4029_v22, %v4029_v22  ;;  %v4023_v46 = vpop.f32.mrb[67].mxu0  ;;  %v4032_v56 = vadd.f32 %v5371_v39, %v3871_v2  ;;  %v4371_v52 = vadd.f32 %v4370_v34, %v4369_v44  ;;  %v3879_v58 = vadd.f32 %v5293_v24, %v6885_v15 }
 0x20a   : > { %v4024_v36 = vadd.f32 %v4023_v46, %v6972_v33  ;;  %v4272_v43 = vadd.f32 %v4271_v45, %v4270_v53  ;;  %v5084_v60 = vpack.c.bf16 %v4021_v50, %v4021_v50  ;;  %v4275_v0 = vsel %vm336_vm6, %v4021_v50, 0.0 }
 0x20b   : > { %v5294_v54 = vpop.f32.mrb[60].mxu1  ;;  %4230 = vst.msk [vmem:[%s6908_s9 + $0x48] sm:$0xf] %vm4211_vm8, %v5086_v26  ;;  %v4329_v4 = vmul.f32 %v4021_v50, %v4021_v50  ;;  %v5087_v59 = vpack.c.bf16 %v4032_v56, %v4032_v56  ;;  %v4373_v2 = vadd.f32 %v4372_v48, %v4371_v52  ;;  %v4374_v5 = vsel %vm336_vm6, %v4328_v42, 0.0 }
 0x20c   : > { %v5295_v29 = vpop.f32.mrb[61].mxu1  ;;  %v4274_v9 = vadd.f32 %v4273_v19, %v4272_v43  ;;  %4228 = vst.msk [vmem:[%s6908_s9 + $0x40] sm:$0xf] %vm4211_vm8, %v5084_v60  ;;  %v5085_v15 = vpack.c.bf16 %v4024_v36, %v4024_v36  ;;  %v4277_v61 = vsel %vm336_vm6, %v4024_v36, 0.0  ;;  %v4330_v40 = vmul.f32 %v4024_v36, %v4024_v36 }
 0x20d   : > { %v5296_v31 = vadd.f32 %v5295_v29, %v5294_v54  ;;  %v5297_v33 = vpop.f32.mrb[62].mxu1  ;;  %v4376_v30 = vsel %vm336_vm6, %v4329_v4, 0.0  ;;  %4231 = vst.msk [vmem:[%s6908_s9 + $0x4c] sm:$0xf] %vm4211_vm8, %v5087_v59  ;;  %v4375_v8 = vadd.f32 %v4374_v5, %v4373_v2  ;;  %v4279_v13 = vsel %vm336_vm6, %v4029_v22, 0.0 }
 0x20e   : > { %v5298_v6 = vpop.f32.mrb[63].mxu1  ;;  %v5374_v7 = vpop.f32.mrb[68].mxu0  ;;  %v4276_v10 = vadd.f32 %v4275_v0, %v4274_v9  ;;  %v4331_v3 = vmul.f32 %v4029_v22, %v4029_v22  ;;  %4229 = vst.msk [vmem:[%s6908_s9 + $0x44] sm:$0xf] %vm4211_vm8, %v5085_v15  ;;  %v4378_v47 = vsel %vm336_vm6, %v4330_v40, 0.0  ;;  %v4332_v24 = vmul.f32 %v4032_v56, %v4032_v56 }
 0x20f   : > { %v5299_v1 = vadd.f32 %v5298_v6, %v5297_v33  ;;  %v4036_v11 = vpop.f32.mrb[69].mxu0  ;;  %v3884_v16 = vadd.f32 %v5296_v31, %v6891_v25  ;;  %v4377_v28 = vadd.f32 %v4376_v30, %v4375_v8  ;;  %v4281_v39 = vsel %vm336_vm6, %v4032_v56, 0.0 }
 0x210   : > { %v4037_v12 = vadd.f32 %v4036_v11, %v3876_v63  ;;  %v5375_v20 = vpop.f32.mrb[70].mxu0  ;;  %v4278_v57 = vadd.f32 %v4277_v61, %v4276_v10  ;;  %v4380_v63 = vsel %vm336_vm6, %v4331_v3, 0.0  ;;  %v4382_v36 = vsel %vm336_vm6, %v4332_v24, 0.0 }
 0x211   : > { %v3887_v32 = vadd.f32 %v5299_v1, %v6896_v62  ;;  %v4039_v17 = vpop.f32.mrb[71].mxu0  ;;  %v4045_v45 = vadd.f32 %v5374_v7, %v3884_v16  ;;  %v4379_v22 = vadd.f32 %v4378_v47, %v4377_v28 }
 0x212   : > { %v5088_v35 = vpack.c.bf16 %v4037_v12, %v4037_v12  ;;  %v4333_v44 = vmul.f32 %v4037_v12, %v4037_v12  ;;  %v4280_v21 = vadd.f32 %v4279_v13, %v4278_v57  ;;  %v4040_v25 = vadd.f32 %v4039_v17, %v3879_v58 }
 0x213   : > { %v5300_v55 = vpop.f32.mrb[64].mxu1  ;;  %v4048_v14 = vadd.f32 %v5375_v20, %v3887_v32  ;;  %v5090_v42 = vpack.c.bf16 %v4045_v45, %v4045_v45  ;;  %v4283_v62 = vsel %vm336_vm6, %v4037_v12, 0.0  ;;  %v4381_v53 = vadd.f32 %v4380_v63, %v4379_v22 }
 0x214   : > { %v5301_v48 = vpop.f32.mrb[65].mxu1  ;;  %4232 = vst.msk [vmem:[%s6908_s9 + $0x50] sm:$0xf] %vm4211_vm8, %v5088_v35  ;;  %v4282_v34 = vadd.f32 %v4281_v39, %v4280_v21  ;;  %v4335_v43 = vmul.f32 %v4045_v45, %v4045_v45  ;;  %v4384_v56 = vsel %vm336_vm6, %v4333_v44, 0.0  ;;  %v5089_v52 = vpack.c.bf16 %v4040_v25, %v4040_v25 }
 0x215   : > { %v5302_v26 = vadd.f32 %v5301_v48, %v5300_v55  ;;  %v5303_v46 = vpop.f32.mrb[66].mxu1  ;;  %v5091_v50 = vpack.c.bf16 %v4048_v14, %v4048_v14  ;;  %4234 = vst.msk [vmem:[%s6908_s9 + $0x58] sm:$0xf] %vm4211_vm8, %v5090_v42  ;;  %v4383_v29 = vadd.f32 %v4382_v36, %v4381_v53  ;;  %v4285_v60 = vsel %vm336_vm6, %v4040_v25, 0.0 }
 0x216   : > { %v5304_v19 = vpop.f32.mrb[67].mxu1  ;;  %v4284_v58 = vadd.f32 %v4283_v62, %v4282_v34  ;;  %v5378_v0 = vpop.f32.mrb[72].mxu0  ;;  %4233 = vst.msk [vmem:[%s6908_s9 + $0x54] sm:$0xf] %vm4211_vm8, %v5089_v52  ;;  %v4334_v4 = vmul.f32 %v4040_v25, %v4040_v25  ;;  %v4287_v6 = vsel %vm336_vm6, %v4045_v45, 0.0  ;;  %v4336_v30 = vmul.f32 %v4048_v14, %v4048_v14 }
 0x217   : > { %v5305_v54 = vadd.f32 %v5304_v19, %v5303_v46  ;;  %4235 = vst.msk [vmem:[%s6908_s9 + $0x5c] sm:$0xf] %vm4211_vm8, %v5091_v50  ;;  %v3892_v59 = vadd.f32 %v5302_v26, %v6805_v23  ;;  %v4052_v2 = vpop.f32.mrb[73].mxu0  ;;  %v4385_v31 = vadd.f32 %v4384_v56, %v4383_v29  ;;  %v4388_v1 = vsel %vm336_vm6, %v4335_v43, 0.0 }
 0x218   : > { %v4286_v33 = vadd.f32 %v4285_v60, %v4284_v58  ;;  %v5379_v9 = vpop.f32.mrb[74].mxu0  ;;  %v4386_v15 = vsel %vm336_vm6, %v4334_v4, 0.0  ;;  %v4289_v11 = vsel %vm336_vm6, %v4048_v14, 0.0  ;;  %v4390_v32 = vsel %vm336_vm6, %v4336_v30, 0.0 }
 0x219   : > { %v3895_v5 = vadd.f32 %v5305_v54, %v6807_v27  ;;  %v4053_v61 = vadd.f32 %v4052_v2, %v3892_v59  ;;  %v4055_v7 = vpop.f32.mrb[75].mxu0  ;;  %v4387_v8 = vadd.f32 %v4386_v15, %v4385_v31 }
 0x21a   : > { %v4288_v10 = vadd.f32 %v4287_v6, %v4286_v33 }
 0x21b   : > { %v5306_v40 = vpop.f32.mrb[68].mxu1  ;;  %v4056_v23 = vadd.f32 %v4055_v7, %v3895_v5  ;;  %v5092_v3 = vpack.c.bf16 %v4053_v61, %v4053_v61  ;;  %v4291_v27 = vsel %vm336_vm6, %v4053_v61, 0.0  ;;  %v4337_v16 = vmul.f32 %v4053_v61, %v4053_v61 }
 0x21c   : > { %v5307_v13 = vpop.f32.mrb[69].mxu1  ;;  %v4389_v12 = vadd.f32 %v4388_v1, %v4387_v8  ;;  %v4290_v57 = vadd.f32 %v4289_v11, %v4288_v10 }
 0x21d   : > { %v5308_v20 = vadd.f32 %v5307_v13, %v5306_v40  ;;  %v5309_v28 = vpop.f32.mrb[70].mxu1  ;;  %v5093_v47 = vpack.c.bf16 %v4056_v23, %v4056_v23  ;;  %4236 = vst.msk [vmem:[%s6908_s9 + $0x60] sm:$0xf] %vm4211_vm8, %v5092_v3  ;;  %v4392_v24 = vsel %vm336_vm6, %v4337_v16, 0.0  ;;  %v4293_v45 = vsel %vm336_vm6, %v4056_v23, 0.0 }
 0x21e   : > { %v5310_v17 = vpop.f32.mrb[71].mxu1  ;;  %v4338_v35 = vmul.f32 %v4056_v23, %v4056_v23  ;;  %v4292_v22 = vadd.f32 %v4291_v27, %v4290_v57  ;;  %v4391_v55 = vadd.f32 %v4390_v32, %v4389_v12  ;;  %v5382_v14 = vpop.f32.mrb[76].mxu0 }
 0x21f   : > { %v5311_v44 = vadd.f32 %v5310_v17, %v5309_v28  ;;  %v3900_v21 = vadd.f32 %v5308_v20, %v6813_v37  ;;  %4237 = vst.msk [vmem:[%s6908_s9 + $0x64] sm:$0xf] %vm4211_vm8, %v5093_v47  ;;  %v4068_v63 = vpop.f32.mrb[77].mxu0 }
 0x220   : > { %v4394_v25 = vsel %vm336_vm6, %v4338_v35, 0.0  ;;  %v4393_v48 = vadd.f32 %v4392_v24, %v4391_v55  ;;  %v4294_v62 = vadd.f32 %v4293_v45, %v4292_v22  ;;  %v5383_v53 = vpop.f32.mrb[78].mxu0 }
 0x221   : > { %v4061_v39 = vadd.f32 %v5378_v0, %v3900_v21  ;;  %v3903_v42 = vadd.f32 %v5311_v44, %v6815_v41  ;;  %v4071_v26 = vpop.f32.mrb[79].mxu0 }
 0x222   : > { %v4395_v43 = vadd.f32 %v4394_v25, %v4393_v48 }
 0x223   : > { %v5094_v46 = vpack.c.bf16 %v4061_v39, %v4061_v39  ;;  %v4295_v34 = vsel %vm336_vm6, %v4061_v39, 0.0  ;;  %v4339_v37 = vmul.f32 %v4061_v39, %v4061_v39  ;;  %v4064_v50 = vadd.f32 %v5379_v9, %v3903_v42  ;;  %v5312_v36 = vpop.f32.mrb[72].mxu1 }
 0x224   : > { %v4296_v19 = vadd.f32 %v4295_v34, %v4294_v62  ;;  %v5313_v56 = vpop.f32.mrb[73].mxu1 }
 0x225   : > { %4238 = vst.msk [vmem:[%s6908_s9 + $0x68] sm:$0xf] %vm4211_vm8, %v5094_v46  ;;  %v4396_v52 = vsel %vm336_vm6, %v4339_v37, 0.0  ;;  %v5095_v54 = vpack.c.bf16 %v4064_v50, %v4064_v50  ;;  %v4297_v41 = vsel %vm336_vm6, %v4064_v50, 0.0  ;;  %v4340_v58 = vmul.f32 %v4064_v50, %v4064_v50  ;;  %v5315_v29 = vpop.f32.mrb[74].mxu1 }
 0x226   : > { %v4397_v60 = vadd.f32 %v4396_v52, %v4395_v43  ;;  %v5314_v0 = vadd.f32 %v5313_v56, %v5312_v36  ;;  %v5316_v4 = vpop.f32.mrb[75].mxu1  ;;  %v4298_v59 = vadd.f32 %v4297_v41, %v4296_v19 }
 0x227   : > { %4239 = vst.msk [vmem:[%s6908_s9 + $0x6c] sm:$0xf] %vm4211_vm8, %v5095_v54  ;;  %v4398_v2 = vsel %vm336_vm6, %v4340_v58, 0.0  ;;  %v5317_v31 = vadd.f32 %v5316_v4, %v5315_v29 }
 0x228   : > { %v3908_v33 = vadd.f32 %v5314_v0, %v6819_v49  ;;  %v4399_v9 = vadd.f32 %v4398_v2, %v4397_v60 }
 0x229   : > { %v3911_v5 = vadd.f32 %v5317_v31, %v6823_v51 }
 0x22a   : > { %v4069_v6 = vadd.f32 %v4068_v63, %v3908_v33 }
 0x22b   : > { %v4072_v30 = vadd.f32 %v4071_v26, %v3911_v5  ;;  %v5318_v15 = vpop.f32.mrb[76].mxu1 }
 0x22c   : > { %v5096_v61 = vpack.c.bf16 %v4069_v6, %v4069_v6  ;;  %v4299_v7 = vsel %vm336_vm6, %v4069_v6, 0.0  ;;  %v4341_v1 = vmul.f32 %v4069_v6, %v4069_v6  ;;  %v5319_v10 = vpop.f32.mrb[77].mxu1 }
 0x22d   : > { %v4300_v8 = vadd.f32 %v4299_v7, %v4298_v59  ;;  %v5097_v40 = vpack.c.bf16 %v4072_v30, %v4072_v30  ;;  %v4301_v23 = vsel %vm336_vm6, %v4072_v30, 0.0  ;;  %v4342_v11 = vmul.f32 %v4072_v30, %v4072_v30  ;;  %v5321_v13 = vpop.f32.mrb[78].mxu1 }
 0x22e   : > { %4240 = vst.msk [vmem:[%s6908_s9 + $0x70] sm:$0xf] %vm4211_vm8, %v5096_v61  ;;  %v4400_v49 = vsel %vm336_vm6, %v4341_v1, 0.0  ;;  %v5320_v51 = vadd.f32 %v5319_v10, %v5318_v15  ;;  %v5322_v3 = vpop.f32.mrb[79].mxu1 }
 0x22f   : > { %v4401_v27 = vadd.f32 %v4400_v49, %v4399_v9  ;;  %4241 = vst.msk [vmem:[%s6908_s9 + $0x74] sm:$0xf] %vm4211_vm8, %v5097_v40  ;;  %v4302_v16 = vadd.f32 %v4301_v23, %v4300_v8  ;;  %v4402_v12 = vsel %vm336_vm6, %v4342_v11, 0.0  ;;  %v5323_v20 = vadd.f32 %v5322_v3, %v5321_v13 }
 0x230   : > { %v3916_v28 = vadd.f32 %v5320_v51, %v6829_v38 }
 0x231   : > { %v4403_v57 = vadd.f32 %v4402_v12, %v4401_v27  ;;  %v3919_v47 = vadd.f32 %v5323_v20, %v6831_v18 }
 0x232   : > { %v4077_v32 = vadd.f32 %v5382_v14, %v3916_v28 }
 0x233   : > { %v4080_v17 = vadd.f32 %v5383_v53, %v3919_v47 }
 0x234   : > { %v5098_v24 = vpack.c.bf16 %v4077_v32, %v4077_v32  ;;  %v4303_v45 = vsel %vm336_vm6, %v4077_v32, 0.0  ;;  %v4343_v35 = vmul.f32 %v4077_v32, %v4077_v32 }
 0x235   : > { %v4304_v44 = vadd.f32 %v4303_v45, %v4302_v16  ;;  %v5099_v21 = vpack.c.bf16 %v4080_v17, %v4080_v17  ;;  %v4305_v22 = vsel %vm336_vm6, %v4080_v17, 0.0  ;;  %v4344_v55 = vmul.f32 %v4080_v17, %v4080_v17 }
 0x236   : > { %4242 = vst.msk [vmem:[%s6908_s9 + $0x78] sm:$0xf] %vm4211_vm8, %v5098_v24  ;;  %v4404_v25 = vsel %vm336_vm6, %v4343_v35, 0.0 }
 0x237   : > { %4243 = vst.msk [vmem:[%s6908_s9 + $0x7c] sm:$0xf] %vm4211_vm8, %v5099_v21  ;;  %v4306_v38 = vadd.f32 %v4305_v22, %v4304_v44  ;;  %v4405_v18 = vadd.f32 %v4404_v25, %v4403_v57  ;;  %v4406_v14 = vsel %vm336_vm6, %v4344_v55, 0.0 }
 0x239   : > { %v4407_v63 = vadd.f32 %v4406_v14, %v4405_v18  ;;  %v4307_v46 = vrot.slane %v4306_v38, 4 }
 0x23b   : > { %v4408_v39 = vrot.slane %v4407_v63, 4  ;;  %v4308_v34 = vadd.f32 %v4307_v46, %v4306_v38 }
 0x23d   : > { %v4409_v48 = vadd.f32 %v4408_v39, %v4407_v63  ;;  %v4309_v37 = vrot.slane %v4308_v34, 2 }
 0x23f   : > { %v4410_v42 = vrot.slane %v4409_v48, 2  ;;  %v4310_v50 = vadd.f32 %v4309_v37, %v4308_v34 }
 0x241   : > { %v4411_v62 = vadd.f32 %v4410_v42, %v4409_v48  ;;  %v4311_v36 = vrot.slane %v4310_v50, 1 }
 0x243   : > { %v4412_v53 = vrot.slane %v4411_v62, 1  ;;  %v4312_v19 = vadd.f32 %v4311_v36, %v4310_v50 }
 0x245   : > { %v4413_v26 = vadd.f32 %v4412_v53, %v4411_v62 }
 0x247   : > { %4415 = vrot.lane.b32.xlu0 %v4413_v26, %s5534_s25 }
 0x2b9   : > { %v4416_v43 = vpop.permute.xlu0 %4415 }
 0x2ba   : > { %v4418_v56 = vsel %vm336_vm6, %v4312_v19, %v4416_v43 }
 0x2bb   : > { %4419 = vst [vmem:[%s201_s17] sm:$0x1] %v4418_v56 }
 0x2bc PF: > { %s14_s14 = sadd.s32 1, %s5532_s14   ;;  %s7107_s12 = smov %s5528_s13 }
 0x2bd   : > { %p11_p6 = scmp.ge.s32.totalorder %s14_s14, 4   ;;  %s7108_s13 = smov %s7110_s15 }
 0x2bf   :  { %13 = sbr.rel (!%p11_p6) target bundleno = 2 (0x2), region = 73 }

</bundles_post_ra>
